<compile_context>
chip_gen: v7x
topology: tpu7x:2x2x1
jax: 0.10.0
libtpu: 0.0.40
codegen_flags: <defaults>
</compile_context>

<pallas_src>
import numpy as np
import jax
import jax.numpy as jnp
from jax.experimental import pallas as pl
from jax.experimental.pallas import tpu as pltpu


# --------------------------- Pallas kernel ---------------------------------
def _conv2x2_bn_relu_kernel(x_ref, v_ref, b_ref, o_ref):
    """One image of a 3x3/stride-2 conv expressed as a 2x2/stride-1 conv.

    x_ref : (Hp, Wp, 4*Cin)  bf16   padded + 2x2 space-to-depth activation
    v_ref : (4, 4*Cin, Cout) bf16   tap weights (BN scale folded in)
    b_ref : (1, Cout)        f32    folded BN shift
    o_ref : (Ho*Wo, Cout)    bf16   Ho = Hp-1, Wo = Wp-1
    """
    Hp, Wp, _ = x_ref.shape
    Ho, Wo = Hp - 1, Wp - 1

    # Grid-invariant operands: load once, reuse across all output rows.
    v00 = v_ref[0]
    v01 = v_ref[1]
    v10 = v_ref[2]
    v11 = v_ref[3]
    bias = b_ref[...]                      # (1, Cout) f32

    for i in range(Ho):                    # static unroll; Ho is small per image
        # tap (dI, dJ): rows i+dI, columns dJ .. dJ+Wo of the sd-packed input.
        acc = jnp.dot(x_ref[i, 0:Wo, :], v00,
                      preferred_element_type=jnp.float32)
        acc += jnp.dot(x_ref[i, 1:Wo + 1, :], v01,
                       preferred_element_type=jnp.float32)
        acc += jnp.dot(x_ref[i + 1, 0:Wo, :], v10,
                       preferred_element_type=jnp.float32)
        acc += jnp.dot(x_ref[i + 1, 1:Wo + 1, :], v11,
                       preferred_element_type=jnp.float32)
        o_ref[i * Wo:(i + 1) * Wo, :] = jnp.maximum(acc + bias, 0.0).astype(o_ref.dtype)


# --------------------------- per-block wrapper ------------------------------
def _conv_bn_relu_block(x_nhwc, w, gamma, beta, rmean, rvar, eps):
    """conv3x3(stride=2, pad=1, bias=False) + BatchNorm2d(eval) + ReLU.

    x_nhwc : (N, H, W, Cin) bf16 activation (H, W even)
    w      : (Cout, Cin, 3, 3)  PyTorch conv weight
    returns (N, Ho, Wo, Cout) bf16
    """
    N, H, W, Cin = x_nhwc.shape
    assert H % 2 == 0 and W % 2 == 0, "stride-2 blocks expect even spatial dims"
    Cout = w.shape[0]
    Ho, Wo = H // 2, W // 2
    Hp, Wp = Ho + 1, Wo + 1
    K4 = 4 * Cin

    # ---- fold BatchNorm (inference) + repack 3x3 weights into 4 tap matrices ----
    s = gamma / jnp.sqrt(rvar + eps)                                   # (Cout,)
    w_s = jnp.transpose(w, (2, 3, 1, 0)).astype(jnp.float32) * s       # (3,3,Cin,Cout)
    wz = jnp.pad(w_s, ((0, 1), (0, 1), (0, 0), (0, 0)))                # (4,4,Cin,Cout)
    taps = []
    for di in (0, 1):
        for dj in (0, 1):
            taps.append(jnp.concatenate(
                [wz[2 * di + ph, 2 * dj + pw] for ph in (0, 1) for pw in (0, 1)],
                axis=0))                                               # (4*Cin, Cout)
    v = jnp.stack(taps, axis=0).astype(jnp.bfloat16)                   # (4, K4, Cout)
    b = (beta - rmean * s).astype(jnp.float32).reshape(1, Cout)

    # ---- zero-pad + 2x2 space-to-depth of the activation (pure layout, ~1x) ----
    xp = jnp.pad(x_nhwc, ((0, 0), (1, 1), (1, 1), (0, 0)))             # (N,H+2,W+2,Cin)
    xsd = jnp.concatenate(
        [xp[:, ph::2, pw::2, :] for ph in (0, 1) for pw in (0, 1)],
        axis=-1).astype(jnp.bfloat16)                                  # (N,Hp,Wp,4Cin)

    y = pl.pallas_call(
        _conv2x2_bn_relu_kernel,
        out_shape=jax.ShapeDtypeStruct((N, Ho * Wo, Cout), jnp.bfloat16),
        grid_spec=pltpu.PrefetchScalarGridSpec(
            num_scalar_prefetch=0,
            grid=(N,),
            in_specs=[
                pl.BlockSpec((None, Hp, Wp, K4), lambda n: (n, 0, 0, 0)),
                pl.BlockSpec((4, K4, Cout), lambda n: (0, 0, 0)),
                pl.BlockSpec((1, Cout), lambda n: (0, 0)),
            ],
            out_specs=pl.BlockSpec((None, Ho * Wo, Cout), lambda n: (n, 0, 0)),
        ),
        compiler_params=pltpu.CompilerParams(
            dimension_semantics=("parallel",),
            vmem_limit_bytes=32 * 1024 * 1024),
    )(xsd, v, b)
    return y.reshape(N, Ho, Wo, Cout)


@jax.jit
def encoder_simple(x, params):
    """Pallas implementation of EncoderSimple.forward.

    x      : (N, 3, H, W) NCHW, as in PyTorch.
    params : list of (w, gamma, beta, running_mean, running_var, eps) per block.
    returns (N, latent, H//16, W//16) NCHW, f32.
    """
    h = jnp.transpose(x, (0, 2, 3, 1)).astype(jnp.bfloat16)   # NCHW -> NHWC once
    for (w, gamma, beta, rmean, rvar, eps) in params:
        h = _conv_bn_relu_block(h, w, gamma, beta, rmean, rvar, eps)
    h = h.astype(jnp.float32)
    return jnp.transpose(h, (0, 3, 1, 2))                     # NHWC -> NCHW once


# --------------------------- numpy reference (PyTorch semantics) ------------
def _ref_conv_bn_relu(x, w, gamma, beta, rmean, rvar, eps):
    N, C, H, W = x.shape
    Cout = w.shape[0]
    Ho, Wo = (H + 1) // 2, (W + 1) // 2
    xp = np.pad(x, ((0, 0), (0, 0), (1, 1), (1, 1)))
    out = np.zeros((N, Cout, Ho, Wo))
    for kh in range(3):
        for kw in range(3):
            patch = xp[:, :, kh:kh + 2 * Ho:2, kw:kw + 2 * Wo:2]       # (N,C,Ho,Wo)
            out += np.einsum('nchw,oc->nohw', patch, w[:, :, kh, kw])
    out = (out - rmean[None, :, None, None]) / np.sqrt(rvar[None, :, None, None] + eps)
    out = out * gamma[None, :, None, None] + beta[None, :, None, None]
    return np.maximum(out, 0.0)


def ref_encoder(x, params):
    h = np.asarray(x, np.float64)
    for (w, gamma, beta, rmean, rvar, eps) in params:
        h = _ref_conv_bn_relu(h,
                              np.asarray(w, np.float64),
                              np.asarray(gamma, np.float64),
                              np.asarray(beta, np.float64),
                              np.asarray(rmean, np.float64),
                              np.asarray(rvar, np.float64),
                              float(eps))
    return h


# --------------------------- test -------------------------------------------
if __name__ == "__main__":
    key = jax.random.PRNGKey(0)
    latent = 128
    N, Cin0, H, W = 2, 3, 16, 16
    channels = [Cin0, latent // 8, latent // 4, latent // 2, latent]

    keys = jax.random.split(key, 1 + 5 * 4)
    x = jax.random.normal(keys[0], (N, Cin0, H, W), jnp.float32)

    params = []
    ki = 1
    for li in range(4):
        cin, cout = channels[li], channels[li + 1]
        w = jax.random.normal(keys[ki], (cout, cin, 3, 3), jnp.float32) / np.sqrt(9.0 * cin)
        gamma = 0.8 + 0.4 * jax.random.uniform(keys[ki + 1], (cout,), jnp.float32)
        beta = 0.1 * jax.random.normal(keys[ki + 2], (cout,), jnp.float32)
        rmean = 0.1 * jax.random.normal(keys[ki + 3], (cout,), jnp.float32)
        rvar = 0.8 + 0.4 * jax.random.uniform(keys[ki + 4], (cout,), jnp.float32)
        params.append((w, gamma, beta, rmean, rvar, 1e-5))
        ki += 5

    y = encoder_simple(x, params)
    y = jax.block_until_ready(y)
    assert y.shape == (N, latent, H // 16, W // 16), y.shape

    y_ref = ref_encoder(np.asarray(x), params)
    np.testing.assert_allclose(np.asarray(y), y_ref, rtol=5e-2, atol=5e-2)
    print("KERNEL_OK")
</pallas_src>

<mosaic_0001>
module attributes {stable_mosaic.version = 11 : i64} {
  func.func @_conv2x2_bn_relu_kernel(%arg0: i32, %arg1: memref<1x9x9x12xbf16, #tpu.memory_space<vmem>>, %arg2: memref<4x12x16xbf16, #tpu.memory_space<vmem>>, %arg3: memref<1x16xf32, #tpu.memory_space<vmem>>, %arg4: memref<1x64x16xbf16, #tpu.memory_space<vmem>>) attributes {dimension_semantics = [#tpu.dimension_semantics<parallel>], iteration_bounds = array<i64: 2>, scalar_prefetch = 0 : i64, scratch_operands = 0 : i64, tpu.core_type = #tpu.core_type<tc>, window_params = [{transform_indices = @transform_0, window_bounds = array<i64: 1, 9, 9, 12>}, {pipeline_mode = #tpu.pipeline_mode<synchronous>, transform_indices = @transform_1, window_bounds = array<i64: 4, 12, 16>}, {pipeline_mode = #tpu.pipeline_mode<synchronous>, transform_indices = @transform_2, window_bounds = array<i64: 1, 16>}, {transform_indices = @transform_3, window_bounds = array<i64: 1, 64, 16>}]} {
    %c0 = arith.constant 0 : index
    %c0_0 = arith.constant 0 : index
    %c0_1 = arith.constant 0 : index
    %0 = vector.load %arg2[%c0, %c0_0, %c0_1] : memref<4x12x16xbf16, #tpu.memory_space<vmem>>, vector<1x12x16xbf16>
    %1 = vector.shape_cast %0 : vector<1x12x16xbf16> to vector<12x16xbf16>
    %c1 = arith.constant 1 : index
    %c0_2 = arith.constant 0 : index
    %c0_3 = arith.constant 0 : index
    %2 = vector.load %arg2[%c1, %c0_2, %c0_3] : memref<4x12x16xbf16, #tpu.memory_space<vmem>>, vector<1x12x16xbf16>
    %3 = vector.shape_cast %2 : vector<1x12x16xbf16> to vector<12x16xbf16>
    %c2 = arith.constant 2 : index
    %c0_4 = arith.constant 0 : index
    %c0_5 = arith.constant 0 : index
    %4 = vector.load %arg2[%c2, %c0_4, %c0_5] : memref<4x12x16xbf16, #tpu.memory_space<vmem>>, vector<1x12x16xbf16>
    %5 = vector.shape_cast %4 : vector<1x12x16xbf16> to vector<12x16xbf16>
    %c3 = arith.constant 3 : index
    %c0_6 = arith.constant 0 : index
    %c0_7 = arith.constant 0 : index
    %6 = vector.load %arg2[%c3, %c0_6, %c0_7] : memref<4x12x16xbf16, #tpu.memory_space<vmem>>, vector<1x12x16xbf16>
    %7 = vector.shape_cast %6 : vector<1x12x16xbf16> to vector<12x16xbf16>
    %c0_8 = arith.constant 0 : index
    %c0_9 = arith.constant 0 : index
    %8 = vector.load %arg3[%c0_8, %c0_9] : memref<1x16xf32, #tpu.memory_space<vmem>>, vector<1x16xf32>
    %c0_10 = arith.constant 0 : index
    %c0_11 = arith.constant 0 : index
    %c0_12 = arith.constant 0 : index
    %c0_13 = arith.constant 0 : index
    %9 = vector.load %arg1[%c0_10, %c0_11, %c0_12, %c0_13] : memref<1x9x9x12xbf16, #tpu.memory_space<vmem>>, vector<1x1x8x12xbf16>
    %10 = vector.shape_cast %9 : vector<1x1x8x12xbf16> to vector<8x12xbf16>
    %cst = arith.constant dense<0.000000e+00> : vector<8x16xf32>
    %11 = tpu.matmul %10, %1, %cst {dimension_numbers = #tpu.dot_dimension_numbers<[1], [0], [0], [1], [0, 0, 1, 1], [], []>} : vector<8x12xbf16>, vector<12x16xbf16>, vector<8x16xf32> -> vector<8x16xf32>
    %c0_14 = arith.constant 0 : index
    %c0_15 = arith.constant 0 : index
    %c1_16 = arith.constant 1 : index
    %c0_17 = arith.constant 0 : index
    %12 = vector.load %arg1[%c0_14, %c0_15, %c1_16, %c0_17] : memref<1x9x9x12xbf16, #tpu.memory_space<vmem>>, vector<1x1x8x12xbf16>
    %13 = vector.shape_cast %12 : vector<1x1x8x12xbf16> to vector<8x12xbf16>
    %cst_18 = arith.constant dense<0.000000e+00> : vector<8x16xf32>
    %14 = tpu.matmul %13, %3, %cst_18 {dimension_numbers = #tpu.dot_dimension_numbers<[1], [0], [0], [1], [0, 0, 1, 1], [], []>} : vector<8x12xbf16>, vector<12x16xbf16>, vector<8x16xf32> -> vector<8x16xf32>
    %15 = arith.addf %11, %14 : vector<8x16xf32>
    %c0_19 = arith.constant 0 : index
    %c1_20 = arith.constant 1 : index
    %c0_21 = arith.constant 0 : index
    %c0_22 = arith.constant 0 : index
    %16 = vector.load %arg1[%c0_19, %c1_20, %c0_21, %c0_22] : memref<1x9x9x12xbf16, #tpu.memory_space<vmem>>, vector<1x1x8x12xbf16>
    %17 = vector.shape_cast %16 : vector<1x1x8x12xbf16> to vector<8x12xbf16>
    %cst_23 = arith.constant dense<0.000000e+00> : vector<8x16xf32>
    %18 = tpu.matmul %17, %5, %cst_23 {dimension_numbers = #tpu.dot_dimension_numbers<[1], [0], [0], [1], [0, 0, 1, 1], [], []>} : vector<8x12xbf16>, vector<12x16xbf16>, vector<8x16xf32> -> vector<8x16xf32>
    %19 = arith.addf %15, %18 : vector<8x16xf32>
    %c0_24 = arith.constant 0 : index
    %c1_25 = arith.constant 1 : index
    %c1_26 = arith.constant 1 : index
    %c0_27 = arith.constant 0 : index
    %20 = vector.load %arg1[%c0_24, %c1_25, %c1_26, %c0_27] : memref<1x9x9x12xbf16, #tpu.memory_space<vmem>>, vector<1x1x8x12xbf16>
    %21 = vector.shape_cast %20 : vector<1x1x8x12xbf16> to vector<8x12xbf16>
    %cst_28 = arith.constant dense<0.000000e+00> : vector<8x16xf32>
    %22 = tpu.matmul %21, %7, %cst_28 {dimension_numbers = #tpu.dot_dimension_numbers<[1], [0], [0], [1], [0, 0, 1, 1], [], []>} : vector<8x12xbf16>, vector<12x16xbf16>, vector<8x16xf32> -> vector<8x16xf32>
    %23 = arith.addf %19, %22 : vector<8x16xf32>
    %24 = vector.broadcast %8 : vector<1x16xf32> to vector<8x16xf32>
    %25 = arith.addf %23, %24 : vector<8x16xf32>
    %cst_29 = arith.constant 0.000000e+00 : f32
    %26 = vector.broadcast %cst_29 : f32 to vector<8x16xf32>
    %27 = arith.maximumf %25, %26 : vector<8x16xf32>
    %28 = arith.truncf %27 : vector<8x16xf32> to vector<8x16xbf16>
    %c0_30 = arith.constant 0 : index
    %c0_31 = arith.constant 0 : index
    %c0_32 = arith.constant 0 : index
    %29 = vector.load %arg4[%c0_30, %c0_31, %c0_32] : memref<1x64x16xbf16, #tpu.memory_space<vmem>>, vector<1x8x16xbf16>
    %30 = vector.shape_cast %29 : vector<1x8x16xbf16> to vector<8x16xbf16>
    %31 = vector.shape_cast %28 : vector<8x16xbf16> to vector<1x8x16xbf16>
    tpu.vector_store %arg4[%c0_30, %c0_31, %c0_32], %31 {strides = array<i32>} : memref<1x64x16xbf16, #tpu.memory_space<vmem>>, vector<1x8x16xbf16>,
    %c0_33 = arith.constant 0 : index
    %c1_34 = arith.constant 1 : index
    %c0_35 = arith.constant 0 : index
    %c0_36 = arith.constant 0 : index
    %32 = vector.load %arg1[%c0_33, %c1_34, %c0_35, %c0_36] : memref<1x9x9x12xbf16, #tpu.memory_space<vmem>>, vector<1x1x8x12xbf16>
    %33 = vector.shape_cast %32 : vector<1x1x8x12xbf16> to vector<8x12xbf16>
    %cst_37 = arith.constant dense<0.000000e+00> : vector<8x16xf32>
    %34 = tpu.matmul %33, %1, %cst_37 {dimension_numbers = #tpu.dot_dimension_numbers<[1], [0], [0], [1], [0, 0, 1, 1], [], []>} : vector<8x12xbf16>, vector<12x16xbf16>, vector<8x16xf32> -> vector<8x16xf32>
    %c0_38 = arith.constant 0 : index
    %c1_39 = arith.constant 1 : index
    %c1_40 = arith.constant 1 : index
    %c0_41 = arith.constant 0 : index
    %35 = vector.load %arg1[%c0_38, %c1_39, %c1_40, %c0_41] : memref<1x9x9x12xbf16, #tpu.memory_space<vmem>>, vector<1x1x8x12xbf16>
    %36 = vector.shape_cast %35 : vector<1x1x8x12xbf16> to vector<8x12xbf16>
    %cst_42 = arith.constant dense<0.000000e+00> : vector<8x16xf32>
    %37 = tpu.matmul %36, %3, %cst_42 {dimension_numbers = #tpu.dot_dimension_numbers<[1], [0], [0], [1], [0, 0, 1, 1], [], []>} : vector<8x12xbf16>, vector<12x16xbf16>, vector<8x16xf32> -> vector<8x16xf32>
    %38 = arith.addf %34, %37 : vector<8x16xf32>
    %c0_43 = arith.constant 0 : index
    %c2_44 = arith.constant 2 : index
    %c0_45 = arith.constant 0 : index
    %c0_46 = arith.constant 0 : index
    %39 = vector.load %arg1[%c0_43, %c2_44, %c0_45, %c0_46] : memref<1x9x9x12xbf16, #tpu.memory_space<vmem>>, vector<1x1x8x12xbf16>
    %40 = vector.shape_cast %39 : vector<1x1x8x12xbf16> to vector<8x12xbf16>
    %cst_47 = arith.constant dense<0.000000e+00> : vector<8x16xf32>
    %41 = tpu.matmul %40, %5, %cst_47 {dimension_numbers = #tpu.dot_dimension_numbers<[1], [0], [0], [1], [0, 0, 1, 1], [], []>} : vector<8x12xbf16>, vector<12x16xbf16>, vector<8x16xf32> -> vector<8x16xf32>
    %42 = arith.addf %38, %41 : vector<8x16xf32>
    %c0_48 = arith.constant 0 : index
    %c2_49 = arith.constant 2 : index
    %c1_50 = arith.constant 1 : index
    %c0_51 = arith.constant 0 : index
    %43 = vector.load %arg1[%c0_48, %c2_49, %c1_50, %c0_51] : memref<1x9x9x12xbf16, #tpu.memory_space<vmem>>, vector<1x1x8x12xbf16>
    %44 = vector.shape_cast %43 : vector<1x1x8x12xbf16> to vector<8x12xbf16>
    %cst_52 = arith.constant dense<0.000000e+00> : vector<8x16xf32>
    %45 = tpu.matmul %44, %7, %cst_52 {dimension_numbers = #tpu.dot_dimension_numbers<[1], [0], [0], [1], [0, 0, 1, 1], [], []>} : vector<8x12xbf16>, vector<12x16xbf16>, vector<8x16xf32> -> vector<8x16xf32>
    %46 = arith.addf %42, %45 : vector<8x16xf32>
    %47 = vector.broadcast %8 : vector<1x16xf32> to vector<8x16xf32>
    %48 = arith.addf %46, %47 : vector<8x16xf32>
    %cst_53 = arith.constant 0.000000e+00 : f32
    %49 = vector.broadcast %cst_53 : f32 to vector<8x16xf32>
    %50 = arith.maximumf %48, %49 : vector<8x16xf32>
    %51 = arith.truncf %50 : vector<8x16xf32> to vector<8x16xbf16>
    %c0_54 = arith.constant 0 : index
    %c8 = arith.constant 8 : index
    %c0_55 = arith.constant 0 : index
    %52 = vector.load %arg4[%c0_54, %c8, %c0_55] : memref<1x64x16xbf16, #tpu.memory_space<vmem>>, vector<1x8x16xbf16>
    %53 = vector.shape_cast %52 : vector<1x8x16xbf16> to vector<8x16xbf16>
    %54 = vector.shape_cast %51 : vector<8x16xbf16> to vector<1x8x16xbf16>
    tpu.vector_store %arg4[%c0_54, %c8, %c0_55], %54 {strides = array<i32>} : memref<1x64x16xbf16, #tpu.memory_space<vmem>>, vector<1x8x16xbf16>,
    %c0_56 = arith.constant 0 : index
    %c2_57 = arith.constant 2 : index
    %c0_58 = arith.constant 0 : index
    %c0_59 = arith.constant 0 : index
    %55 = vector.load %arg1[%c0_56, %c2_57, %c0_58, %c0_59] : memref<1x9x9x12xbf16, #tpu.memory_space<vmem>>, vector<1x1x8x12xbf16>
    %56 = vector.shape_cast %55 : vector<1x1x8x12xbf16> to vector<8x12xbf16>
    %cst_60 = arith.constant dense<0.000000e+00> : vector<8x16xf32>
    %57 = tpu.matmul %56, %1, %cst_60 {dimension_numbers = #tpu.dot_dimension_numbers<[1], [0], [0], [1], [0, 0, 1, 1], [], []>} : vector<8x12xbf16>, vector<12x16xbf16>, vector<8x16xf32> -> vector<8x16xf32>
    %c0_61 = arith.constant 0 : index
    %c2_62 = arith.constant 2 : index
    %c1_63 = arith.constant 1 : index
    %c0_64 = arith.constant 0 : index
    %58 = vector.load %arg1[%c0_61, %c2_62, %c1_63, %c0_64] : memref<1x9x9x12xbf16, #tpu.memory_space<vmem>>, vector<1x1x8x12xbf16>
    %59 = vector.shape_cast %58 : vector<1x1x8x12xbf16> to vector<8x12xbf16>
    %cst_65 = arith.constant dense<0.000000e+00> : vector<8x16xf32>
    %60 = tpu.matmul %59, %3, %cst_65 {dimension_numbers = #tpu.dot_dimension_numbers<[1], [0], [0], [1], [0, 0, 1, 1], [], []>} : vector<8x12xbf16>, vector<12x16xbf16>, vector<8x16xf32> -> vector<8x16xf32>
    %61 = arith.addf %57, %60 : vector<8x16xf32>
    %c0_66 = arith.constant 0 : index
    %c3_67 = arith.constant 3 : index
    %c0_68 = arith.constant 0 : index
    %c0_69 = arith.constant 0 : index
    %62 = vector.load %arg1[%c0_66, %c3_67, %c0_68, %c0_69] : memref<1x9x9x12xbf16, #tpu.memory_space<vmem>>, vector<1x1x8x12xbf16>
    %63 = vector.shape_cast %62 : vector<1x1x8x12xbf16> to vector<8x12xbf16>
    %cst_70 = arith.constant dense<0.000000e+00> : vector<8x16xf32>
    %64 = tpu.matmul %63, %5, %cst_70 {dimension_numbers = #tpu.dot_dimension_numbers<[1], [0], [0], [1], [0, 0, 1, 1], [], []>} : vector<8x12xbf16>, vector<12x16xbf16>, vector<8x16xf32> -> vector<8x16xf32>
    %65 = arith.addf %61, %64 : vector<8x16xf32>
    %c0_71 = arith.constant 0 : index
    %c3_72 = arith.constant 3 : index
    %c1_73 = arith.constant 1 : index
    %c0_74 = arith.constant 0 : index
    %66 = vector.load %arg1[%c0_71, %c3_72, %c1_73, %c0_74] : memref<1x9x9x12xbf16, #tpu.memory_space<vmem>>, vector<1x1x8x12xbf16>
    %67 = vector.shape_cast %66 : vector<1x1x8x12xbf16> to vector<8x12xbf16>
    %cst_75 = arith.constant dense<0.000000e+00> : vector<8x16xf32>
    %68 = tpu.matmul %67, %7, %cst_75 {dimension_numbers = #tpu.dot_dimension_numbers<[1], [0], [0], [1], [0, 0, 1, 1], [], []>} : vector<8x12xbf16>, vector<12x16xbf16>, vector<8x16xf32> -> vector<8x16xf32>
    %69 = arith.addf %65, %68 : vector<8x16xf32>
    %70 = vector.broadcast %8 : vector<1x16xf32> to vector<8x16xf32>
    %71 = arith.addf %69, %70 : vector<8x16xf32>
    %cst_76 = arith.constant 0.000000e+00 : f32
    %72 = vector.broadcast %cst_76 : f32 to vector<8x16xf32>
    %73 = arith.maximumf %71, %72 : vector<8x16xf32>
    %74 = arith.truncf %73 : vector<8x16xf32> to vector<8x16xbf16>
    %c0_77 = arith.constant 0 : index
    %c16 = arith.constant 16 : index
    %c0_78 = arith.constant 0 : index
    %75 = vector.load %arg4[%c0_77, %c16, %c0_78] : memref<1x64x16xbf16, #tpu.memory_space<vmem>>, vector<1x8x16xbf16>
    %76 = vector.shape_cast %75 : vector<1x8x16xbf16> to vector<8x16xbf16>
    %77 = vector.shape_cast %74 : vector<8x16xbf16> to vector<1x8x16xbf16>
    tpu.vector_store %arg4[%c0_77, %c16, %c0_78], %77 {strides = array<i32>} : memref<1x64x16xbf16, #tpu.memory_space<vmem>>, vector<1x8x16xbf16>,
    %c0_79 = arith.constant 0 : index
    %c3_80 = arith.constant 3 : index
    %c0_81 = arith.constant 0 : index
    %c0_82 = arith.constant 0 : index
    %78 = vector.load %arg1[%c0_79, %c3_80, %c0_81, %c0_82] : memref<1x9x9x12xbf16, #tpu.memory_space<vmem>>, vector<1x1x8x12xbf16>
    %79 = vector.shape_cast %78 : vector<1x1x8x12xbf16> to vector<8x12xbf16>
    %cst_83 = arith.constant dense<0.000000e+00> : vector<8x16xf32>
    %80 = tpu.matmul %79, %1, %cst_83 {dimension_numbers = #tpu.dot_dimension_numbers<[1], [0], [0], [1], [0, 0, 1, 1], [], []>} : vector<8x12xbf16>, vector<12x16xbf16>, vector<8x16xf32> -> vector<8x16xf32>
    %c0_84 = arith.constant 0 : index
    %c3_85 = arith.constant 3 : index
    %c1_86 = arith.constant 1 : index
    %c0_87 = arith.constant 0 : index
    %81 = vector.load %arg1[%c0_84, %c3_85, %c1_86, %c0_87] : memref<1x9x9x12xbf16, #tpu.memory_space<vmem>>, vector<1x1x8x12xbf16>
    %82 = vector.shape_cast %81 : vector<1x1x8x12xbf16> to vector<8x12xbf16>
    %cst_88 = arith.constant dense<0.000000e+00> : vector<8x16xf32>
    %83 = tpu.matmul %82, %3, %cst_88 {dimension_numbers = #tpu.dot_dimension_numbers<[1], [0], [0], [1], [0, 0, 1, 1], [], []>} : vector<8x12xbf16>, vector<12x16xbf16>, vector<8x16xf32> -> vector<8x16xf32>
    %84 = arith.addf %80, %83 : vector<8x16xf32>
    %c0_89 = arith.constant 0 : index
    %c4 = arith.constant 4 : index
    %c0_90 = arith.constant 0 : index
    %c0_91 = arith.constant 0 : index
    %85 = vector.load %arg1[%c0_89, %c4, %c0_90, %c0_91] : memref<1x9x9x12xbf16, #tpu.memory_space<vmem>>, vector<1x1x8x12xbf16>
    %86 = vector.shape_cast %85 : vector<1x1x8x12xbf16> to vector<8x12xbf16>
    %cst_92 = arith.constant dense<0.000000e+00> : vector<8x16xf32>
    %87 = tpu.matmul %86, %5, %cst_92 {dimension_numbers = #tpu.dot_dimension_numbers<[1], [0], [0], [1], [0, 0, 1, 1], [], []>} : vector<8x12xbf16>, vector<12x16xbf16>, vector<8x16xf32> -> vector<8x16xf32>
    %88 = arith.addf %84, %87 : vector<8x16xf32>
    %c0_93 = arith.constant 0 : index
    %c4_94 = arith.constant 4 : index
    %c1_95 = arith.constant 1 : index
    %c0_96 = arith.constant 0 : index
    %89 = vector.load %arg1[%c0_93, %c4_94, %c1_95, %c0_96] : memref<1x9x9x12xbf16, #tpu.memory_space<vmem>>, vector<1x1x8x12xbf16>
    %90 = vector.shape_cast %89 : vector<1x1x8x12xbf16> to vector<8x12xbf16>
    %cst_97 = arith.constant dense<0.000000e+00> : vector<8x16xf32>
    %91 = tpu.matmul %90, %7, %cst_97 {dimension_numbers = #tpu.dot_dimension_numbers<[1], [0], [0], [1], [0, 0, 1, 1], [], []>} : vector<8x12xbf16>, vector<12x16xbf16>, vector<8x16xf32> -> vector<8x16xf32>
    %92 = arith.addf %88, %91 : vector<8x16xf32>
    %93 = vector.broadcast %8 : vector<1x16xf32> to vector<8x16xf32>
    %94 = arith.addf %92, %93 : vector<8x16xf32>
    %cst_98 = arith.constant 0.000000e+00 : f32
    %95 = vector.broadcast %cst_98 : f32 to vector<8x16xf32>
    %96 = arith.maximumf %94, %95 : vector<8x16xf32>
    %97 = arith.truncf %96 : vector<8x16xf32> to vector<8x16xbf16>
    %c0_99 = arith.constant 0 : index
    %c24 = arith.constant 24 : index
    %c0_100 = arith.constant 0 : index
    %98 = vector.load %arg4[%c0_99, %c24, %c0_100] : memref<1x64x16xbf16, #tpu.memory_space<vmem>>, vector<1x8x16xbf16>
    %99 = vector.shape_cast %98 : vector<1x8x16xbf16> to vector<8x16xbf16>
    %100 = vector.shape_cast %97 : vector<8x16xbf16> to vector<1x8x16xbf16>
    tpu.vector_store %arg4[%c0_99, %c24, %c0_100], %100 {strides = array<i32>} : memref<1x64x16xbf16, #tpu.memory_space<vmem>>, vector<1x8x16xbf16>,
    %c0_101 = arith.constant 0 : index
    %c4_102 = arith.constant 4 : index
    %c0_103 = arith.constant 0 : index
    %c0_104 = arith.constant 0 : index
    %101 = vector.load %arg1[%c0_101, %c4_102, %c0_103, %c0_104] : memref<1x9x9x12xbf16, #tpu.memory_space<vmem>>, vector<1x1x8x12xbf16>
    %102 = vector.shape_cast %101 : vector<1x1x8x12xbf16> to vector<8x12xbf16>
    %cst_105 = arith.constant dense<0.000000e+00> : vector<8x16xf32>
    %103 = tpu.matmul %102, %1, %cst_105 {dimension_numbers = #tpu.dot_dimension_numbers<[1], [0], [0], [1], [0, 0, 1, 1], [], []>} : vector<8x12xbf16>, vector<12x16xbf16>, vector<8x16xf32> -> vector<8x16xf32>
    %c0_106 = arith.constant 0 : index
    %c4_107 = arith.constant 4 : index
    %c1_108 = arith.constant 1 : index
    %c0_109 = arith.constant 0 : index
    %104 = vector.load %arg1[%c0_106, %c4_107, %c1_108, %c0_109] : memref<1x9x9x12xbf16, #tpu.memory_space<vmem>>, vector<1x1x8x12xbf16>
    %105 = vector.shape_cast %104 : vector<1x1x8x12xbf16> to vector<8x12xbf16>
    %cst_110 = arith.constant dense<0.000000e+00> : vector<8x16xf32>
    %106 = tpu.matmul %105, %3, %cst_110 {dimension_numbers = #tpu.dot_dimension_numbers<[1], [0], [0], [1], [0, 0, 1, 1], [], []>} : vector<8x12xbf16>, vector<12x16xbf16>, vector<8x16xf32> -> vector<8x16xf32>
    %107 = arith.addf %103, %106 : vector<8x16xf32>
    %c0_111 = arith.constant 0 : index
    %c5 = arith.constant 5 : index
    %c0_112 = arith.constant 0 : index
    %c0_113 = arith.constant 0 : index
    %108 = vector.load %arg1[%c0_111, %c5, %c0_112, %c0_113] : memref<1x9x9x12xbf16, #tpu.memory_space<vmem>>, vector<1x1x8x12xbf16>
    %109 = vector.shape_cast %108 : vector<1x1x8x12xbf16> to vector<8x12xbf16>
    %cst_114 = arith.constant dense<0.000000e+00> : vector<8x16xf32>
    %110 = tpu.matmul %109, %5, %cst_114 {dimension_numbers = #tpu.dot_dimension_numbers<[1], [0], [0], [1], [0, 0, 1, 1], [], []>} : vector<8x12xbf16>, vector<12x16xbf16>, vector<8x16xf32> -> vector<8x16xf32>
    %111 = arith.addf %107, %110 : vector<8x16xf32>
    %c0_115 = arith.constant 0 : index
    %c5_116 = arith.constant 5 : index
    %c1_117 = arith.constant 1 : index
    %c0_118 = arith.constant 0 : index
    %112 = vector.load %arg1[%c0_115, %c5_116, %c1_117, %c0_118] : memref<1x9x9x12xbf16, #tpu.memory_space<vmem>>, vector<1x1x8x12xbf16>
    %113 = vector.shape_cast %112 : vector<1x1x8x12xbf16> to vector<8x12xbf16>
    %cst_119 = arith.constant dense<0.000000e+00> : vector<8x16xf32>
    %114 = tpu.matmul %113, %7, %cst_119 {dimension_numbers = #tpu.dot_dimension_numbers<[1], [0], [0], [1], [0, 0, 1, 1], [], []>} : vector<8x12xbf16>, vector<12x16xbf16>, vector<8x16xf32> -> vector<8x16xf32>
    %115 = arith.addf %111, %114 : vector<8x16xf32>
    %116 = vector.broadcast %8 : vector<1x16xf32> to vector<8x16xf32>
    %117 = arith.addf %115, %116 : vector<8x16xf32>
    %cst_120 = arith.constant 0.000000e+00 : f32
    %118 = vector.broadcast %cst_120 : f32 to vector<8x16xf32>
    %119 = arith.maximumf %117, %118 : vector<8x16xf32>
    %120 = arith.truncf %119 : vector<8x16xf32> to vector<8x16xbf16>
    %c0_121 = arith.constant 0 : index
    %c32 = arith.constant 32 : index
    %c0_122 = arith.constant 0 : index
    %121 = vector.load %arg4[%c0_121, %c32, %c0_122] : memref<1x64x16xbf16, #tpu.memory_space<vmem>>, vector<1x8x16xbf16>
    %122 = vector.shape_cast %121 : vector<1x8x16xbf16> to vector<8x16xbf16>
    %123 = vector.shape_cast %120 : vector<8x16xbf16> to vector<1x8x16xbf16>
    tpu.vector_store %arg4[%c0_121, %c32, %c0_122], %123 {strides = array<i32>} : memref<1x64x16xbf16, #tpu.memory_space<vmem>>, vector<1x8x16xbf16>,
    %c0_123 = arith.constant 0 : index
    %c5_124 = arith.constant 5 : index
    %c0_125 = arith.constant 0 : index
    %c0_126 = arith.constant 0 : index
    %124 = vector.load %arg1[%c0_123, %c5_124, %c0_125, %c0_126] : memref<1x9x9x12xbf16, #tpu.memory_space<vmem>>, vector<1x1x8x12xbf16>
    %125 = vector.shape_cast %124 : vector<1x1x8x12xbf16> to vector<8x12xbf16>
    %cst_127 = arith.constant dense<0.000000e+00> : vector<8x16xf32>
    %126 = tpu.matmul %125, %1, %cst_127 {dimension_numbers = #tpu.dot_dimension_numbers<[1], [0], [0], [1], [0, 0, 1, 1], [], []>} : vector<8x12xbf16>, vector<12x16xbf16>, vector<8x16xf32> -> vector<8x16xf32>
    %c0_128 = arith.constant 0 : index
    %c5_129 = arith.constant 5 : index
    %c1_130 = arith.constant 1 : index
    %c0_131 = arith.constant 0 : index
    %127 = vector.load %arg1[%c0_128, %c5_129, %c1_130, %c0_131] : memref<1x9x9x12xbf16, #tpu.memory_space<vmem>>, vector<1x1x8x12xbf16>
    %128 = vector.shape_cast %127 : vector<1x1x8x12xbf16> to vector<8x12xbf16>
    %cst_132 = arith.constant dense<0.000000e+00> : vector<8x16xf32>
    %129 = tpu.matmul %128, %3, %cst_132 {dimension_numbers = #tpu.dot_dimension_numbers<[1], [0], [0], [1], [0, 0, 1, 1], [], []>} : vector<8x12xbf16>, vector<12x16xbf16>, vector<8x16xf32> -> vector<8x16xf32>
    %130 = arith.addf %126, %129 : vector<8x16xf32>
    %c0_133 = arith.constant 0 : index
    %c6 = arith.constant 6 : index
    %c0_134 = arith.constant 0 : index
    %c0_135 = arith.constant 0 : index
    %131 = vector.load %arg1[%c0_133, %c6, %c0_134, %c0_135] : memref<1x9x9x12xbf16, #tpu.memory_space<vmem>>, vector<1x1x8x12xbf16>
    %132 = vector.shape_cast %131 : vector<1x1x8x12xbf16> to vector<8x12xbf16>
    %cst_136 = arith.constant dense<0.000000e+00> : vector<8x16xf32>
    %133 = tpu.matmul %132, %5, %cst_136 {dimension_numbers = #tpu.dot_dimension_numbers<[1], [0], [0], [1], [0, 0, 1, 1], [], []>} : vector<8x12xbf16>, vector<12x16xbf16>, vector<8x16xf32> -> vector<8x16xf32>
    %134 = arith.addf %130, %133 : vector<8x16xf32>
    %c0_137 = arith.constant 0 : index
    %c6_138 = arith.constant 6 : index
    %c1_139 = arith.constant 1 : index
    %c0_140 = arith.constant 0 : index
    %135 = vector.load %arg1[%c0_137, %c6_138, %c1_139, %c0_140] : memref<1x9x9x12xbf16, #tpu.memory_space<vmem>>, vector<1x1x8x12xbf16>
    %136 = vector.shape_cast %135 : vector<1x1x8x12xbf16> to vector<8x12xbf16>
    %cst_141 = arith.constant dense<0.000000e+00> : vector<8x16xf32>
    %137 = tpu.matmul %136, %7, %cst_141 {dimension_numbers = #tpu.dot_dimension_numbers<[1], [0], [0], [1], [0, 0, 1, 1], [], []>} : vector<8x12xbf16>, vector<12x16xbf16>, vector<8x16xf32> -> vector<8x16xf32>
    %138 = arith.addf %134, %137 : vector<8x16xf32>
    %139 = vector.broadcast %8 : vector<1x16xf32> to vector<8x16xf32>
    %140 = arith.addf %138, %139 : vector<8x16xf32>
    %cst_142 = arith.constant 0.000000e+00 : f32
    %141 = vector.broadcast %cst_142 : f32 to vector<8x16xf32>
    %142 = arith.maximumf %140, %141 : vector<8x16xf32>
    %143 = arith.truncf %142 : vector<8x16xf32> to vector<8x16xbf16>
    %c0_143 = arith.constant 0 : index
    %c40 = arith.constant 40 : index
    %c0_144 = arith.constant 0 : index
    %144 = vector.load %arg4[%c0_143, %c40, %c0_144] : memref<1x64x16xbf16, #tpu.memory_space<vmem>>, vector<1x8x16xbf16>
    %145 = vector.shape_cast %144 : vector<1x8x16xbf16> to vector<8x16xbf16>
    %146 = vector.shape_cast %143 : vector<8x16xbf16> to vector<1x8x16xbf16>
    tpu.vector_store %arg4[%c0_143, %c40, %c0_144], %146 {strides = array<i32>} : memref<1x64x16xbf16, #tpu.memory_space<vmem>>, vector<1x8x16xbf16>,
    %c0_145 = arith.constant 0 : index
    %c6_146 = arith.constant 6 : index
    %c0_147 = arith.constant 0 : index
    %c0_148 = arith.constant 0 : index
    %147 = vector.load %arg1[%c0_145, %c6_146, %c0_147, %c0_148] : memref<1x9x9x12xbf16, #tpu.memory_space<vmem>>, vector<1x1x8x12xbf16>
    %148 = vector.shape_cast %147 : vector<1x1x8x12xbf16> to vector<8x12xbf16>
    %cst_149 = arith.constant dense<0.000000e+00> : vector<8x16xf32>
    %149 = tpu.matmul %148, %1, %cst_149 {dimension_numbers = #tpu.dot_dimension_numbers<[1], [0], [0], [1], [0, 0, 1, 1], [], []>} : vector<8x12xbf16>, vector<12x16xbf16>, vector<8x16xf32> -> vector<8x16xf32>
    %c0_150 = arith.constant 0 : index
    %c6_151 = arith.constant 6 : index
    %c1_152 = arith.constant 1 : index
    %c0_153 = arith.constant 0 : index
    %150 = vector.load %arg1[%c0_150, %c6_151, %c1_152, %c0_153] : memref<1x9x9x12xbf16, #tpu.memory_space<vmem>>, vector<1x1x8x12xbf16>
    %151 = vector.shape_cast %150 : vector<1x1x8x12xbf16> to vector<8x12xbf16>
    %cst_154 = arith.constant dense<0.000000e+00> : vector<8x16xf32>
    %152 = tpu.matmul %151, %3, %cst_154 {dimension_numbers = #tpu.dot_dimension_numbers<[1], [0], [0], [1], [0, 0, 1, 1], [], []>} : vector<8x12xbf16>, vector<12x16xbf16>, vector<8x16xf32> -> vector<8x16xf32>
    %153 = arith.addf %149, %152 : vector<8x16xf32>
    %c0_155 = arith.constant 0 : index
    %c7 = arith.constant 7 : index
    %c0_156 = arith.constant 0 : index
    %c0_157 = arith.constant 0 : index
    %154 = vector.load %arg1[%c0_155, %c7, %c0_156, %c0_157] : memref<1x9x9x12xbf16, #tpu.memory_space<vmem>>, vector<1x1x8x12xbf16>
    %155 = vector.shape_cast %154 : vector<1x1x8x12xbf16> to vector<8x12xbf16>
    %cst_158 = arith.constant dense<0.000000e+00> : vector<8x16xf32>
    %156 = tpu.matmul %155, %5, %cst_158 {dimension_numbers = #tpu.dot_dimension_numbers<[1], [0], [0], [1], [0, 0, 1, 1], [], []>} : vector<8x12xbf16>, vector<12x16xbf16>, vector<8x16xf32> -> vector<8x16xf32>
    %157 = arith.addf %153, %156 : vector<8x16xf32>
    %c0_159 = arith.constant 0 : index
    %c7_160 = arith.constant 7 : index
    %c1_161 = arith.constant 1 : index
    %c0_162 = arith.constant 0 : index
    %158 = vector.load %arg1[%c0_159, %c7_160, %c1_161, %c0_162] : memref<1x9x9x12xbf16, #tpu.memory_space<vmem>>, vector<1x1x8x12xbf16>
    %159 = vector.shape_cast %158 : vector<1x1x8x12xbf16> to vector<8x12xbf16>
    %cst_163 = arith.constant dense<0.000000e+00> : vector<8x16xf32>
    %160 = tpu.matmul %159, %7, %cst_163 {dimension_numbers = #tpu.dot_dimension_numbers<[1], [0], [0], [1], [0, 0, 1, 1], [], []>} : vector<8x12xbf16>, vector<12x16xbf16>, vector<8x16xf32> -> vector<8x16xf32>
    %161 = arith.addf %157, %160 : vector<8x16xf32>
    %162 = vector.broadcast %8 : vector<1x16xf32> to vector<8x16xf32>
    %163 = arith.addf %161, %162 : vector<8x16xf32>
    %cst_164 = arith.constant 0.000000e+00 : f32
    %164 = vector.broadcast %cst_164 : f32 to vector<8x16xf32>
    %165 = arith.maximumf %163, %164 : vector<8x16xf32>
    %166 = arith.truncf %165 : vector<8x16xf32> to vector<8x16xbf16>
    %c0_165 = arith.constant 0 : index
    %c48 = arith.constant 48 : index
    %c0_166 = arith.constant 0 : index
    %167 = vector.load %arg4[%c0_165, %c48, %c0_166] : memref<1x64x16xbf16, #tpu.memory_space<vmem>>, vector<1x8x16xbf16>
    %168 = vector.shape_cast %167 : vector<1x8x16xbf16> to vector<8x16xbf16>
    %169 = vector.shape_cast %166 : vector<8x16xbf16> to vector<1x8x16xbf16>
    tpu.vector_store %arg4[%c0_165, %c48, %c0_166], %169 {strides = array<i32>} : memref<1x64x16xbf16, #tpu.memory_space<vmem>>, vector<1x8x16xbf16>,
    %c0_167 = arith.constant 0 : index
    %c7_168 = arith.constant 7 : index
    %c0_169 = arith.constant 0 : index
    %c0_170 = arith.constant 0 : index
    %170 = vector.load %arg1[%c0_167, %c7_168, %c0_169, %c0_170] : memref<1x9x9x12xbf16, #tpu.memory_space<vmem>>, vector<1x1x8x12xbf16>
    %171 = vector.shape_cast %170 : vector<1x1x8x12xbf16> to vector<8x12xbf16>
    %cst_171 = arith.constant dense<0.000000e+00> : vector<8x16xf32>
    %172 = tpu.matmul %171, %1, %cst_171 {dimension_numbers = #tpu.dot_dimension_numbers<[1], [0], [0], [1], [0, 0, 1, 1], [], []>} : vector<8x12xbf16>, vector<12x16xbf16>, vector<8x16xf32> -> vector<8x16xf32>
    %c0_172 = arith.constant 0 : index
    %c7_173 = arith.constant 7 : index
    %c1_174 = arith.constant 1 : index
    %c0_175 = arith.constant 0 : index
    %173 = vector.load %arg1[%c0_172, %c7_173, %c1_174, %c0_175] : memref<1x9x9x12xbf16, #tpu.memory_space<vmem>>, vector<1x1x8x12xbf16>
    %174 = vector.shape_cast %173 : vector<1x1x8x12xbf16> to vector<8x12xbf16>
    %cst_176 = arith.constant dense<0.000000e+00> : vector<8x16xf32>
    %175 = tpu.matmul %174, %3, %cst_176 {dimension_numbers = #tpu.dot_dimension_numbers<[1], [0], [0], [1], [0, 0, 1, 1], [], []>} : vector<8x12xbf16>, vector<12x16xbf16>, vector<8x16xf32> -> vector<8x16xf32>
    %176 = arith.addf %172, %175 : vector<8x16xf32>
    %c0_177 = arith.constant 0 : index
    %c8_178 = arith.constant 8 : index
    %c0_179 = arith.constant 0 : index
    %c0_180 = arith.constant 0 : index
    %177 = vector.load %arg1[%c0_177, %c8_178, %c0_179, %c0_180] : memref<1x9x9x12xbf16, #tpu.memory_space<vmem>>, vector<1x1x8x12xbf16>
    %178 = vector.shape_cast %177 : vector<1x1x8x12xbf16> to vector<8x12xbf16>
    %cst_181 = arith.constant dense<0.000000e+00> : vector<8x16xf32>
    %179 = tpu.matmul %178, %5, %cst_181 {dimension_numbers = #tpu.dot_dimension_numbers<[1], [0], [0], [1], [0, 0, 1, 1], [], []>} : vector<8x12xbf16>, vector<12x16xbf16>, vector<8x16xf32> -> vector<8x16xf32>
    %180 = arith.addf %176, %179 : vector<8x16xf32>
    %c0_182 = arith.constant 0 : index
    %c8_183 = arith.constant 8 : index
    %c1_184 = arith.constant 1 : index
    %c0_185 = arith.constant 0 : index
    %181 = vector.load %arg1[%c0_182, %c8_183, %c1_184, %c0_185] : memref<1x9x9x12xbf16, #tpu.memory_space<vmem>>, vector<1x1x8x12xbf16>
    %182 = vector.shape_cast %181 : vector<1x1x8x12xbf16> to vector<8x12xbf16>
    %cst_186 = arith.constant dense<0.000000e+00> : vector<8x16xf32>
    %183 = tpu.matmul %182, %7, %cst_186 {dimension_numbers = #tpu.dot_dimension_numbers<[1], [0], [0], [1], [0, 0, 1, 1], [], []>} : vector<8x12xbf16>, vector<12x16xbf16>, vector<8x16xf32> -> vector<8x16xf32>
    %184 = arith.addf %180, %183 : vector<8x16xf32>
    %185 = vector.broadcast %8 : vector<1x16xf32> to vector<8x16xf32>
    %186 = arith.addf %184, %185 : vector<8x16xf32>
    %cst_187 = arith.constant 0.000000e+00 : f32
    %187 = vector.broadcast %cst_187 : f32 to vector<8x16xf32>
    %188 = arith.maximumf %186, %187 : vector<8x16xf32>
    %189 = arith.truncf %188 : vector<8x16xf32> to vector<8x16xbf16>
    %c0_188 = arith.constant 0 : index
    %c56 = arith.constant 56 : index
    %c0_189 = arith.constant 0 : index
    %190 = vector.load %arg4[%c0_188, %c56, %c0_189] : memref<1x64x16xbf16, #tpu.memory_space<vmem>>, vector<1x8x16xbf16>
    %191 = vector.shape_cast %190 : vector<1x8x16xbf16> to vector<8x16xbf16>
    %192 = vector.shape_cast %189 : vector<8x16xbf16> to vector<1x8x16xbf16>
    tpu.vector_store %arg4[%c0_188, %c56, %c0_189], %192 {strides = array<i32>} : memref<1x64x16xbf16, #tpu.memory_space<vmem>>, vector<1x8x16xbf16>,
    return
  }
  func.func @transform_0(%arg0: i32) -> (i32, i32, i32, i32) {
    %c0_i32 = arith.constant 0 : i32
    %c0_i32_0 = arith.constant 0 : i32
    %c0_i32_1 = arith.constant 0 : i32
    %c0_i32_2 = arith.constant 0 : i32
    return %arg0, %c0_i32, %c0_i32_0, %c0_i32_1 : i32, i32, i32, i32
  }
  func.func @transform_1(%arg0: i32) -> (i32, i32, i32) {
    %c0_i32 = arith.constant 0 : i32
    %c0_i32_0 = arith.constant 0 : i32
    %c0_i32_1 = arith.constant 0 : i32
    %c0_i32_2 = arith.constant 0 : i32
    return %c0_i32, %c0_i32_0, %c0_i32_1 : i32, i32, i32
  }
  func.func @transform_2(%arg0: i32) -> (i32, i32) {
    %c0_i32 = arith.constant 0 : i32
    %c0_i32_0 = arith.constant 0 : i32
    %c0_i32_1 = arith.constant 0 : i32
    return %c0_i32, %c0_i32_0 : i32, i32
  }
  func.func @transform_3(%arg0: i32) -> (i32, i32, i32) {
    %c0_i32 = arith.constant 0 : i32
    %c0_i32_0 = arith.constant 0 : i32
    %c0_i32_1 = arith.constant 0 : i32
    return %arg0, %c0_i32, %c0_i32_0 : i32, i32, i32
  }
}

module attributes {stable_mosaic.version = 11 : i64} {
  func.func @_conv2x2_bn_relu_kernel(%arg0: i32, %arg1: memref<1x5x5x64xbf16, #tpu.memory_space<vmem>>, %arg2: memref<4x64x32xbf16, #tpu.memory_space<vmem>>, %arg3: memref<1x32xf32, #tpu.memory_space<vmem>>, %arg4: memref<1x16x32xbf16, #tpu.memory_space<vmem>>) attributes {dimension_semantics = [#tpu.dimension_semantics<parallel>], iteration_bounds = array<i64: 2>, scalar_prefetch = 0 : i64, scratch_operands = 0 : i64, tpu.core_type = #tpu.core_type<tc>, window_params = [{transform_indices = @transform_0, window_bounds = array<i64: 1, 5, 5, 64>}, {pipeline_mode = #tpu.pipeline_mode<synchronous>, transform_indices = @transform_1, window_bounds = array<i64: 4, 64, 32>}, {pipeline_mode = #tpu.pipeline_mode<synchronous>, transform_indices = @transform_2, window_bounds = array<i64: 1, 32>}, {transform_indices = @transform_3, window_bounds = array<i64: 1, 16, 32>}]} {
    %c0 = arith.constant 0 : index
    %c0_0 = arith.constant 0 : index
    %c0_1 = arith.constant 0 : index
    %0 = vector.load %arg2[%c0, %c0_0, %c0_1] : memref<4x64x32xbf16, #tpu.memory_space<vmem>>, vector<1x64x32xbf16>
    %1 = vector.shape_cast %0 : vector<1x64x32xbf16> to vector<64x32xbf16>
    %c1 = arith.constant 1 : index
    %c0_2 = arith.constant 0 : index
    %c0_3 = arith.constant 0 : index
    %2 = vector.load %arg2[%c1, %c0_2, %c0_3] : memref<4x64x32xbf16, #tpu.memory_space<vmem>>, vector<1x64x32xbf16>
    %3 = vector.shape_cast %2 : vector<1x64x32xbf16> to vector<64x32xbf16>
    %c2 = arith.constant 2 : index
    %c0_4 = arith.constant 0 : index
    %c0_5 = arith.constant 0 : index
    %4 = vector.load %arg2[%c2, %c0_4, %c0_5] : memref<4x64x32xbf16, #tpu.memory_space<vmem>>, vector<1x64x32xbf16>
    %5 = vector.shape_cast %4 : vector<1x64x32xbf16> to vector<64x32xbf16>
    %c3 = arith.constant 3 : index
    %c0_6 = arith.constant 0 : index
    %c0_7 = arith.constant 0 : index
    %6 = vector.load %arg2[%c3, %c0_6, %c0_7] : memref<4x64x32xbf16, #tpu.memory_space<vmem>>, vector<1x64x32xbf16>
    %7 = vector.shape_cast %6 : vector<1x64x32xbf16> to vector<64x32xbf16>
    %c0_8 = arith.constant 0 : index
    %c0_9 = arith.constant 0 : index
    %8 = vector.load %arg3[%c0_8, %c0_9] : memref<1x32xf32, #tpu.memory_space<vmem>>, vector<1x32xf32>
    %c0_10 = arith.constant 0 : index
    %c0_11 = arith.constant 0 : index
    %c0_12 = arith.constant 0 : index
    %c0_13 = arith.constant 0 : index
    %9 = vector.load %arg1[%c0_10, %c0_11, %c0_12, %c0_13] : memref<1x5x5x64xbf16, #tpu.memory_space<vmem>>, vector<1x1x4x64xbf16>
    %10 = vector.shape_cast %9 : vector<1x1x4x64xbf16> to vector<4x64xbf16>
    %cst = arith.constant dense<0.000000e+00> : vector<4x32xf32>
    %11 = tpu.matmul %10, %1, %cst {dimension_numbers = #tpu.dot_dimension_numbers<[1], [0], [0], [1], [0, 0, 1, 1], [], []>} : vector<4x64xbf16>, vector<64x32xbf16>, vector<4x32xf32> -> vector<4x32xf32>
    %c0_14 = arith.constant 0 : index
    %c0_15 = arith.constant 0 : index
    %c1_16 = arith.constant 1 : index
    %c0_17 = arith.constant 0 : index
    %12 = vector.load %arg1[%c0_14, %c0_15, %c1_16, %c0_17] : memref<1x5x5x64xbf16, #tpu.memory_space<vmem>>, vector<1x1x4x64xbf16>
    %13 = vector.shape_cast %12 : vector<1x1x4x64xbf16> to vector<4x64xbf16>
    %cst_18 = arith.constant dense<0.000000e+00> : vector<4x32xf32>
    %14 = tpu.matmul %13, %3, %cst_18 {dimension_numbers = #tpu.dot_dimension_numbers<[1], [0], [0], [1], [0, 0, 1, 1], [], []>} : vector<4x64xbf16>, vector<64x32xbf16>, vector<4x32xf32> -> vector<4x32xf32>
    %15 = arith.addf %11, %14 : vector<4x32xf32>
    %c0_19 = arith.constant 0 : index
    %c1_20 = arith.constant 1 : index
    %c0_21 = arith.constant 0 : index
    %c0_22 = arith.constant 0 : index
    %16 = vector.load %arg1[%c0_19, %c1_20, %c0_21, %c0_22] : memref<1x5x5x64xbf16, #tpu.memory_space<vmem>>, vector<1x1x4x64xbf16>
    %17 = vector.shape_cast %16 : vector<1x1x4x64xbf16> to vector<4x64xbf16>
    %cst_23 = arith.constant dense<0.000000e+00> : vector<4x32xf32>
    %18 = tpu.matmul %17, %5, %cst_23 {dimension_numbers = #tpu.dot_dimension_numbers<[1], [0], [0], [1], [0, 0, 1, 1], [], []>} : vector<4x64xbf16>, vector<64x32xbf16>, vector<4x32xf32> -> vector<4x32xf32>
    %19 = arith.addf %15, %18 : vector<4x32xf32>
    %c0_24 = arith.constant 0 : index
    %c1_25 = arith.constant 1 : index
    %c1_26 = arith.constant 1 : index
    %c0_27 = arith.constant 0 : index
    %20 = vector.load %arg1[%c0_24, %c1_25, %c1_26, %c0_27] : memref<1x5x5x64xbf16, #tpu.memory_space<vmem>>, vector<1x1x4x64xbf16>
    %21 = vector.shape_cast %20 : vector<1x1x4x64xbf16> to vector<4x64xbf16>
    %cst_28 = arith.constant dense<0.000000e+00> : vector<4x32xf32>
    %22 = tpu.matmul %21, %7, %cst_28 {dimension_numbers = #tpu.dot_dimension_numbers<[1], [0], [0], [1], [0, 0, 1, 1], [], []>} : vector<4x64xbf16>, vector<64x32xbf16>, vector<4x32xf32> -> vector<4x32xf32>
    %23 = arith.addf %19, %22 : vector<4x32xf32>
    %24 = vector.broadcast %8 : vector<1x32xf32> to vector<4x32xf32>
    %25 = arith.addf %23, %24 : vector<4x32xf32>
    %cst_29 = arith.constant 0.000000e+00 : f32
    %26 = vector.broadcast %cst_29 : f32 to vector<4x32xf32>
    %27 = arith.maximumf %25, %26 : vector<4x32xf32>
    %28 = arith.truncf %27 : vector<4x32xf32> to vector<4x32xbf16>
    %c0_30 = arith.constant 0 : index
    %c0_31 = arith.constant 0 : index
    %c0_32 = arith.constant 0 : index
    %29 = vector.load %arg4[%c0_30, %c0_31, %c0_32] : memref<1x16x32xbf16, #tpu.memory_space<vmem>>, vector<1x4x32xbf16>
    %30 = vector.shape_cast %29 : vector<1x4x32xbf16> to vector<4x32xbf16>
    %31 = vector.shape_cast %28 : vector<4x32xbf16> to vector<1x4x32xbf16>
    tpu.vector_store %arg4[%c0_30, %c0_31, %c0_32], %31 {strides = array<i32>} : memref<1x16x32xbf16, #tpu.memory_space<vmem>>, vector<1x4x32xbf16>,
    %c0_33 = arith.constant 0 : index
    %c1_34 = arith.constant 1 : index
    %c0_35 = arith.constant 0 : index
    %c0_36 = arith.constant 0 : index
    %32 = vector.load %arg1[%c0_33, %c1_34, %c0_35, %c0_36] : memref<1x5x5x64xbf16, #tpu.memory_space<vmem>>, vector<1x1x4x64xbf16>
    %33 = vector.shape_cast %32 : vector<1x1x4x64xbf16> to vector<4x64xbf16>
    %cst_37 = arith.constant dense<0.000000e+00> : vector<4x32xf32>
    %34 = tpu.matmul %33, %1, %cst_37 {dimension_numbers = #tpu.dot_dimension_numbers<[1], [0], [0], [1], [0, 0, 1, 1], [], []>} : vector<4x64xbf16>, vector<64x32xbf16>, vector<4x32xf32> -> vector<4x32xf32>
    %c0_38 = arith.constant 0 : index
    %c1_39 = arith.constant 1 : index
    %c1_40 = arith.constant 1 : index
    %c0_41 = arith.constant 0 : index
    %35 = vector.load %arg1[%c0_38, %c1_39, %c1_40, %c0_41] : memref<1x5x5x64xbf16, #tpu.memory_space<vmem>>, vector<1x1x4x64xbf16>
    %36 = vector.shape_cast %35 : vector<1x1x4x64xbf16> to vector<4x64xbf16>
    %cst_42 = arith.constant dense<0.000000e+00> : vector<4x32xf32>
    %37 = tpu.matmul %36, %3, %cst_42 {dimension_numbers = #tpu.dot_dimension_numbers<[1], [0], [0], [1], [0, 0, 1, 1], [], []>} : vector<4x64xbf16>, vector<64x32xbf16>, vector<4x32xf32> -> vector<4x32xf32>
    %38 = arith.addf %34, %37 : vector<4x32xf32>
    %c0_43 = arith.constant 0 : index
    %c2_44 = arith.constant 2 : index
    %c0_45 = arith.constant 0 : index
    %c0_46 = arith.constant 0 : index
    %39 = vector.load %arg1[%c0_43, %c2_44, %c0_45, %c0_46] : memref<1x5x5x64xbf16, #tpu.memory_space<vmem>>, vector<1x1x4x64xbf16>
    %40 = vector.shape_cast %39 : vector<1x1x4x64xbf16> to vector<4x64xbf16>
    %cst_47 = arith.constant dense<0.000000e+00> : vector<4x32xf32>
    %41 = tpu.matmul %40, %5, %cst_47 {dimension_numbers = #tpu.dot_dimension_numbers<[1], [0], [0], [1], [0, 0, 1, 1], [], []>} : vector<4x64xbf16>, vector<64x32xbf16>, vector<4x32xf32> -> vector<4x32xf32>
    %42 = arith.addf %38, %41 : vector<4x32xf32>
    %c0_48 = arith.constant 0 : index
    %c2_49 = arith.constant 2 : index
    %c1_50 = arith.constant 1 : index
    %c0_51 = arith.constant 0 : index
    %43 = vector.load %arg1[%c0_48, %c2_49, %c1_50, %c0_51] : memref<1x5x5x64xbf16, #tpu.memory_space<vmem>>, vector<1x1x4x64xbf16>
    %44 = vector.shape_cast %43 : vector<1x1x4x64xbf16> to vector<4x64xbf16>
    %cst_52 = arith.constant dense<0.000000e+00> : vector<4x32xf32>
    %45 = tpu.matmul %44, %7, %cst_52 {dimension_numbers = #tpu.dot_dimension_numbers<[1], [0], [0], [1], [0, 0, 1, 1], [], []>} : vector<4x64xbf16>, vector<64x32xbf16>, vector<4x32xf32> -> vector<4x32xf32>
    %46 = arith.addf %42, %45 : vector<4x32xf32>
    %47 = vector.broadcast %8 : vector<1x32xf32> to vector<4x32xf32>
    %48 = arith.addf %46, %47 : vector<4x32xf32>
    %cst_53 = arith.constant 0.000000e+00 : f32
    %49 = vector.broadcast %cst_53 : f32 to vector<4x32xf32>
    %50 = arith.maximumf %48, %49 : vector<4x32xf32>
    %51 = arith.truncf %50 : vector<4x32xf32> to vector<4x32xbf16>
    %c0_54 = arith.constant 0 : index
    %c4 = arith.constant 4 : index
    %c0_55 = arith.constant 0 : index
    %52 = vector.load %arg4[%c0_54, %c4, %c0_55] : memref<1x16x32xbf16, #tpu.memory_space<vmem>>, vector<1x4x32xbf16>
    %53 = vector.shape_cast %52 : vector<1x4x32xbf16> to vector<4x32xbf16>
    %54 = vector.shape_cast %51 : vector<4x32xbf16> to vector<1x4x32xbf16>
    tpu.vector_store %arg4[%c0_54, %c4, %c0_55], %54 {strides = array<i32>} : memref<1x16x32xbf16, #tpu.memory_space<vmem>>, vector<1x4x32xbf16>,
    %c0_56 = arith.constant 0 : index
    %c2_57 = arith.constant 2 : index
    %c0_58 = arith.constant 0 : index
    %c0_59 = arith.constant 0 : index
    %55 = vector.load %arg1[%c0_56, %c2_57, %c0_58, %c0_59] : memref<1x5x5x64xbf16, #tpu.memory_space<vmem>>, vector<1x1x4x64xbf16>
    %56 = vector.shape_cast %55 : vector<1x1x4x64xbf16> to vector<4x64xbf16>
    %cst_60 = arith.constant dense<0.000000e+00> : vector<4x32xf32>
    %57 = tpu.matmul %56, %1, %cst_60 {dimension_numbers = #tpu.dot_dimension_numbers<[1], [0], [0], [1], [0, 0, 1, 1], [], []>} : vector<4x64xbf16>, vector<64x32xbf16>, vector<4x32xf32> -> vector<4x32xf32>
    %c0_61 = arith.constant 0 : index
    %c2_62 = arith.constant 2 : index
    %c1_63 = arith.constant 1 : index
    %c0_64 = arith.constant 0 : index
    %58 = vector.load %arg1[%c0_61, %c2_62, %c1_63, %c0_64] : memref<1x5x5x64xbf16, #tpu.memory_space<vmem>>, vector<1x1x4x64xbf16>
    %59 = vector.shape_cast %58 : vector<1x1x4x64xbf16> to vector<4x64xbf16>
    %cst_65 = arith.constant dense<0.000000e+00> : vector<4x32xf32>
    %60 = tpu.matmul %59, %3, %cst_65 {dimension_numbers = #tpu.dot_dimension_numbers<[1], [0], [0], [1], [0, 0, 1, 1], [], []>} : vector<4x64xbf16>, vector<64x32xbf16>, vector<4x32xf32> -> vector<4x32xf32>
    %61 = arith.addf %57, %60 : vector<4x32xf32>
    %c0_66 = arith.constant 0 : index
    %c3_67 = arith.constant 3 : index
    %c0_68 = arith.constant 0 : index
    %c0_69 = arith.constant 0 : index
    %62 = vector.load %arg1[%c0_66, %c3_67, %c0_68, %c0_69] : memref<1x5x5x64xbf16, #tpu.memory_space<vmem>>, vector<1x1x4x64xbf16>
    %63 = vector.shape_cast %62 : vector<1x1x4x64xbf16> to vector<4x64xbf16>
    %cst_70 = arith.constant dense<0.000000e+00> : vector<4x32xf32>
    %64 = tpu.matmul %63, %5, %cst_70 {dimension_numbers = #tpu.dot_dimension_numbers<[1], [0], [0], [1], [0, 0, 1, 1], [], []>} : vector<4x64xbf16>, vector<64x32xbf16>, vector<4x32xf32> -> vector<4x32xf32>
    %65 = arith.addf %61, %64 : vector<4x32xf32>
    %c0_71 = arith.constant 0 : index
    %c3_72 = arith.constant 3 : index
    %c1_73 = arith.constant 1 : index
    %c0_74 = arith.constant 0 : index
    %66 = vector.load %arg1[%c0_71, %c3_72, %c1_73, %c0_74] : memref<1x5x5x64xbf16, #tpu.memory_space<vmem>>, vector<1x1x4x64xbf16>
    %67 = vector.shape_cast %66 : vector<1x1x4x64xbf16> to vector<4x64xbf16>
    %cst_75 = arith.constant dense<0.000000e+00> : vector<4x32xf32>
    %68 = tpu.matmul %67, %7, %cst_75 {dimension_numbers = #tpu.dot_dimension_numbers<[1], [0], [0], [1], [0, 0, 1, 1], [], []>} : vector<4x64xbf16>, vector<64x32xbf16>, vector<4x32xf32> -> vector<4x32xf32>
    %69 = arith.addf %65, %68 : vector<4x32xf32>
    %70 = vector.broadcast %8 : vector<1x32xf32> to vector<4x32xf32>
    %71 = arith.addf %69, %70 : vector<4x32xf32>
    %cst_76 = arith.constant 0.000000e+00 : f32
    %72 = vector.broadcast %cst_76 : f32 to vector<4x32xf32>
    %73 = arith.maximumf %71, %72 : vector<4x32xf32>
    %74 = arith.truncf %73 : vector<4x32xf32> to vector<4x32xbf16>
    %c0_77 = arith.constant 0 : index
    %c8 = arith.constant 8 : index
    %c0_78 = arith.constant 0 : index
    %75 = vector.load %arg4[%c0_77, %c8, %c0_78] : memref<1x16x32xbf16, #tpu.memory_space<vmem>>, vector<1x4x32xbf16>
    %76 = vector.shape_cast %75 : vector<1x4x32xbf16> to vector<4x32xbf16>
    %77 = vector.shape_cast %74 : vector<4x32xbf16> to vector<1x4x32xbf16>
    tpu.vector_store %arg4[%c0_77, %c8, %c0_78], %77 {strides = array<i32>} : memref<1x16x32xbf16, #tpu.memory_space<vmem>>, vector<1x4x32xbf16>,
    %c0_79 = arith.constant 0 : index
    %c3_80 = arith.constant 3 : index
    %c0_81 = arith.constant 0 : index
    %c0_82 = arith.constant 0 : index
    %78 = vector.load %arg1[%c0_79, %c3_80, %c0_81, %c0_82] : memref<1x5x5x64xbf16, #tpu.memory_space<vmem>>, vector<1x1x4x64xbf16>
    %79 = vector.shape_cast %78 : vector<1x1x4x64xbf16> to vector<4x64xbf16>
    %cst_83 = arith.constant dense<0.000000e+00> : vector<4x32xf32>
    %80 = tpu.matmul %79, %1, %cst_83 {dimension_numbers = #tpu.dot_dimension_numbers<[1], [0], [0], [1], [0, 0, 1, 1], [], []>} : vector<4x64xbf16>, vector<64x32xbf16>, vector<4x32xf32> -> vector<4x32xf32>
    %c0_84 = arith.constant 0 : index
    %c3_85 = arith.constant 3 : index
    %c1_86 = arith.constant 1 : index
    %c0_87 = arith.constant 0 : index
    %81 = vector.load %arg1[%c0_84, %c3_85, %c1_86, %c0_87] : memref<1x5x5x64xbf16, #tpu.memory_space<vmem>>, vector<1x1x4x64xbf16>
    %82 = vector.shape_cast %81 : vector<1x1x4x64xbf16> to vector<4x64xbf16>
    %cst_88 = arith.constant dense<0.000000e+00> : vector<4x32xf32>
    %83 = tpu.matmul %82, %3, %cst_88 {dimension_numbers = #tpu.dot_dimension_numbers<[1], [0], [0], [1], [0, 0, 1, 1], [], []>} : vector<4x64xbf16>, vector<64x32xbf16>, vector<4x32xf32> -> vector<4x32xf32>
    %84 = arith.addf %80, %83 : vector<4x32xf32>
    %c0_89 = arith.constant 0 : index
    %c4_90 = arith.constant 4 : index
    %c0_91 = arith.constant 0 : index
    %c0_92 = arith.constant 0 : index
    %85 = vector.load %arg1[%c0_89, %c4_90, %c0_91, %c0_92] : memref<1x5x5x64xbf16, #tpu.memory_space<vmem>>, vector<1x1x4x64xbf16>
    %86 = vector.shape_cast %85 : vector<1x1x4x64xbf16> to vector<4x64xbf16>
    %cst_93 = arith.constant dense<0.000000e+00> : vector<4x32xf32>
    %87 = tpu.matmul %86, %5, %cst_93 {dimension_numbers = #tpu.dot_dimension_numbers<[1], [0], [0], [1], [0, 0, 1, 1], [], []>} : vector<4x64xbf16>, vector<64x32xbf16>, vector<4x32xf32> -> vector<4x32xf32>
    %88 = arith.addf %84, %87 : vector<4x32xf32>
    %c0_94 = arith.constant 0 : index
    %c4_95 = arith.constant 4 : index
    %c1_96 = arith.constant 1 : index
    %c0_97 = arith.constant 0 : index
    %89 = vector.load %arg1[%c0_94, %c4_95, %c1_96, %c0_97] : memref<1x5x5x64xbf16, #tpu.memory_space<vmem>>, vector<1x1x4x64xbf16>
    %90 = vector.shape_cast %89 : vector<1x1x4x64xbf16> to vector<4x64xbf16>
    %cst_98 = arith.constant dense<0.000000e+00> : vector<4x32xf32>
    %91 = tpu.matmul %90, %7, %cst_98 {dimension_numbers = #tpu.dot_dimension_numbers<[1], [0], [0], [1], [0, 0, 1, 1], [], []>} : vector<4x64xbf16>, vector<64x32xbf16>, vector<4x32xf32> -> vector<4x32xf32>
    %92 = arith.addf %88, %91 : vector<4x32xf32>
    %93 = vector.broadcast %8 : vector<1x32xf32> to vector<4x32xf32>
    %94 = arith.addf %92, %93 : vector<4x32xf32>
    %cst_99 = arith.constant 0.000000e+00 : f32
    %95 = vector.broadcast %cst_99 : f32 to vector<4x32xf32>
    %96 = arith.maximumf %94, %95 : vector<4x32xf32>
    %97 = arith.truncf %96 : vector<4x32xf32> to vector<4x32xbf16>
    %c0_100 = arith.constant 0 : index
    %c12 = arith.constant 12 : index
    %c0_101 = arith.constant 0 : index
    %98 = vector.load %arg4[%c0_100, %c12, %c0_101] : memref<1x16x32xbf16, #tpu.memory_space<vmem>>, vector<1x4x32xbf16>
    %99 = vector.shape_cast %98 : vector<1x4x32xbf16> to vector<4x32xbf16>
    %100 = vector.shape_cast %97 : vector<4x32xbf16> to vector<1x4x32xbf16>
    tpu.vector_store %arg4[%c0_100, %c12, %c0_101], %100 {strides = array<i32>} : memref<1x16x32xbf16, #tpu.memory_space<vmem>>, vector<1x4x32xbf16>,
    return
  }
  func.func @transform_0(%arg0: i32) -> (i32, i32, i32, i32) {
    %c0_i32 = arith.constant 0 : i32
    %c0_i32_0 = arith.constant 0 : i32
    %c0_i32_1 = arith.constant 0 : i32
    %c0_i32_2 = arith.constant 0 : i32
    return %arg0, %c0_i32, %c0_i32_0, %c0_i32_1 : i32, i32, i32, i32
  }
  func.func @transform_1(%arg0: i32) -> (i32, i32, i32) {
    %c0_i32 = arith.constant 0 : i32
    %c0_i32_0 = arith.constant 0 : i32
    %c0_i32_1 = arith.constant 0 : i32
    %c0_i32_2 = arith.constant 0 : i32
    return %c0_i32, %c0_i32_0, %c0_i32_1 : i32, i32, i32
  }
  func.func @transform_2(%arg0: i32) -> (i32, i32) {
    %c0_i32 = arith.constant 0 : i32
    %c0_i32_0 = arith.constant 0 : i32
    %c0_i32_1 = arith.constant 0 : i32
    return %c0_i32, %c0_i32_0 : i32, i32
  }
  func.func @transform_3(%arg0: i32) -> (i32, i32, i32) {
    %c0_i32 = arith.constant 0 : i32
    %c0_i32_0 = arith.constant 0 : i32
    %c0_i32_1 = arith.constant 0 : i32
    return %arg0, %c0_i32, %c0_i32_0 : i32, i32, i32
  }
}

module attributes {stable_mosaic.version = 11 : i64} {
  func.func @_conv2x2_bn_relu_kernel(%arg0: i32, %arg1: memref<1x3x3x128xbf16, #tpu.memory_space<vmem>>, %arg2: memref<4x128x64xbf16, #tpu.memory_space<vmem>>, %arg3: memref<1x64xf32, #tpu.memory_space<vmem>>, %arg4: memref<1x4x64xbf16, #tpu.memory_space<vmem>>) attributes {dimension_semantics = [#tpu.dimension_semantics<parallel>], iteration_bounds = array<i64: 2>, scalar_prefetch = 0 : i64, scratch_operands = 0 : i64, tpu.core_type = #tpu.core_type<tc>, window_params = [{transform_indices = @transform_0, window_bounds = array<i64: 1, 3, 3, 128>}, {pipeline_mode = #tpu.pipeline_mode<synchronous>, transform_indices = @transform_1, window_bounds = array<i64: 4, 128, 64>}, {pipeline_mode = #tpu.pipeline_mode<synchronous>, transform_indices = @transform_2, window_bounds = array<i64: 1, 64>}, {transform_indices = @transform_3, window_bounds = array<i64: 1, 4, 64>}]} {
    %c0 = arith.constant 0 : index
    %c0_0 = arith.constant 0 : index
    %c0_1 = arith.constant 0 : index
    %0 = vector.load %arg2[%c0, %c0_0, %c0_1] : memref<4x128x64xbf16, #tpu.memory_space<vmem>>, vector<1x128x64xbf16>
    %1 = vector.shape_cast %0 : vector<1x128x64xbf16> to vector<128x64xbf16>
    %c1 = arith.constant 1 : index
    %c0_2 = arith.constant 0 : index
    %c0_3 = arith.constant 0 : index
    %2 = vector.load %arg2[%c1, %c0_2, %c0_3] : memref<4x128x64xbf16, #tpu.memory_space<vmem>>, vector<1x128x64xbf16>
    %3 = vector.shape_cast %2 : vector<1x128x64xbf16> to vector<128x64xbf16>
    %c2 = arith.constant 2 : index
    %c0_4 = arith.constant 0 : index
    %c0_5 = arith.constant 0 : index
    %4 = vector.load %arg2[%c2, %c0_4, %c0_5] : memref<4x128x64xbf16, #tpu.memory_space<vmem>>, vector<1x128x64xbf16>
    %5 = vector.shape_cast %4 : vector<1x128x64xbf16> to vector<128x64xbf16>
    %c3 = arith.constant 3 : index
    %c0_6 = arith.constant 0 : index
    %c0_7 = arith.constant 0 : index
    %6 = vector.load %arg2[%c3, %c0_6, %c0_7] : memref<4x128x64xbf16, #tpu.memory_space<vmem>>, vector<1x128x64xbf16>
    %7 = vector.shape_cast %6 : vector<1x128x64xbf16> to vector<128x64xbf16>
    %c0_8 = arith.constant 0 : index
    %c0_9 = arith.constant 0 : index
    %8 = vector.load %arg3[%c0_8, %c0_9] : memref<1x64xf32, #tpu.memory_space<vmem>>, vector<1x64xf32>
    %c0_10 = arith.constant 0 : index
    %c0_11 = arith.constant 0 : index
    %c0_12 = arith.constant 0 : index
    %c0_13 = arith.constant 0 : index
    %9 = vector.load %arg1[%c0_10, %c0_11, %c0_12, %c0_13] : memref<1x3x3x128xbf16, #tpu.memory_space<vmem>>, vector<1x1x2x128xbf16>
    %10 = vector.shape_cast %9 : vector<1x1x2x128xbf16> to vector<2x128xbf16>
    %cst = arith.constant dense<0.000000e+00> : vector<2x64xf32>
    %11 = tpu.matmul %10, %1, %cst {dimension_numbers = #tpu.dot_dimension_numbers<[1], [0], [0], [1], [0, 0, 1, 1], [], []>} : vector<2x128xbf16>, vector<128x64xbf16>, vector<2x64xf32> -> vector<2x64xf32>
    %c0_14 = arith.constant 0 : index
    %c0_15 = arith.constant 0 : index
    %c1_16 = arith.constant 1 : index
    %c0_17 = arith.constant 0 : index
    %12 = vector.load %arg1[%c0_14, %c0_15, %c1_16, %c0_17] : memref<1x3x3x128xbf16, #tpu.memory_space<vmem>>, vector<1x1x2x128xbf16>
    %13 = vector.shape_cast %12 : vector<1x1x2x128xbf16> to vector<2x128xbf16>
    %cst_18 = arith.constant dense<0.000000e+00> : vector<2x64xf32>
    %14 = tpu.matmul %13, %3, %cst_18 {dimension_numbers = #tpu.dot_dimension_numbers<[1], [0], [0], [1], [0, 0, 1, 1], [], []>} : vector<2x128xbf16>, vector<128x64xbf16>, vector<2x64xf32> -> vector<2x64xf32>
    %15 = arith.addf %11, %14 : vector<2x64xf32>
    %c0_19 = arith.constant 0 : index
    %c1_20 = arith.constant 1 : index
    %c0_21 = arith.constant 0 : index
    %c0_22 = arith.constant 0 : index
    %16 = vector.load %arg1[%c0_19, %c1_20, %c0_21, %c0_22] : memref<1x3x3x128xbf16, #tpu.memory_space<vmem>>, vector<1x1x2x128xbf16>
    %17 = vector.shape_cast %16 : vector<1x1x2x128xbf16> to vector<2x128xbf16>
    %cst_23 = arith.constant dense<0.000000e+00> : vector<2x64xf32>
    %18 = tpu.matmul %17, %5, %cst_23 {dimension_numbers = #tpu.dot_dimension_numbers<[1], [0], [0], [1], [0, 0, 1, 1], [], []>} : vector<2x128xbf16>, vector<128x64xbf16>, vector<2x64xf32> -> vector<2x64xf32>
    %19 = arith.addf %15, %18 : vector<2x64xf32>
    %c0_24 = arith.constant 0 : index
    %c1_25 = arith.constant 1 : index
    %c1_26 = arith.constant 1 : index
    %c0_27 = arith.constant 0 : index
    %20 = vector.load %arg1[%c0_24, %c1_25, %c1_26, %c0_27] : memref<1x3x3x128xbf16, #tpu.memory_space<vmem>>, vector<1x1x2x128xbf16>
    %21 = vector.shape_cast %20 : vector<1x1x2x128xbf16> to vector<2x128xbf16>
    %cst_28 = arith.constant dense<0.000000e+00> : vector<2x64xf32>
    %22 = tpu.matmul %21, %7, %cst_28 {dimension_numbers = #tpu.dot_dimension_numbers<[1], [0], [0], [1], [0, 0, 1, 1], [], []>} : vector<2x128xbf16>, vector<128x64xbf16>, vector<2x64xf32> -> vector<2x64xf32>
    %23 = arith.addf %19, %22 : vector<2x64xf32>
    %24 = vector.broadcast %8 : vector<1x64xf32> to vector<2x64xf32>
    %25 = arith.addf %23, %24 : vector<2x64xf32>
    %cst_29 = arith.constant 0.000000e+00 : f32
    %26 = vector.broadcast %cst_29 : f32 to vector<2x64xf32>
    %27 = arith.maximumf %25, %26 : vector<2x64xf32>
    %28 = arith.truncf %27 : vector<2x64xf32> to vector<2x64xbf16>
    %c0_30 = arith.constant 0 : index
    %c0_31 = arith.constant 0 : index
    %c0_32 = arith.constant 0 : index
    %29 = vector.load %arg4[%c0_30, %c0_31, %c0_32] : memref<1x4x64xbf16, #tpu.memory_space<vmem>>, vector<1x2x64xbf16>
    %30 = vector.shape_cast %29 : vector<1x2x64xbf16> to vector<2x64xbf16>
    %31 = vector.shape_cast %28 : vector<2x64xbf16> to vector<1x2x64xbf16>
    tpu.vector_store %arg4[%c0_30, %c0_31, %c0_32], %31 {strides = array<i32>} : memref<1x4x64xbf16, #tpu.memory_space<vmem>>, vector<1x2x64xbf16>,
    %c0_33 = arith.constant 0 : index
    %c1_34 = arith.constant 1 : index
    %c0_35 = arith.constant 0 : index
    %c0_36 = arith.constant 0 : index
    %32 = vector.load %arg1[%c0_33, %c1_34, %c0_35, %c0_36] : memref<1x3x3x128xbf16, #tpu.memory_space<vmem>>, vector<1x1x2x128xbf16>
    %33 = vector.shape_cast %32 : vector<1x1x2x128xbf16> to vector<2x128xbf16>
    %cst_37 = arith.constant dense<0.000000e+00> : vector<2x64xf32>
    %34 = tpu.matmul %33, %1, %cst_37 {dimension_numbers = #tpu.dot_dimension_numbers<[1], [0], [0], [1], [0, 0, 1, 1], [], []>} : vector<2x128xbf16>, vector<128x64xbf16>, vector<2x64xf32> -> vector<2x64xf32>
    %c0_38 = arith.constant 0 : index
    %c1_39 = arith.constant 1 : index
    %c1_40 = arith.constant 1 : index
    %c0_41 = arith.constant 0 : index
    %35 = vector.load %arg1[%c0_38, %c1_39, %c1_40, %c0_41] : memref<1x3x3x128xbf16, #tpu.memory_space<vmem>>, vector<1x1x2x128xbf16>
    %36 = vector.shape_cast %35 : vector<1x1x2x128xbf16> to vector<2x128xbf16>
    %cst_42 = arith.constant dense<0.000000e+00> : vector<2x64xf32>
    %37 = tpu.matmul %36, %3, %cst_42 {dimension_numbers = #tpu.dot_dimension_numbers<[1], [0], [0], [1], [0, 0, 1, 1], [], []>} : vector<2x128xbf16>, vector<128x64xbf16>, vector<2x64xf32> -> vector<2x64xf32>
    %38 = arith.addf %34, %37 : vector<2x64xf32>
    %c0_43 = arith.constant 0 : index
    %c2_44 = arith.constant 2 : index
    %c0_45 = arith.constant 0 : index
    %c0_46 = arith.constant 0 : index
    %39 = vector.load %arg1[%c0_43, %c2_44, %c0_45, %c0_46] : memref<1x3x3x128xbf16, #tpu.memory_space<vmem>>, vector<1x1x2x128xbf16>
    %40 = vector.shape_cast %39 : vector<1x1x2x128xbf16> to vector<2x128xbf16>
    %cst_47 = arith.constant dense<0.000000e+00> : vector<2x64xf32>
    %41 = tpu.matmul %40, %5, %cst_47 {dimension_numbers = #tpu.dot_dimension_numbers<[1], [0], [0], [1], [0, 0, 1, 1], [], []>} : vector<2x128xbf16>, vector<128x64xbf16>, vector<2x64xf32> -> vector<2x64xf32>
    %42 = arith.addf %38, %41 : vector<2x64xf32>
    %c0_48 = arith.constant 0 : index
    %c2_49 = arith.constant 2 : index
    %c1_50 = arith.constant 1 : index
    %c0_51 = arith.constant 0 : index
    %43 = vector.load %arg1[%c0_48, %c2_49, %c1_50, %c0_51] : memref<1x3x3x128xbf16, #tpu.memory_space<vmem>>, vector<1x1x2x128xbf16>
    %44 = vector.shape_cast %43 : vector<1x1x2x128xbf16> to vector<2x128xbf16>
    %cst_52 = arith.constant dense<0.000000e+00> : vector<2x64xf32>
    %45 = tpu.matmul %44, %7, %cst_52 {dimension_numbers = #tpu.dot_dimension_numbers<[1], [0], [0], [1], [0, 0, 1, 1], [], []>} : vector<2x128xbf16>, vector<128x64xbf16>, vector<2x64xf32> -> vector<2x64xf32>
    %46 = arith.addf %42, %45 : vector<2x64xf32>
    %47 = vector.broadcast %8 : vector<1x64xf32> to vector<2x64xf32>
    %48 = arith.addf %46, %47 : vector<2x64xf32>
    %cst_53 = arith.constant 0.000000e+00 : f32
    %49 = vector.broadcast %cst_53 : f32 to vector<2x64xf32>
    %50 = arith.maximumf %48, %49 : vector<2x64xf32>
    %51 = arith.truncf %50 : vector<2x64xf32> to vector<2x64xbf16>
    %c0_54 = arith.constant 0 : index
    %c2_55 = arith.constant 2 : index
    %c0_56 = arith.constant 0 : index
    %52 = vector.load %arg4[%c0_54, %c2_55, %c0_56] : memref<1x4x64xbf16, #tpu.memory_space<vmem>>, vector<1x2x64xbf16>
    %53 = vector.shape_cast %52 : vector<1x2x64xbf16> to vector<2x64xbf16>
    %54 = vector.shape_cast %51 : vector<2x64xbf16> to vector<1x2x64xbf16>
    tpu.vector_store %arg4[%c0_54, %c2_55, %c0_56], %54 {strides = array<i32>} : memref<1x4x64xbf16, #tpu.memory_space<vmem>>, vector<1x2x64xbf16>,
    return
  }
  func.func @transform_0(%arg0: i32) -> (i32, i32, i32, i32) {
    %c0_i32 = arith.constant 0 : i32
    %c0_i32_0 = arith.constant 0 : i32
    %c0_i32_1 = arith.constant 0 : i32
    %c0_i32_2 = arith.constant 0 : i32
    return %arg0, %c0_i32, %c0_i32_0, %c0_i32_1 : i32, i32, i32, i32
  }
  func.func @transform_1(%arg0: i32) -> (i32, i32, i32) {
    %c0_i32 = arith.constant 0 : i32
    %c0_i32_0 = arith.constant 0 : i32
    %c0_i32_1 = arith.constant 0 : i32
    %c0_i32_2 = arith.constant 0 : i32
    return %c0_i32, %c0_i32_0, %c0_i32_1 : i32, i32, i32
  }
  func.func @transform_2(%arg0: i32) -> (i32, i32) {
    %c0_i32 = arith.constant 0 : i32
    %c0_i32_0 = arith.constant 0 : i32
    %c0_i32_1 = arith.constant 0 : i32
    return %c0_i32, %c0_i32_0 : i32, i32
  }
  func.func @transform_3(%arg0: i32) -> (i32, i32, i32) {
    %c0_i32 = arith.constant 0 : i32
    %c0_i32_0 = arith.constant 0 : i32
    %c0_i32_1 = arith.constant 0 : i32
    return %arg0, %c0_i32, %c0_i32_0 : i32, i32, i32
  }
}

module attributes {stable_mosaic.version = 11 : i64} {
  func.func @_conv2x2_bn_relu_kernel(%arg0: i32, %arg1: memref<1x2x2x256xbf16, #tpu.memory_space<vmem>>, %arg2: memref<4x256x128xbf16, #tpu.memory_space<vmem>>, %arg3: memref<1x128xf32, #tpu.memory_space<vmem>>, %arg4: memref<1x1x128xbf16, #tpu.memory_space<vmem>>) attributes {dimension_semantics = [#tpu.dimension_semantics<parallel>], iteration_bounds = array<i64: 2>, scalar_prefetch = 0 : i64, scratch_operands = 0 : i64, tpu.core_type = #tpu.core_type<tc>, window_params = [{transform_indices = @transform_0, window_bounds = array<i64: 1, 2, 2, 256>}, {pipeline_mode = #tpu.pipeline_mode<synchronous>, transform_indices = @transform_1, window_bounds = array<i64: 4, 256, 128>}, {pipeline_mode = #tpu.pipeline_mode<synchronous>, transform_indices = @transform_2, window_bounds = array<i64: 1, 128>}, {transform_indices = @transform_3, window_bounds = array<i64: 1, 1, 128>}]} {
    %c0 = arith.constant 0 : index
    %c0_0 = arith.constant 0 : index
    %c0_1 = arith.constant 0 : index
    %0 = vector.load %arg2[%c0, %c0_0, %c0_1] : memref<4x256x128xbf16, #tpu.memory_space<vmem>>, vector<1x256x128xbf16>
    %1 = vector.shape_cast %0 : vector<1x256x128xbf16> to vector<256x128xbf16>
    %c1 = arith.constant 1 : index
    %c0_2 = arith.constant 0 : index
    %c0_3 = arith.constant 0 : index
    %2 = vector.load %arg2[%c1, %c0_2, %c0_3] : memref<4x256x128xbf16, #tpu.memory_space<vmem>>, vector<1x256x128xbf16>
    %3 = vector.shape_cast %2 : vector<1x256x128xbf16> to vector<256x128xbf16>
    %c2 = arith.constant 2 : index
    %c0_4 = arith.constant 0 : index
    %c0_5 = arith.constant 0 : index
    %4 = vector.load %arg2[%c2, %c0_4, %c0_5] : memref<4x256x128xbf16, #tpu.memory_space<vmem>>, vector<1x256x128xbf16>
    %5 = vector.shape_cast %4 : vector<1x256x128xbf16> to vector<256x128xbf16>
    %c3 = arith.constant 3 : index
    %c0_6 = arith.constant 0 : index
    %c0_7 = arith.constant 0 : index
    %6 = vector.load %arg2[%c3, %c0_6, %c0_7] : memref<4x256x128xbf16, #tpu.memory_space<vmem>>, vector<1x256x128xbf16>
    %7 = vector.shape_cast %6 : vector<1x256x128xbf16> to vector<256x128xbf16>
    %c0_8 = arith.constant 0 : index
    %c0_9 = arith.constant 0 : index
    %8 = vector.load %arg3[%c0_8, %c0_9] : memref<1x128xf32, #tpu.memory_space<vmem>>, vector<1x128xf32>
    %c0_10 = arith.constant 0 : index
    %c0_11 = arith.constant 0 : index
    %c0_12 = arith.constant 0 : index
    %c0_13 = arith.constant 0 : index
    %9 = vector.load %arg1[%c0_10, %c0_11, %c0_12, %c0_13] : memref<1x2x2x256xbf16, #tpu.memory_space<vmem>>, vector<1x1x1x256xbf16>
    %10 = vector.shape_cast %9 : vector<1x1x1x256xbf16> to vector<1x256xbf16>
    %cst = arith.constant dense<0.000000e+00> : vector<1x128xf32>
    %11 = tpu.matmul %10, %1, %cst {dimension_numbers = #tpu.dot_dimension_numbers<[1], [0], [0], [1], [0, 0, 1, 1], [], []>} : vector<1x256xbf16>, vector<256x128xbf16>, vector<1x128xf32> -> vector<1x128xf32>
    %c0_14 = arith.constant 0 : index
    %c0_15 = arith.constant 0 : index
    %c1_16 = arith.constant 1 : index
    %c0_17 = arith.constant 0 : index
    %12 = vector.load %arg1[%c0_14, %c0_15, %c1_16, %c0_17] : memref<1x2x2x256xbf16, #tpu.memory_space<vmem>>, vector<1x1x1x256xbf16>
    %13 = vector.shape_cast %12 : vector<1x1x1x256xbf16> to vector<1x256xbf16>
    %cst_18 = arith.constant dense<0.000000e+00> : vector<1x128xf32>
    %14 = tpu.matmul %13, %3, %cst_18 {dimension_numbers = #tpu.dot_dimension_numbers<[1], [0], [0], [1], [0, 0, 1, 1], [], []>} : vector<1x256xbf16>, vector<256x128xbf16>, vector<1x128xf32> -> vector<1x128xf32>
    %15 = arith.addf %11, %14 : vector<1x128xf32>
    %c0_19 = arith.constant 0 : index
    %c1_20 = arith.constant 1 : index
    %c0_21 = arith.constant 0 : index
    %c0_22 = arith.constant 0 : index
    %16 = vector.load %arg1[%c0_19, %c1_20, %c0_21, %c0_22] : memref<1x2x2x256xbf16, #tpu.memory_space<vmem>>, vector<1x1x1x256xbf16>
    %17 = vector.shape_cast %16 : vector<1x1x1x256xbf16> to vector<1x256xbf16>
    %cst_23 = arith.constant dense<0.000000e+00> : vector<1x128xf32>
    %18 = tpu.matmul %17, %5, %cst_23 {dimension_numbers = #tpu.dot_dimension_numbers<[1], [0], [0], [1], [0, 0, 1, 1], [], []>} : vector<1x256xbf16>, vector<256x128xbf16>, vector<1x128xf32> -> vector<1x128xf32>
    %19 = arith.addf %15, %18 : vector<1x128xf32>
    %c0_24 = arith.constant 0 : index
    %c1_25 = arith.constant 1 : index
    %c1_26 = arith.constant 1 : index
    %c0_27 = arith.constant 0 : index
    %20 = vector.load %arg1[%c0_24, %c1_25, %c1_26, %c0_27] : memref<1x2x2x256xbf16, #tpu.memory_space<vmem>>, vector<1x1x1x256xbf16>
    %21 = vector.shape_cast %20 : vector<1x1x1x256xbf16> to vector<1x256xbf16>
    %cst_28 = arith.constant dense<0.000000e+00> : vector<1x128xf32>
    %22 = tpu.matmul %21, %7, %cst_28 {dimension_numbers = #tpu.dot_dimension_numbers<[1], [0], [0], [1], [0, 0, 1, 1], [], []>} : vector<1x256xbf16>, vector<256x128xbf16>, vector<1x128xf32> -> vector<1x128xf32>
    %23 = arith.addf %19, %22 : vector<1x128xf32>
    %24 = arith.addf %23, %8 : vector<1x128xf32>
    %cst_29 = arith.constant 0.000000e+00 : f32
    %25 = vector.broadcast %cst_29 : f32 to vector<1x128xf32>
    %26 = arith.maximumf %24, %25 : vector<1x128xf32>
    %27 = arith.truncf %26 : vector<1x128xf32> to vector<1x128xbf16>
    %c0_30 = arith.constant 0 : index
    %c0_31 = arith.constant 0 : index
    %c0_32 = arith.constant 0 : index
    %28 = vector.load %arg4[%c0_30, %c0_31, %c0_32] : memref<1x1x128xbf16, #tpu.memory_space<vmem>>, vector<1x1x128xbf16>
    %29 = vector.shape_cast %28 : vector<1x1x128xbf16> to vector<1x128xbf16>
    %30 = vector.shape_cast %27 : vector<1x128xbf16> to vector<1x1x128xbf16>
    tpu.vector_store %arg4[%c0_30, %c0_31, %c0_32], %30 {strides = array<i32>} : memref<1x1x128xbf16, #tpu.memory_space<vmem>>, vector<1x1x128xbf16>,
    return
  }
  func.func @transform_0(%arg0: i32) -> (i32, i32, i32, i32) {
    %c0_i32 = arith.constant 0 : i32
    %c0_i32_0 = arith.constant 0 : i32
    %c0_i32_1 = arith.constant 0 : i32
    %c0_i32_2 = arith.constant 0 : i32
    return %arg0, %c0_i32, %c0_i32_0, %c0_i32_1 : i32, i32, i32, i32
  }
  func.func @transform_1(%arg0: i32) -> (i32, i32, i32) {
    %c0_i32 = arith.constant 0 : i32
    %c0_i32_0 = arith.constant 0 : i32
    %c0_i32_1 = arith.constant 0 : i32
    %c0_i32_2 = arith.constant 0 : i32
    return %c0_i32, %c0_i32_0, %c0_i32_1 : i32, i32, i32
  }
  func.func @transform_2(%arg0: i32) -> (i32, i32) {
    %c0_i32 = arith.constant 0 : i32
    %c0_i32_0 = arith.constant 0 : i32
    %c0_i32_1 = arith.constant 0 : i32
    return %c0_i32, %c0_i32_0 : i32, i32
  }
  func.func @transform_3(%arg0: i32) -> (i32, i32, i32) {
    %c0_i32 = arith.constant 0 : i32
    %c0_i32_0 = arith.constant 0 : i32
    %c0_i32_1 = arith.constant 0 : i32
    return %arg0, %c0_i32, %c0_i32_0 : i32, i32, i32
  }
}

</mosaic_0001>

<bundles_post_ra>
// kernel: encoder_simple.5
= control target key start
LH: loop header
LB: loop body
LE: loop exit
PB: predicated region body
PF: predicated region fallthrough
CT: control target
= control target key end

     0   :  { %s1621_s12 = smov 0   ;;  %s1935_s0 = inlined_call_operand.vmem [shape: bf16[2,5,5,64], index: 0, kind: input, shape index: {}]   ;;  %s1936_s1 = inlined_call_operand.vmem [shape: bf16[4,64,32], index: 1, kind: input, shape index: {}]   ;;  %s1937_s2 = inlined_call_operand.vmem [shape: f32[1,32], index: 2, kind: input, shape index: {}]   ;;  %s1938_s3 = inlined_call_operand.vmem [shape: bf16[2,16,32], index: 3, kind: output, shape index: {}]  }
   0x1 LB: > { %s1190_s13 = sadd.s32 4294967295, %s1597_s12   ;;  %p1194_p0 = scmp.ge.s32.totalorder %s1597_s12, 1  ;;  %s1597_s12 = sphi %s1621_s12, %s13_s12  }
   0x2   : > { %p137_p1 = scmp.lt.s32.totalorder %s1597_s12, 3 }
   0x4   : > { %p138_p2 = pnand %p1194_p0, %p137_p1 }
   0x5   : > { %v1632_v0 = vld [vmem:[%s1936_s1 + $0x20] sm:$0xff] (!%p138_p2)   ;;  %v1599_v1 = vmov (!%p138_p2), 0.0   ;;  %v1645_v3 = vld [vmem:[%s1936_s1 + $0x28] sm:$0xff] (!%p138_p2)   ;;  %vm1600_vm0 = vmmov (!%p138_p2), 0   ;;  %p161_p3 = scmp.lt.s32.totalorder (!%p138_p2), %s1190_s13, 1  ;;  %v1665_v5 = vld [vmem:[%s1936_s1 + $0x30] sm:$0xff] (!%p138_p2)  }
   0x6   : > { %141 = sbr.rel (%p138_p2) target bundleno = 361 (0x169), region = 32  ;;  %1364 = vmatprep.subr.bf16.mxu0 (!%p138_p2), %v1599_v1  ;;  %1376 = vmatprep.subr.bf16.mxu1 (!%p138_p2), %v1599_v1  ;;  %v1639_v2 = vld [vmem:[%s1936_s1] sm:$0xff] (!%p138_p2)   ;;  %v1654_v4 = vld [vmem:[%s1936_s1 + $0x8] sm:$0xff] (!%p138_p2)   ;;  %v1673_v6 = vld [vmem:[%s1936_s1 + $0x10] sm:$0xff] (!%p138_p2)   ;;  %vm244_vm1 = vcmask (!%p138_p2), 523264   ;;  %vm513_vm2 = vcmask (!%p138_p2), 254976  }
   0x7   : > { %1365 = vmatpush3.bf16.msra.mxu0 (!%p138_p2), %v1632_v0  ;;  %1372 = vmatprep.mubr.msk.bf16.mxu0 (!%p138_p2), %vm1600_vm0, %v1599_v1  ;;  %v1684_v7 = vld [vmem:[%s1936_s1 + $0x38] sm:$0xff] (!%p138_p2)   ;;  %v1699_v13 = vld [vmem:[%s1936_s1 + $0x40] sm:$0xff] (!%p138_p2)   ;;  %v1717_v17 = vld [vmem:[%s1936_s1 + $0x48] sm:$0xff] (!%p138_p2)   ;;  %vm722_vm3 = vcmask (!%p138_p2), 257026  }
   0x8   : > { %1377 = vmatpush3.bf16.msra.mxu1 (!%p138_p2), %v1639_v2  ;;  %1366 = vmatprep.subr.bf16.mxu0 (!%p138_p2), %v1599_v1  ;;  %v1691_v9 = vld [vmem:[%s1936_s1 + $0x18] sm:$0xff] (!%p138_p2)   ;;  %v1705_v14 = vld [vmem:[%s1936_s1 + $0x60] sm:$0xff] (!%p138_p2)   ;;  %v1725_v19 = vld [vmem:[%s1936_s1 + $0x68] sm:$0xff] (!%p138_p2)  }
   0x9   : > { %1378 = vmatprep.subr.bf16.mxu1 (!%p138_p2), %v1599_v1  ;;  %1384 = vmatprep.mubr.msk.bf16.mxu1 (!%p138_p2), %vm1600_vm0, %v1599_v1  ;;  %v1736_v20 = vld [vmem:[%s1936_s1 + $0x50] sm:$0xff] (!%p138_p2)   ;;  %v1750_v23 = vld [vmem:[%s1936_s1 + $0x58] sm:$0xff] (!%p138_p2)  }
   0xa   : > { %v1743_v22 = vld [vmem:[%s1936_s1 + $0x70] sm:$0xff] (!%p138_p2)   ;;  %v1757_v26 = vld [vmem:[%s1936_s1 + $0x78] sm:$0xff] (!%p138_p2)  }
   0xb   : > { %1367 = vmatpush3.bf16.msra.mxu0 (!%p138_p2), %v1645_v3 }
   0xc   : > { %1379 = vmatpush3.bf16.msra.mxu1 (!%p138_p2), %v1654_v4  ;;  %1368 = vmatprep.subr.bf16.mxu0 (!%p138_p2), %v1599_v1 }
   0xd   : > { %s1940_s13 = smov (!%p161_p3, %s1190_s13), 1  ;;  %1380 = vmatprep.subr.bf16.mxu1 %v1599_v1 }
   0xe   : > { %s1556_s24 = smul.u32 20, %s1940_s13  ;;  %s1281_s27 = sshll.u32 %s1940_s13, 3 }
   0xf   : > { %1369 = vmatpush3.bf16.msra.mxu0 %v1665_v5  ;;  %s1919_s30 = scalar_lea.vmem %s1938_s3, %s1281_s27 }
  0x10   : > { %s1679_s29 = scalar_lea.vmem %s1935_s0, %s1556_s24  ;;  %1381 = vmatpush3.bf16.msra.mxu1 %v1673_v6  ;;  %1370 = vmatprep.subr.bf16.mxu0 %v1599_v1 }
  0x11   : > { %v1575_v8 = vld [vmem:[%s1679_s29] ss:$0 sps:$4 sm:$0x77]   ;;  %1382 = vmatprep.subr.bf16.mxu1 %v1599_v1  ;;  %v1584_v18 = vld [vmem:[%s1679_s29 + $0x4] ss:$0 sps:$4 sm:$0x77]  }
  0x12   : > { %v214_v10 = vshrl.u32 %v1575_v8, 16  ;;  %v216_v11 = vshll.u32 %v1575_v8, 16  ;;  %v208_v16 = vld [vmem:[%s1679_s29] sm:$0x3]  ;;  %v432_v21 = vshll.u32 %v1584_v18, 16  ;;  %v430_v24 = vshrl.u32 %v1584_v18, 16 }
  0x13   : > { %1371 = vmatpush3.bf16.msra.mxu0 %v1684_v7  ;;  %v1233_v27 = vld [vmem:[%s1679_s29 + $0x4] sm:$0x3]  ;;  %v1586_v35 = vld [vmem:[%s1679_s29 + $0x8] ss:$0 sps:$4 sm:$0x77]  }
  0x14   : > { %v218_v12 = vrot.slane %v216_v11, 1  ;;  %1383 = vmatpush3.bf16.msra.mxu1 %v1691_v9  ;;  %1388 = vmatprep.subr.bf16.mxu0 %v1599_v1  ;;  %v434_v25 = vrot.slane %v432_v21, 1  ;;  %v1585_v29 = vld [vmem:[%s1679_s29 + $0x4] ss:$0 sps:$4 sm:$0x77]   ;;  %v666_v36 = vshll.u32 %v1586_v35, 16 }
  0x15   : > { %1400 = vmatprep.subr.bf16.mxu1 %v1599_v1  ;;  %v523_v30 = vshll.u32 %v1585_v29, 16  ;;  %v521_v31 = vshrl.u32 %v1585_v29, 16  ;;  %v1247_v34 = vld [vmem:[%s1679_s29 + $0x4] sm:$0x3]  ;;  %v664_v37 = vshrl.u32 %v1586_v35, 16 }
  0x16   : > { %v219_v15 = vor.u32 %v218_v12, %v214_v10  ;;  %v435_v28 = vor.u32 %v434_v25, %v430_v24  ;;  %v668_v38 = vrot.slane %v666_v36, 1  ;;  %v1252_v39 = vld [vmem:[%s1679_s29 + $0x8] sm:$0x3]  ;;  %v1588_v47 = vld [vmem:[%s1679_s29 + $0xc] ss:$0 sps:$4 sm:$0x77]  }
  0x17   : > { %1385 = vmatmul.mubr.msk.bf16.vlgmr.msra.gmra.mrb[0].mxu1 %vm244_vm1, %v208_v16  ;;  %v525_v32 = vrot.slane %v523_v30, 1  ;;  %v1587_v41 = vld [vmem:[%s1679_s29 + $0x8] ss:$0 sps:$4 sm:$0x77]   ;;  %v875_v48 = vshll.u32 %v1588_v47, 16  ;;  %v873_v49 = vshrl.u32 %v1588_v47, 16 }
  0x18   : > { %1373 = vmatmul.mubr.msk.bf16.vlgmr.msra.gmra.mrb[0].mxu0 %vm244_vm1, %v219_v15  ;;  %1401 = vmatpush3.bf16.msra.mxu1 %v1705_v14  ;;  %v669_v40 = vor.u32 %v668_v38, %v664_v37  ;;  %v732_v42 = vshll.u32 %v1587_v41, 16  ;;  %v730_v43 = vshrl.u32 %v1587_v41, 16  ;;  %v1258_v46 = vld [vmem:[%s1679_s29 + $0x8] sm:$0x3]  ;;  %v1263_v51 = vld [vmem:[%s1679_s29 + $0xc] sm:$0x3] }
  0x19   : > { %1389 = vmatpush3.bf16.msra.mxu0 %v1699_v13  ;;  %1402 = vmatprep.subr.bf16.mxu1 %v1599_v1  ;;  %v526_v33 = vor.u32 %v525_v32, %v521_v31  ;;  %v877_v50 = vrot.slane %v875_v48, 1  ;;  %v1589_v53 = vld [vmem:[%s1679_s29 + $0xc] ss:$0 sps:$4 sm:$0x77]   ;;  %v1273_v63 = vld [vmem:[%s1679_s29 + $0x10] sm:$0x3] }
  0x1a   : > { %1390 = vmatprep.subr.bf16.mxu0 %v1599_v1  ;;  %1396 = vmatprep.mubr.msk.bf16.mxu0 %vm1600_vm0, %v1599_v1  ;;  %v734_v44 = vrot.slane %v732_v42, 1  ;;  %v935_v54 = vshll.u32 %v1589_v53, 16  ;;  %v933_v55 = vshrl.u32 %v1589_v53, 16  ;;  %v1268_v58 = vld [vmem:[%s1679_s29 + $0xc] sm:$0x3] }
  0x1b   : > { %1408 = vmatprep.mubr.msk.bf16.mxu1 %vm1600_vm0, %v1599_v1  ;;  %v878_v52 = vor.u32 %v877_v50, %v873_v49  ;;  %v1590_v59 = vld [vmem:[%s1679_s29 + $0x10] ss:$0 sps:$4 sm:$0x77]  }
  0x1c   : > { %1403 = vmatpush3.bf16.msra.mxu1 %v1725_v19  ;;  %v735_v45 = vor.u32 %v734_v44, %v730_v43  ;;  %v937_v56 = vrot.slane %v935_v54, 1  ;;  %v1078_v60 = vshll.u32 %v1590_v59, 16  ;;  %v1076_v61 = vshrl.u32 %v1590_v59, 16 }
  0x1d   : > { %1391 = vmatpush3.bf16.msra.mxu0 %v1717_v17  ;;  %1404 = vmatprep.subr.bf16.mxu1 %v1599_v1 }
  0x1e   : > { %1392 = vmatprep.subr.bf16.mxu0 %v1599_v1  ;;  %v938_v57 = vor.u32 %v937_v56, %v933_v55  ;;  %v1080_v62 = vrot.slane %v1078_v60, 1 }
  0x20   : > { %1405 = vmatpush3.bf16.msra.mxu1 %v1743_v22 }
  0x21   : > { %1393 = vmatpush3.bf16.msra.mxu0 %v1736_v20  ;;  %1406 = vmatprep.subr.bf16.mxu1 %v1599_v1 }
  0x22   : > { %1394 = vmatprep.subr.bf16.mxu0 %v1599_v1 }
  0x24   : > { %1407 = vmatpush3.bf16.msra.mxu1 %v1757_v26 }
  0x25   : > { %1395 = vmatpush3.bf16.msra.mxu0 %v1750_v23  ;;  %1424 = vmatprep.subr.bf16.mxu1 %v1599_v1 }
  0x26   : > { %1412 = vmatprep.subr.bf16.mxu0 %v1599_v1 }
  0x27   : > { %1409 = vmatmul.mubr.msk.bf16.vlgmr.msra.gmra.mrb[4].mxu1 %vm244_vm1, %v435_v28 }
  0x28   : > { %1397 = vmatmul.mubr.msk.bf16.vlgmr.msra.gmra.mrb[4].mxu0 %vm244_vm1, %v1233_v27  ;;  %1425 = vmatpush3.bf16.msra.mxu1 %v1639_v2 }
  0x29   : > { %1413 = vmatpush3.bf16.msra.mxu0 %v1632_v0  ;;  %1426 = vmatprep.subr.bf16.mxu1 %v1599_v1 }
  0x2a   : > { %1414 = vmatprep.subr.bf16.mxu0 %v1599_v1  ;;  %1420 = vmatprep.mubr.msk.bf16.mxu0 %vm1600_vm0, %v1599_v1 }
  0x2b   : > { %1432 = vmatprep.mubr.msk.bf16.mxu1 %vm1600_vm0, %v1599_v1 }
  0x2c   : > { %1427 = vmatpush3.bf16.msra.mxu1 %v1654_v4 }
  0x2d   : > { %1415 = vmatpush3.bf16.msra.mxu0 %v1645_v3  ;;  %1428 = vmatprep.subr.bf16.mxu1 %v1599_v1 }
  0x2e   : > { %1416 = vmatprep.subr.bf16.mxu0 %v1599_v1 }
  0x30   : > { %1429 = vmatpush3.bf16.msra.mxu1 %v1673_v6 }
  0x31   : > { %1417 = vmatpush3.bf16.msra.mxu0 %v1665_v5  ;;  %1430 = vmatprep.subr.bf16.mxu1 %v1599_v1 }
  0x32   : > { %1418 = vmatprep.subr.bf16.mxu0 %v1599_v1 }
  0x34   : > { %1431 = vmatpush3.bf16.msra.mxu1 %v1691_v9 }
  0x35   : > { %1419 = vmatpush3.bf16.msra.mxu0 %v1684_v7  ;;  %1448 = vmatprep.subr.bf16.mxu1 %v1599_v1 }
  0x36   : > { %1436 = vmatprep.subr.bf16.mxu0 %v1599_v1 }
  0x37   : > { %1433 = vmatmul.mubr.msk.bf16.vlgmr.msra.gmra.mrb[8].mxu1 %vm244_vm1, %v1247_v34 }
  0x38   : > { %1421 = vmatmul.mubr.msk.bf16.vlgmr.msra.gmra.mrb[8].mxu0 %vm244_vm1, %v526_v33  ;;  %1449 = vmatpush3.bf16.msra.mxu1 %v1705_v14 }
  0x39   : > { %1437 = vmatpush3.bf16.msra.mxu0 %v1699_v13  ;;  %1450 = vmatprep.subr.bf16.mxu1 %v1599_v1 }
  0x3a   : > { %1438 = vmatprep.subr.bf16.mxu0 %v1599_v1  ;;  %1444 = vmatprep.mubr.msk.bf16.mxu0 %vm1600_vm0, %v1599_v1 }
  0x3b   : > { %1456 = vmatprep.mubr.msk.bf16.mxu1 %vm1600_vm0, %v1599_v1 }
  0x3c   : > { %1451 = vmatpush3.bf16.msra.mxu1 %v1725_v19 }
  0x3d   : > { %1439 = vmatpush3.bf16.msra.mxu0 %v1717_v17  ;;  %1452 = vmatprep.subr.bf16.mxu1 %v1599_v1 }
  0x3e   : > { %1440 = vmatprep.subr.bf16.mxu0 %v1599_v1 }
  0x40   : > { %1453 = vmatpush3.bf16.msra.mxu1 %v1743_v22 }
  0x41   : > { %1441 = vmatpush3.bf16.msra.mxu0 %v1736_v20  ;;  %1454 = vmatprep.subr.bf16.mxu1 %v1599_v1 }
  0x42   : > { %1442 = vmatprep.subr.bf16.mxu0 %v1599_v1 }
  0x44   : > { %1455 = vmatpush3.bf16.msra.mxu1 %v1757_v26 }
  0x45   : > { %1443 = vmatpush3.bf16.msra.mxu0 %v1750_v23  ;;  %1472 = vmatprep.subr.bf16.mxu1 %v1599_v1 }
  0x46   : > { %1460 = vmatprep.subr.bf16.mxu0 %v1599_v1 }
  0x47   : > { %1457 = vmatmul.mubr.msk.bf16.vlgmr.msra.gmra.mrb[12].mxu1 %vm244_vm1, %v669_v40 }
  0x48   : > { %1445 = vmatmul.mubr.msk.bf16.vlgmr.msra.gmra.mrb[12].mxu0 %vm244_vm1, %v1252_v39  ;;  %1473 = vmatpush3.bf16.msra.mxu1 %v1639_v2 }
  0x49   : > { %1461 = vmatpush3.bf16.msra.mxu0 %v1632_v0  ;;  %1474 = vmatprep.subr.bf16.mxu1 %v1599_v1 }
  0x4a   : > { %1462 = vmatprep.subr.bf16.mxu0 %v1599_v1  ;;  %1468 = vmatprep.mubr.msk.bf16.mxu0 %vm1600_vm0, %v1599_v1 }
  0x4b   : > { %1480 = vmatprep.mubr.msk.bf16.mxu1 %vm1600_vm0, %v1599_v1 }
  0x4c   : > { %1475 = vmatpush3.bf16.msra.mxu1 %v1654_v4 }
  0x4d   : > { %1463 = vmatpush3.bf16.msra.mxu0 %v1645_v3  ;;  %1476 = vmatprep.subr.bf16.mxu1 %v1599_v1 }
  0x4e   : > { %1464 = vmatprep.subr.bf16.mxu0 %v1599_v1 }
  0x50   : > { %1477 = vmatpush3.bf16.msra.mxu1 %v1673_v6 }
  0x51   : > { %1465 = vmatpush3.bf16.msra.mxu0 %v1665_v5  ;;  %1478 = vmatprep.subr.bf16.mxu1 %v1599_v1 }
  0x52   : > { %1466 = vmatprep.subr.bf16.mxu0 %v1599_v1 }
  0x54   : > { %1479 = vmatpush3.bf16.msra.mxu1 %v1691_v9 }
  0x55   : > { %1467 = vmatpush3.bf16.msra.mxu0 %v1684_v7  ;;  %1496 = vmatprep.subr.bf16.mxu1 %v1599_v1 }
  0x56   : > { %1484 = vmatprep.subr.bf16.mxu0 %v1599_v1 }
  0x57   : > { %1481 = vmatmul.mubr.msk.bf16.vlgmr.msra.gmra.mrb[16].mxu1 %vm244_vm1, %v1258_v46 }
  0x58   : > { %1469 = vmatmul.mubr.msk.bf16.vlgmr.msra.gmra.mrb[16].mxu0 %vm244_vm1, %v735_v45  ;;  %1497 = vmatpush3.bf16.msra.mxu1 %v1705_v14 }
  0x59   : > { %1485 = vmatpush3.bf16.msra.mxu0 %v1699_v13  ;;  %1498 = vmatprep.subr.bf16.mxu1 %v1599_v1 }
  0x5a   : > { %1486 = vmatprep.subr.bf16.mxu0 %v1599_v1  ;;  %1492 = vmatprep.mubr.msk.bf16.mxu0 %vm1600_vm0, %v1599_v1 }
  0x5b   : > { %1504 = vmatprep.mubr.msk.bf16.mxu1 %vm1600_vm0, %v1599_v1 }
  0x5c   : > { %1499 = vmatpush3.bf16.msra.mxu1 %v1725_v19 }
  0x5d   : > { %1487 = vmatpush3.bf16.msra.mxu0 %v1717_v17  ;;  %1500 = vmatprep.subr.bf16.mxu1 %v1599_v1 }
  0x5e   : > { %1488 = vmatprep.subr.bf16.mxu0 %v1599_v1 }
  0x60   : > { %1501 = vmatpush3.bf16.msra.mxu1 %v1743_v22 }
  0x61   : > { %1489 = vmatpush3.bf16.msra.mxu0 %v1736_v20  ;;  %1502 = vmatprep.subr.bf16.mxu1 %v1599_v1 }
  0x62   : > { %1490 = vmatprep.subr.bf16.mxu0 %v1599_v1 }
  0x64   : > { %1503 = vmatpush3.bf16.msra.mxu1 %v1757_v26 }
  0x65   : > { %1491 = vmatpush3.bf16.msra.mxu0 %v1750_v23  ;;  %1520 = vmatprep.subr.bf16.mxu1 %v1599_v1 }
  0x66   : > { %1508 = vmatprep.subr.bf16.mxu0 %v1599_v1 }
  0x67   : > { %1505 = vmatmul.mubr.msk.bf16.vlgmr.msra.gmra.mrb[20].mxu1 %vm244_vm1, %v878_v52 }
  0x68   : > { %1493 = vmatmul.mubr.msk.bf16.vlgmr.msra.gmra.mrb[20].mxu0 %vm244_vm1, %v1263_v51  ;;  %1521 = vmatpush3.bf16.msra.mxu1 %v1639_v2 }
  0x69   : > { %1509 = vmatpush3.bf16.msra.mxu0 %v1632_v0  ;;  %1522 = vmatprep.subr.bf16.mxu1 %v1599_v1  ;;  %v1081_v0 = vor.u32 %v1080_v62, %v1076_v61 }
  0x6a   : > { %1510 = vmatprep.subr.bf16.mxu0 %v1599_v1  ;;  %1516 = vmatprep.mubr.msk.bf16.mxu0 %vm1600_vm0, %v1599_v1 }
  0x6b   : > { %1528 = vmatprep.mubr.msk.bf16.mxu1 %vm1600_vm0, %v1599_v1 }
  0x6c   : > { %1523 = vmatpush3.bf16.msra.mxu1 %v1654_v4 }
  0x6d   : > { %1511 = vmatpush3.bf16.msra.mxu0 %v1645_v3  ;;  %1524 = vmatprep.subr.bf16.mxu1 %v1599_v1 }
  0x6e   : > { %1512 = vmatprep.subr.bf16.mxu0 %v1599_v1 }
  0x70   : > { %1525 = vmatpush3.bf16.msra.mxu1 %v1673_v6 }
  0x71   : > { %1513 = vmatpush3.bf16.msra.mxu0 %v1665_v5  ;;  %1526 = vmatprep.subr.bf16.mxu1 %v1599_v1 }
  0x72   : > { %1514 = vmatprep.subr.bf16.mxu0 %v1599_v1 }
  0x74   : > { %1527 = vmatpush3.bf16.msra.mxu1 %v1691_v9 }
  0x75   : > { %1515 = vmatpush3.bf16.msra.mxu0 %v1684_v7  ;;  %1544 = vmatprep.subr.bf16.mxu1 %v1599_v1 }
  0x76   : > { %1532 = vmatprep.subr.bf16.mxu0 %v1599_v1 }
  0x77   : > { %1529 = vmatmul.mubr.msk.bf16.vlgmr.msra.gmra.mrb[24].mxu1 %vm244_vm1, %v1268_v58 }
  0x78   : > { %1517 = vmatmul.mubr.msk.bf16.vlgmr.msra.gmra.mrb[24].mxu0 %vm244_vm1, %v938_v57  ;;  %1545 = vmatpush3.bf16.msra.mxu1 %v1705_v14  ;;  %v1912_v14 = vld [vmem:[%s1937_s2] ss:$0 sm:$0xff] }
  0x79   : > { %1533 = vmatpush3.bf16.msra.mxu0 %v1699_v13  ;;  %1546 = vmatprep.subr.bf16.mxu1 %v1599_v1 }
  0x7a   : > { %1534 = vmatprep.subr.bf16.mxu0 %v1599_v1  ;;  %1540 = vmatprep.mubr.msk.bf16.mxu0 %vm1600_vm0, %v1599_v1 }
  0x7b   : > { %1552 = vmatprep.mubr.msk.bf16.mxu1 %vm1600_vm0, %v1599_v1 }
  0x7c   : > { %1547 = vmatpush3.bf16.msra.mxu1 %v1725_v19 }
  0x7d   : > { %1535 = vmatpush3.bf16.msra.mxu0 %v1717_v17  ;;  %1548 = vmatprep.subr.bf16.mxu1 %v1599_v1 }
  0x7e   : > { %1536 = vmatprep.subr.bf16.mxu0 %v1599_v1 }
  0x80   : > { %1549 = vmatpush3.bf16.msra.mxu1 %v1743_v22 }
  0x81   : > { %1537 = vmatpush3.bf16.msra.mxu0 %v1736_v20  ;;  %1550 = vmatprep.subr.bf16.mxu1 %v1599_v1 }
  0x82   : > { %1538 = vmatprep.subr.bf16.mxu0 %v1599_v1 }
  0x84   : > { %1551 = vmatpush3.bf16.msra.mxu1 %v1757_v26 }
  0x85   : > { %1539 = vmatpush3.bf16.msra.mxu0 %v1750_v23 }
  0x87   : > { %1553 = vmatmul.mubr.msk.bf16.vlgmr.msra.gmra.mrb[28].mxu1 %vm244_vm1, %v1081_v0 }
  0x88   : > { %1541 = vmatmul.mubr.msk.bf16.vlgmr.msra.gmra.mrb[28].mxu0 %vm244_vm1, %v1273_v63 }
  0xea   : > { %v349_v3 = vpop.f32.mrb[0].mxu1 }
  0xeb   : > { %v282_v2 = vpop.f32.mrb[0].mxu0  ;;  %v1386_v6 = vpop.f32.mrb[1].mxu1 }
  0xec   : > { %v1374_v4 = vpop.f32.mrb[1].mxu0  ;;  %v350_v5 = vadd.f32 %v349_v3, %v282_v2  ;;  %v352_v8 = vpop.f32.mrb[2].mxu1 }
  0xed   : > { %v285_v7 = vpop.f32.mrb[2].mxu0  ;;  %v1387_v1 = vpop.f32.mrb[3].mxu1 }
  0xee   : > { %v1375_v9 = vpop.f32.mrb[3].mxu0 }
  0xfa   : > { %v497_v12 = vpop.f32.mrb[4].mxu1 }
  0xfb   : > { %v418_v10 = vpop.f32.mrb[4].mxu0  ;;  %v1410_v15 = vpop.f32.mrb[5].mxu1 }
  0xfc   : > { %v424_v11 = vadd.f32 %v418_v10, %v350_v5  ;;  %v1398_v13 = vpop.f32.mrb[5].mxu0  ;;  %v500_v18 = vpop.f32.mrb[6].mxu1 }
  0xfd   : > { %v421_v16 = vpop.f32.mrb[6].mxu0  ;;  %v1411_v20 = vpop.f32.mrb[7].mxu1 }
  0xfe   : > { %v503_v17 = vadd.f32 %v497_v12, %v424_v11  ;;  %v1399_v19 = vpop.f32.mrb[7].mxu0 }
 0x100   : > { %v510_v21 = vadd.f32 %v1912_v14, %v503_v17 }
 0x102   : > { %v511_v22 = vmax.f32 %v510_v21, 0.0 }
 0x104   : > { %v512_v23 = vpack.c.bf16 %v511_v22, %v511_v22 }
 0x106   : > { %514 = vst.msk [vmem:[%s1919_s30] sm:$0x3] %vm513_vm2, %v512_v23 }
 0x10a   : > { %v607_v25 = vpop.f32.mrb[8].mxu1 }
 0x10b   : > { %v564_v24 = vpop.f32.mrb[8].mxu0  ;;  %v1434_v28 = vpop.f32.mrb[9].mxu1 }
 0x10c   : > { %v1422_v26 = vpop.f32.mrb[9].mxu0  ;;  %v608_v27 = vadd.f32 %v607_v25, %v564_v24  ;;  %v610_v30 = vpop.f32.mrb[10].mxu1 }
 0x10d   : > { %v567_v29 = vpop.f32.mrb[10].mxu0  ;;  %v1435_v32 = vpop.f32.mrb[11].mxu1 }
 0x10e   : > { %v1423_v31 = vpop.f32.mrb[11].mxu0 }
 0x11a   : > { %v707_v35 = vpop.f32.mrb[12].mxu1 }
 0x11b   : > { %v652_v33 = vpop.f32.mrb[12].mxu0  ;;  %v1458_v37 = vpop.f32.mrb[13].mxu1 }
 0x11c   : > { %v658_v34 = vadd.f32 %v652_v33, %v608_v27  ;;  %v1446_v36 = vpop.f32.mrb[13].mxu0  ;;  %v710_v40 = vpop.f32.mrb[14].mxu1 }
 0x11d   : > { %v655_v38 = vpop.f32.mrb[14].mxu0  ;;  %v1459_v42 = vpop.f32.mrb[15].mxu1 }
 0x11e   : > { %v713_v39 = vadd.f32 %v707_v35, %v658_v34  ;;  %v1447_v41 = vpop.f32.mrb[15].mxu0 }
 0x120   : > { %v714_v43 = vadd.f32 %v1912_v14, %v713_v39 }
 0x122   : > { %v715_v44 = vmax.f32 %v714_v43, 0.0 }
 0x124   : > { %v1282_v45 = vpack.c.bf16 %v715_v44, %v715_v44 }
 0x126   : > { %v720_v46 = vrot.slane %v1282_v45, 6 }
 0x128   : > { %723 = vst.msk [vmem:[%s1919_s30] sm:$0xc] %vm722_vm3, %v720_v46 }
 0x12a   : > { %v816_v48 = vpop.f32.mrb[16].mxu1 }
 0x12b   : > { %v773_v47 = vpop.f32.mrb[16].mxu0  ;;  %v1482_v51 = vpop.f32.mrb[17].mxu1 }
 0x12c   : > { %v1470_v49 = vpop.f32.mrb[17].mxu0  ;;  %v817_v50 = vadd.f32 %v816_v48, %v773_v47  ;;  %v819_v53 = vpop.f32.mrb[18].mxu1 }
 0x12d   : > { %v776_v52 = vpop.f32.mrb[18].mxu0  ;;  %v1483_v55 = vpop.f32.mrb[19].mxu1 }
 0x12e   : > { %v1471_v54 = vpop.f32.mrb[19].mxu0 }
 0x13a   : > { %v916_v58 = vpop.f32.mrb[20].mxu1 }
 0x13b   : > { %v861_v56 = vpop.f32.mrb[20].mxu0  ;;  %v1506_v60 = vpop.f32.mrb[21].mxu1 }
 0x13c   : > { %v867_v57 = vadd.f32 %v861_v56, %v817_v50  ;;  %v1494_v59 = vpop.f32.mrb[21].mxu0  ;;  %v919_v63 = vpop.f32.mrb[22].mxu1 }
 0x13d   : > { %v864_v61 = vpop.f32.mrb[22].mxu0  ;;  %v1507_v2 = vpop.f32.mrb[23].mxu1 }
 0x13e   : > { %v922_v62 = vadd.f32 %v916_v58, %v867_v57  ;;  %v1495_v0 = vpop.f32.mrb[23].mxu0 }
 0x140   : > { %v923_v3 = vadd.f32 %v1912_v14, %v922_v62 }
 0x142   : > { %v924_v4 = vmax.f32 %v923_v3, 0.0 }
 0x144   : > { %v925_v5 = vpack.c.bf16 %v924_v4, %v924_v4 }
 0x146   : > { %926 = vst.msk [vmem:[%s1919_s30 + $0x4] sm:$0x3] %vm513_vm2, %v925_v5 }
 0x14a   : > { %v1019_v7 = vpop.f32.mrb[24].mxu1 }
 0x14b   : > { %v976_v6 = vpop.f32.mrb[24].mxu0  ;;  %v1530_v1 = vpop.f32.mrb[25].mxu1 }
 0x14c   : > { %v1518_v8 = vpop.f32.mrb[25].mxu0  ;;  %v1020_v9 = vadd.f32 %v1019_v7, %v976_v6  ;;  %v1022_v11 = vpop.f32.mrb[26].mxu1 }
 0x14d   : > { %v979_v10 = vpop.f32.mrb[26].mxu0  ;;  %v1531_v13 = vpop.f32.mrb[27].mxu1 }
 0x14e   : > { %v1519_v12 = vpop.f32.mrb[27].mxu0 }
 0x15a   : > { %v1119_v17 = vpop.f32.mrb[28].mxu1 }
 0x15b   : > { %v1064_v15 = vpop.f32.mrb[28].mxu0  ;;  %v1554_v19 = vpop.f32.mrb[29].mxu1 }
 0x15c   : > { %v1070_v16 = vadd.f32 %v1064_v15, %v1020_v9  ;;  %v1542_v18 = vpop.f32.mrb[29].mxu0  ;;  %v1122_v22 = vpop.f32.mrb[30].mxu1 }
 0x15d   : > { %v1067_v20 = vpop.f32.mrb[30].mxu0  ;;  %v1555_v24 = vpop.f32.mrb[31].mxu1 }
 0x15e   : > { %v1125_v21 = vadd.f32 %v1119_v17, %v1070_v16  ;;  %v1543_v23 = vpop.f32.mrb[31].mxu0 }
 0x160   : > { %v1126_v25 = vadd.f32 %v1912_v14, %v1125_v21 }
 0x162   : > { %v1127_v26 = vmax.f32 %v1126_v25, 0.0 }
 0x164   : > { %v1283_v27 = vpack.c.bf16 %v1127_v26, %v1127_v26 }
 0x166   : > { %v1132_v28 = vrot.slane %v1283_v27, 6 }
 0x168   : > { %1134 = vst.msk [vmem:[%s1919_s30 + $0x4] sm:$0xc] %vm722_vm3, %v1132_v28 }
 0x169 PF: > { %s13_s12 = sadd.s32 1, %s1597_s12  }
 0x16a   : > { %p10_p4 = scmp.ge.s32.totalorder %s13_s12, 4  }
 0x16c   :  { %12 = sbr.rel (!%p10_p4) target bundleno = 1 (0x1), region = 69 }

// kernel: encoder_simple.4
= control target key start
LH: loop header
LB: loop body
LE: loop exit
PB: predicated region body
PF: predicated region fallthrough
CT: control target
= control target key end

     0   :  { %s2369_s12 = smov 0   ;;  %s2639_s0 = inlined_call_operand.vmem [shape: bf16[2,9,9,12], index: 0, kind: input, shape index: {}]   ;;  %s2640_s1 = inlined_call_operand.vmem [shape: bf16[4,12,16], index: 1, kind: input, shape index: {}]   ;;  %s2641_s2 = inlined_call_operand.vmem [shape: f32[1,16], index: 2, kind: input, shape index: {}]   ;;  %s2642_s3 = inlined_call_operand.vmem [shape: bf16[2,64,16], index: 3, kind: output, shape index: {}]  }
   0x1 LB: > { %s1944_s13 = sadd.s32 4294967295, %s2345_s12   ;;  %p1948_p0 = scmp.ge.s32.totalorder %s2345_s12, 1  ;;  %s2345_s12 = sphi %s2369_s12, %s13_s12  }
   0x2   : > { %p137_p1 = scmp.lt.s32.totalorder %s2345_s12, 3 }
   0x4   : > { %p138_p2 = pnand %p1948_p0, %p137_p1 }
   0x5   : > { %vm207_vm0 = vcmask (!%p138_p2), 1045504   ;;  %v2347_v0 = vmov (!%p138_p2), 0.0   ;;  %v2319_v1 = vld [vmem:[%s2640_s1 + $0x8] sm:$0x3f] (!%p138_p2)   ;;  %v2320_v2 = vld [vmem:[%s2640_s1] sm:$0x3f] (!%p138_p2)  }
   0x6   : > { %141 = sbr.rel (%p138_p2) target bundleno = 369 (0x171), region = 32  ;;  %2116 = vmatprep.subr.bf16.mxu0 (!%p138_p2), %v2347_v0  ;;  %2122 = vmatprep.subr.bf16.mxu1 (!%p138_p2), %v2347_v0  ;;  %p161_p3 = scmp.lt.s32.totalorder (!%p138_p2), %s1944_s13, 1  ;;  %v2386_v3 = vsel (!%p138_p2), %vm207_vm0, %v2319_v1, 0  ;;  %vm2348_vm1 = vmmov (!%p138_p2), 0   ;;  %v2394_v4 = vsel (!%p138_p2), %vm207_vm0, %v2320_v2, 0  ;;  %vm203_vm2 = vcmask (!%p138_p2), 97280  }
   0x7   : > { %2124 = vmatprep.mubr.msk.bf16.mxu1 (!%p138_p2), %vm2348_vm1, %v2347_v0  ;;  %2118 = vmatprep.mubr.msk.bf16.mxu0 (!%p138_p2), %vm2348_vm1, %v2347_v0  ;;  %v2323_v5 = vld [vmem:[%s2640_s1 + $0x18] sm:$0x3f] (!%p138_p2)   ;;  %v2322_v11 = vld [vmem:[%s2640_s1 + $0x10] sm:$0x3f] (!%p138_p2)   ;;  %vm431_vm3 = vcmask (!%p138_p2), 125952  }
   0x8   : > { %2117 = vmatpush3.bf16.msra.mxu0 (!%p138_p2), %v2386_v3  ;;  %2123 = vmatpush3.bf16.msra.mxu1 (!%p138_p2), %v2394_v4  ;;  %v2411_v6 = vsel (!%p138_p2), %vm207_vm0, %v2323_v5, 0  ;;  %v2427_v21 = vsel (!%p138_p2), %vm207_vm0, %v2322_v11, 0 }
   0x9   : > { %2128 = vmatprep.subr.bf16.mxu0 (!%p138_p2), %v2347_v0  ;;  %2134 = vmatprep.subr.bf16.mxu1 (!%p138_p2), %v2347_v0 }
   0xd   : > { %s2644_s13 = smov (!%p161_p3, %s1944_s13), 1 }
   0xe   : > { %s2308_s20 = smul.u32 72, %s2644_s13  ;;  %s2051_s28 = sshll.u32 %s2644_s13, 5 }
   0xf   : > { %s2611_s4 = scalar_lea.vmem %s2642_s3, %s2051_s28 }
  0x10   : > { %s2408_s23 = scalar_lea.vmem %s2639_s0, %s2308_s20 }
  0x11   : > { %v184_v7 = vld [vmem:[%s2408_s23] sm:$0xf]  ;;  %v185_v8 = vld [vmem:[%s2408_s23 + $0x4] sm:$0x1]  ;;  %v2324_v10 = vld [vmem:[%s2408_s23 + $0x8] sm:$0x1f]  }
  0x12   : > { %v1958_v9 = vcombine.low %v184_v7, %v185_v8  ;;  %2125 = vmatmul.mubr.msk.bf16.vlgmr.msra.gmra.mrb[0].mxu1 %vm203_vm2, %v184_v7  ;;  %v364_v14 = vshrl.u32 %v2324_v10, 16  ;;  %v366_v15 = vshll.u32 %v2324_v10, 16  ;;  %v1972_v18 = vld [vmem:[%s2408_s23 + $0x8] sm:$0xf]  ;;  %v1973_v19 = vld [vmem:[%s2408_s23 + $0xc] sm:$0x1] }
  0x13   : > { %2135 = vmatpush3.bf16.msra.mxu1 %v2411_v6  ;;  %2136 = vmatprep.mubr.msk.bf16.mxu1 %vm2348_vm1, %v2347_v0  ;;  %v1974_v23 = vcombine.low %v1972_v18, %v1973_v19  ;;  %v2326_v24 = vld [vmem:[%s2408_s23 + $0x10] sm:$0x1f]   ;;  %v1963_v27 = vld [vmem:[%s2408_s23 + $0x8] sm:$0xf]  ;;  %v2328_v37 = vld [vmem:[%s2408_s23 + $0x18] sm:$0x1f]  }
  0x14   : > { %v192_v12 = vshrl.u32 %v1958_v9, 16  ;;  %v194_v13 = vshll.u32 %v1958_v9, 16  ;;  %2146 = vmatprep.subr.bf16.mxu1 %v2347_v0  ;;  %v368_v17 = vrot.slane %v366_v15, 1  ;;  %v589_v26 = vshll.u32 %v2326_v24, 16  ;;  %v1983_v34 = vld [vmem:[%s2408_s23 + $0x10] sm:$0xf] }
  0x15   : > { %v443_v25 = vshll.u32 %v1974_v23, 16  ;;  %v441_v28 = vshrl.u32 %v1974_v23, 16  ;;  %v587_v30 = vshrl.u32 %v2326_v24, 16  ;;  %v1984_v35 = vld [vmem:[%s2408_s23 + $0x14] sm:$0x1]  ;;  %v797_v39 = vshll.u32 %v2328_v37, 16 }
  0x16   : > { %v196_v16 = vrot.slane %v194_v13, 1  ;;  %v369_v22 = vor.u32 %v368_v17, %v364_v14  ;;  %v591_v31 = vrot.slane %v589_v26, 1  ;;  %v1985_v36 = vcombine.low %v1983_v34, %v1984_v35  ;;  %v1977_v40 = vld [vmem:[%s2408_s23 + $0x10] sm:$0xf]  ;;  %v1994_v47 = vld [vmem:[%s2408_s23 + $0x18] sm:$0xf] }
  0x17   : > { %v445_v29 = vrot.slane %v443_v25, 1  ;;  %v795_v43 = vshrl.u32 %v2328_v37, 16  ;;  %v799_v44 = vrot.slane %v797_v39, 1  ;;  %v1995_v48 = vld [vmem:[%s2408_s23 + $0x1c] sm:$0x1] }
  0x18   : > { %v197_v20 = vor.u32 %v196_v16, %v192_v12  ;;  %v592_v33 = vor.u32 %v591_v31, %v587_v30  ;;  %v651_v38 = vshll.u32 %v1985_v36, 16  ;;  %v649_v41 = vshrl.u32 %v1985_v36, 16  ;;  %v2330_v50 = vld [vmem:[%s2408_s23 + $0x20] sm:$0x1f]   ;;  %v1988_v53 = vld [vmem:[%s2408_s23 + $0x18] sm:$0xf] }
  0x19   : > { %v446_v32 = vor.u32 %v445_v29, %v441_v28  ;;  %v800_v46 = vor.u32 %v799_v44, %v795_v43  ;;  %v1996_v49 = vcombine.low %v1994_v47, %v1995_v48  ;;  %v1005_v52 = vshll.u32 %v2330_v50, 16  ;;  %v2005_v60 = vld [vmem:[%s2408_s23 + $0x20] sm:$0xf]  ;;  %v2006_v61 = vld [vmem:[%s2408_s23 + $0x24] sm:$0x1] }
  0x1a   : > { %2119 = vmatmul.mubr.msk.bf16.vlgmr.msra.gmra.mrb[0].mxu0 %vm203_vm2, %v197_v20  ;;  %2137 = vmatmul.mubr.msk.bf16.vlgmr.msra.gmra.mrb[4].mxu1 %vm203_vm2, %v369_v22  ;;  %v653_v42 = vrot.slane %v651_v38, 1  ;;  %v1003_v56 = vshrl.u32 %v2330_v50, 16  ;;  %v2007_v62 = vcombine.low %v2005_v60, %v2006_v61  ;;  %v2332_v63 = vld [vmem:[%s2408_s23 + $0x28] sm:$0x1f]   ;;  %v1999_v5 = vld [vmem:[%s2408_s23 + $0x20] sm:$0xf] }
  0x1b   : > { %2129 = vmatpush3.bf16.msra.mxu0 %v2427_v21  ;;  %2130 = vmatprep.mubr.msk.bf16.mxu0 %vm2348_vm1, %v2347_v0  ;;  %v859_v51 = vshll.u32 %v1996_v49, 16  ;;  %v857_v54 = vshrl.u32 %v1996_v49, 16  ;;  %v1007_v57 = vrot.slane %v1005_v52, 1  ;;  %v1213_v2 = vshll.u32 %v2332_v63, 16  ;;  %v2016_v13 = vld [vmem:[%s2408_s23 + $0x28] sm:$0xf] }
  0x1c   : > { %2140 = vmatprep.subr.bf16.mxu0 %v2347_v0  ;;  %2147 = vmatpush3.bf16.msra.mxu1 %v2394_v4  ;;  %v654_v45 = vor.u32 %v653_v42, %v649_v41  ;;  %v1067_v1 = vshll.u32 %v2007_v62, 16  ;;  %v1065_v7 = vshrl.u32 %v2007_v62, 16  ;;  %v1211_v9 = vshrl.u32 %v2332_v63, 16  ;;  %v2017_v14 = vld [vmem:[%s2408_s23 + $0x2c] sm:$0x1] }
  0x1d   : > { %2148 = vmatprep.mubr.msk.bf16.mxu1 %vm2348_vm1, %v2347_v0  ;;  %2158 = vmatprep.subr.bf16.mxu1 %v2347_v0  ;;  %v861_v55 = vrot.slane %v859_v51, 1  ;;  %v1008_v59 = vor.u32 %v1007_v57, %v1003_v56  ;;  %v1215_v10 = vrot.slane %v1213_v2, 1  ;;  %v2018_v15 = vcombine.low %v2016_v13, %v2017_v14  ;;  %v2334_v16 = vld [vmem:[%s2408_s23 + $0x30] sm:$0x1f]   ;;  %v2010_v19 = vld [vmem:[%s2408_s23 + $0x28] sm:$0xf] }
  0x1e   : > { %v1069_v8 = vrot.slane %v1067_v1, 1  ;;  %v1419_v23 = vshrl.u32 %v2334_v16, 16  ;;  %v2028_v28 = vld [vmem:[%s2408_s23 + $0x34] sm:$0x1]  ;;  %v2336_v30 = vld [vmem:[%s2408_s23 + $0x38] sm:$0x1f]  }
  0x1f   : > { %v862_v58 = vor.u32 %v861_v55, %v857_v54  ;;  %v1216_v12 = vor.u32 %v1215_v10, %v1211_v9  ;;  %v1275_v17 = vshll.u32 %v2018_v15, 16  ;;  %v1273_v20 = vshrl.u32 %v2018_v15, 16  ;;  %v2039_v41 = vld [vmem:[%s2408_s23 + $0x3c] sm:$0x1]  ;;  %v2338_v43 = vld [vmem:[%s2408_s23 + $0x40] sm:$0x1f]  }
  0x20   : > { %v1070_v11 = vor.u32 %v1069_v8, %v1065_v7  ;;  %v1627_v36 = vshrl.u32 %v2336_v30, 16  ;;  %v1835_v49 = vshrl.u32 %v2338_v43, 16  ;;  %v2604_v7 = vld [vmem:[%s2641_s2] ss:$0 sm:$0xff] }
  0x21   : > { %v1277_v22 = vrot.slane %v1275_v17, 1 }
  0x22   : > { %2131 = vmatmul.mubr.msk.bf16.vlgmr.msra.gmra.mrb[4].mxu0 %vm203_vm2, %v1963_v27  ;;  %2149 = vmatmul.mubr.msk.bf16.vlgmr.msra.gmra.mrb[8].mxu1 %vm203_vm2, %v1972_v18  ;;  %v1421_v18 = vshll.u32 %v2334_v16, 16  ;;  %v2027_v27 = vld [vmem:[%s2408_s23 + $0x30] sm:$0xf] }
  0x23   : > { %2141 = vmatpush3.bf16.msra.mxu0 %v2386_v3  ;;  %2142 = vmatprep.mubr.msk.bf16.mxu0 %vm2348_vm1, %v2347_v0  ;;  %v1278_v25 = vor.u32 %v1277_v22, %v1273_v20  ;;  %v2029_v29 = vcombine.low %v2027_v27, %v2028_v28 }
  0x24   : > { %2152 = vmatprep.subr.bf16.mxu0 %v2347_v0  ;;  %2159 = vmatpush3.bf16.msra.mxu1 %v2411_v6  ;;  %v1423_v24 = vrot.slane %v1421_v18, 1 }
  0x25   : > { %2160 = vmatprep.mubr.msk.bf16.mxu1 %vm2348_vm1, %v2347_v0  ;;  %2170 = vmatprep.subr.bf16.mxu1 %v2347_v0  ;;  %v1483_v31 = vshll.u32 %v2029_v29, 16 }
  0x26   : > { %v1424_v26 = vor.u32 %v1423_v24, %v1419_v23 }
  0x27   : > { %v1485_v35 = vrot.slane %v1483_v31, 1 }
  0x2a   : > { %2143 = vmatmul.mubr.msk.bf16.vlgmr.msra.gmra.mrb[8].mxu0 %vm203_vm2, %v446_v32  ;;  %2161 = vmatmul.mubr.msk.bf16.vlgmr.msra.gmra.mrb[12].mxu1 %vm203_vm2, %v592_v33  ;;  %v1629_v32 = vshll.u32 %v2336_v30, 16  ;;  %v2021_v33 = vld [vmem:[%s2408_s23 + $0x30] sm:$0xf] }
  0x2b   : > { %2153 = vmatpush3.bf16.msra.mxu0 %v2427_v21  ;;  %2154 = vmatprep.mubr.msk.bf16.mxu0 %vm2348_vm1, %v2347_v0 }
  0x2c   : > { %2164 = vmatprep.subr.bf16.mxu0 %v2347_v0  ;;  %2171 = vmatpush3.bf16.msra.mxu1 %v2394_v4  ;;  %v1631_v37 = vrot.slane %v1629_v32, 1 }
  0x2d   : > { %2172 = vmatprep.mubr.msk.bf16.mxu1 %vm2348_vm1, %v2347_v0  ;;  %2182 = vmatprep.subr.bf16.mxu1 %v2347_v0 }
  0x2e   : > { %v1632_v39 = vor.u32 %v1631_v37, %v1627_v36 }
  0x32   : > { %2155 = vmatmul.mubr.msk.bf16.vlgmr.msra.gmra.mrb[12].mxu0 %vm203_vm2, %v1977_v40  ;;  %2173 = vmatmul.mubr.msk.bf16.vlgmr.msra.gmra.mrb[16].mxu1 %vm203_vm2, %v1983_v34  ;;  %v1481_v34 = vshrl.u32 %v2029_v29, 16  ;;  %v2038_v40 = vld [vmem:[%s2408_s23 + $0x38] sm:$0xf] }
  0x33   : > { %2165 = vmatpush3.bf16.msra.mxu0 %v2386_v3  ;;  %2166 = vmatprep.mubr.msk.bf16.mxu0 %vm2348_vm1, %v2347_v0  ;;  %v2040_v42 = vcombine.low %v2038_v40, %v2039_v41 }
  0x34   : > { %2176 = vmatprep.subr.bf16.mxu0 %v2347_v0  ;;  %2183 = vmatpush3.bf16.msra.mxu1 %v2411_v6  ;;  %v1486_v38 = vor.u32 %v1485_v35, %v1481_v34 }
  0x35   : > { %2184 = vmatprep.mubr.msk.bf16.mxu1 %vm2348_vm1, %v2347_v0  ;;  %2194 = vmatprep.subr.bf16.mxu1 %v2347_v0  ;;  %v1691_v44 = vshll.u32 %v2040_v42, 16 }
  0x37   : > { %v1693_v48 = vrot.slane %v1691_v44, 1 }
  0x3a   : > { %2167 = vmatmul.mubr.msk.bf16.vlgmr.msra.gmra.mrb[16].mxu0 %vm203_vm2, %v654_v45  ;;  %2185 = vmatmul.mubr.msk.bf16.vlgmr.msra.gmra.mrb[20].mxu1 %vm203_vm2, %v800_v46  ;;  %v1837_v45 = vshll.u32 %v2338_v43, 16  ;;  %v2032_v46 = vld [vmem:[%s2408_s23 + $0x38] sm:$0xf] }
  0x3b   : > { %2177 = vmatpush3.bf16.msra.mxu0 %v2427_v21  ;;  %2178 = vmatprep.mubr.msk.bf16.mxu0 %vm2348_vm1, %v2347_v0 }
  0x3c   : > { %2188 = vmatprep.subr.bf16.mxu0 %v2347_v0  ;;  %2195 = vmatpush3.bf16.msra.mxu1 %v2394_v4  ;;  %v1839_v50 = vrot.slane %v1837_v45, 1 }
  0x3d   : > { %2196 = vmatprep.mubr.msk.bf16.mxu1 %vm2348_vm1, %v2347_v0  ;;  %2206 = vmatprep.subr.bf16.mxu1 %v2347_v0 }
  0x3e   : > { %v1840_v51 = vor.u32 %v1839_v50, %v1835_v49 }
  0x42   : > { %2179 = vmatmul.mubr.msk.bf16.vlgmr.msra.gmra.mrb[20].mxu0 %vm203_vm2, %v1988_v53  ;;  %2197 = vmatmul.mubr.msk.bf16.vlgmr.msra.gmra.mrb[24].mxu1 %vm203_vm2, %v1994_v47  ;;  %v1689_v47 = vshrl.u32 %v2040_v42, 16 }
  0x43   : > { %2189 = vmatpush3.bf16.msra.mxu0 %v2386_v3  ;;  %2190 = vmatprep.mubr.msk.bf16.mxu0 %vm2348_vm1, %v2347_v0 }
  0x44   : > { %2200 = vmatprep.subr.bf16.mxu0 %v2347_v0  ;;  %2207 = vmatpush3.bf16.msra.mxu1 %v2411_v6 }
  0x45   : > { %2208 = vmatprep.mubr.msk.bf16.mxu1 %vm2348_vm1, %v2347_v0  ;;  %2218 = vmatprep.subr.bf16.mxu1 %v2347_v0 }
  0x4a   : > { %2191 = vmatmul.mubr.msk.bf16.vlgmr.msra.gmra.mrb[24].mxu0 %vm203_vm2, %v862_v58  ;;  %2209 = vmatmul.mubr.msk.bf16.vlgmr.msra.gmra.mrb[28].mxu1 %vm203_vm2, %v1008_v59 }
  0x4b   : > { %2201 = vmatpush3.bf16.msra.mxu0 %v2427_v21  ;;  %2202 = vmatprep.mubr.msk.bf16.mxu0 %vm2348_vm1, %v2347_v0 }
  0x4c   : > { %2212 = vmatprep.subr.bf16.mxu0 %v2347_v0  ;;  %2219 = vmatpush3.bf16.msra.mxu1 %v2394_v4 }
  0x4d   : > { %2220 = vmatprep.mubr.msk.bf16.mxu1 %vm2348_vm1, %v2347_v0  ;;  %2230 = vmatprep.subr.bf16.mxu1 %v2347_v0 }
  0x52   : > { %2203 = vmatmul.mubr.msk.bf16.vlgmr.msra.gmra.mrb[28].mxu0 %vm203_vm2, %v1999_v5  ;;  %2221 = vmatmul.mubr.msk.bf16.vlgmr.msra.gmra.mrb[32].mxu1 %vm203_vm2, %v2005_v60 }
  0x53   : > { %2213 = vmatpush3.bf16.msra.mxu0 %v2386_v3  ;;  %2214 = vmatprep.mubr.msk.bf16.mxu0 %vm2348_vm1, %v2347_v0 }
  0x54   : > { %2224 = vmatprep.subr.bf16.mxu0 %v2347_v0  ;;  %2231 = vmatpush3.bf16.msra.mxu1 %v2411_v6 }
  0x55   : > { %2232 = vmatprep.mubr.msk.bf16.mxu1 %vm2348_vm1, %v2347_v0  ;;  %2242 = vmatprep.subr.bf16.mxu1 %v2347_v0 }
  0x5a   : > { %2215 = vmatmul.mubr.msk.bf16.vlgmr.msra.gmra.mrb[32].mxu0 %vm203_vm2, %v1070_v11  ;;  %2233 = vmatmul.mubr.msk.bf16.vlgmr.msra.gmra.mrb[36].mxu1 %vm203_vm2, %v1216_v12 }
  0x5b   : > { %2225 = vmatpush3.bf16.msra.mxu0 %v2427_v21  ;;  %2226 = vmatprep.mubr.msk.bf16.mxu0 %vm2348_vm1, %v2347_v0 }
  0x5c   : > { %2236 = vmatprep.subr.bf16.mxu0 %v2347_v0  ;;  %2243 = vmatpush3.bf16.msra.mxu1 %v2394_v4 }
  0x5d   : > { %2244 = vmatprep.mubr.msk.bf16.mxu1 %vm2348_vm1, %v2347_v0  ;;  %2254 = vmatprep.subr.bf16.mxu1 %v2347_v0 }
  0x62   : > { %2227 = vmatmul.mubr.msk.bf16.vlgmr.msra.gmra.mrb[36].mxu0 %vm203_vm2, %v2010_v19  ;;  %2245 = vmatmul.mubr.msk.bf16.vlgmr.msra.gmra.mrb[40].mxu1 %vm203_vm2, %v2016_v13 }
  0x63   : > { %2237 = vmatpush3.bf16.msra.mxu0 %v2386_v3  ;;  %2238 = vmatprep.mubr.msk.bf16.mxu0 %vm2348_vm1, %v2347_v0 }
  0x64   : > { %2248 = vmatprep.subr.bf16.mxu0 %v2347_v0  ;;  %2255 = vmatpush3.bf16.msra.mxu1 %v2411_v6 }
  0x65   : > { %2256 = vmatprep.mubr.msk.bf16.mxu1 %vm2348_vm1, %v2347_v0  ;;  %2266 = vmatprep.subr.bf16.mxu1 %v2347_v0 }
  0x6a   : > { %2239 = vmatmul.mubr.msk.bf16.vlgmr.msra.gmra.mrb[40].mxu0 %vm203_vm2, %v1278_v25  ;;  %2257 = vmatmul.mubr.msk.bf16.vlgmr.msra.gmra.mrb[44].mxu1 %vm203_vm2, %v1424_v26 }
  0x6b   : > { %2249 = vmatpush3.bf16.msra.mxu0 %v2427_v21  ;;  %2250 = vmatprep.mubr.msk.bf16.mxu0 %vm2348_vm1, %v2347_v0 }
  0x6c   : > { %2260 = vmatprep.subr.bf16.mxu0 %v2347_v0  ;;  %2267 = vmatpush3.bf16.msra.mxu1 %v2394_v4 }
  0x6d   : > { %2268 = vmatprep.mubr.msk.bf16.mxu1 %vm2348_vm1, %v2347_v0  ;;  %2278 = vmatprep.subr.bf16.mxu1 %v2347_v0 }
  0x72   : > { %2251 = vmatmul.mubr.msk.bf16.vlgmr.msra.gmra.mrb[44].mxu0 %vm203_vm2, %v2021_v33  ;;  %2269 = vmatmul.mubr.msk.bf16.vlgmr.msra.gmra.mrb[48].mxu1 %vm203_vm2, %v2027_v27 }
  0x73   : > { %2261 = vmatpush3.bf16.msra.mxu0 %v2386_v3  ;;  %2262 = vmatprep.mubr.msk.bf16.mxu0 %vm2348_vm1, %v2347_v0 }
  0x74   : > { %2272 = vmatprep.subr.bf16.mxu0 %v2347_v0  ;;  %2279 = vmatpush3.bf16.msra.mxu1 %v2411_v6 }
  0x75   : > { %2280 = vmatprep.mubr.msk.bf16.mxu1 %vm2348_vm1, %v2347_v0  ;;  %2290 = vmatprep.subr.bf16.mxu1 %v2347_v0 }
  0x7a   : > { %2263 = vmatmul.mubr.msk.bf16.vlgmr.msra.gmra.mrb[48].mxu0 %vm203_vm2, %v1486_v38  ;;  %2281 = vmatmul.mubr.msk.bf16.vlgmr.msra.gmra.mrb[52].mxu1 %vm203_vm2, %v1632_v39 }
  0x7b   : > { %2273 = vmatpush3.bf16.msra.mxu0 %v2427_v21  ;;  %2274 = vmatprep.mubr.msk.bf16.mxu0 %vm2348_vm1, %v2347_v0 }
  0x7c   : > { %2284 = vmatprep.subr.bf16.mxu0 %v2347_v0  ;;  %2291 = vmatpush3.bf16.msra.mxu1 %v2394_v4  ;;  %v1694_v4 = vor.u32 %v1693_v48, %v1689_v47 }
  0x7d   : > { %2292 = vmatprep.mubr.msk.bf16.mxu1 %vm2348_vm1, %v2347_v0  ;;  %2302 = vmatprep.subr.bf16.mxu1 %v2347_v0 }
  0x82   : > { %2275 = vmatmul.mubr.msk.bf16.vlgmr.msra.gmra.mrb[52].mxu0 %vm203_vm2, %v2032_v46  ;;  %2293 = vmatmul.mubr.msk.bf16.vlgmr.msra.gmra.mrb[56].mxu1 %vm203_vm2, %v2038_v40 }
  0x83   : > { %2285 = vmatpush3.bf16.msra.mxu0 %v2386_v3  ;;  %2286 = vmatprep.mubr.msk.bf16.mxu0 %vm2348_vm1, %v2347_v0  ;;  %v2043_v3 = vld [vmem:[%s2408_s23 + $0x40] sm:$0xf] }
  0x84   : > { %2296 = vmatprep.subr.bf16.mxu0 %v2347_v0  ;;  %2303 = vmatpush3.bf16.msra.mxu1 %v2411_v6 }
  0x85   : > { %2304 = vmatprep.mubr.msk.bf16.mxu1 %vm2348_vm1, %v2347_v0 }
  0x8a   : > { %2287 = vmatmul.mubr.msk.bf16.vlgmr.msra.gmra.mrb[56].mxu0 %vm203_vm2, %v1694_v4  ;;  %2305 = vmatmul.mubr.msk.bf16.vlgmr.msra.gmra.mrb[60].mxu1 %vm203_vm2, %v1840_v51 }
  0x8b   : > { %2297 = vmatpush3.bf16.msra.mxu0 %v2427_v21  ;;  %2298 = vmatprep.mubr.msk.bf16.mxu0 %vm2348_vm1, %v2347_v0 }
  0x92   : > { %2299 = vmatmul.mubr.msk.bf16.vlgmr.msra.gmra.mrb[60].mxu0 %vm203_vm2, %v2043_v3 }
  0xe5   : > { %v296_v52 = vpop.f32.mrb[0].mxu1 }
  0xe6   : > { %v2126_v53 = vpop.f32.mrb[1].mxu1 }
  0xe7   : > { %v299_v6 = vpop.f32.mrb[2].mxu1 }
  0xe8   : > { %v2127_v54 = vpop.f32.mrb[3].mxu1 }
  0xed   : > { %v245_v55 = vpop.f32.mrb[0].mxu0  ;;  %v415_v56 = vpop.f32.mrb[4].mxu1 }
  0xee   : > { %v297_v57 = vadd.f32 %v296_v52, %v245_v55  ;;  %v2120_v58 = vpop.f32.mrb[1].mxu0  ;;  %v2138_v59 = vpop.f32.mrb[5].mxu1 }
  0xef   : > { %v248_v60 = vpop.f32.mrb[2].mxu0  ;;  %v418_v61 = vpop.f32.mrb[6].mxu1 }
  0xf0   : > { %v2121_v62 = vpop.f32.mrb[3].mxu0  ;;  %v2139_v21 = vpop.f32.mrb[7].mxu1 }
  0xf5   : > { %v349_v63 = vpop.f32.mrb[4].mxu0  ;;  %v527_v1 = vpop.f32.mrb[8].mxu1 }
  0xf6   : > { %v355_v0 = vadd.f32 %v349_v63, %v297_v57  ;;  %v2132_v2 = vpop.f32.mrb[5].mxu0  ;;  %v2150_v5 = vpop.f32.mrb[9].mxu1 }
  0xf7   : > { %v352_v8 = vpop.f32.mrb[6].mxu0  ;;  %v530_v9 = vpop.f32.mrb[10].mxu1 }
  0xf8   : > { %v421_v10 = vadd.f32 %v415_v56, %v355_v0  ;;  %v2133_v11 = vpop.f32.mrb[7].mxu0  ;;  %v2151_v12 = vpop.f32.mrb[11].mxu1 }
  0xfa   : > { %v428_v13 = vadd.f32 %v2604_v7, %v421_v10 }
  0xfc   : > { %v429_v14 = vmax.f32 %v428_v13, 0.0 }
  0xfd   : > { %v484_v15 = vpop.f32.mrb[8].mxu0  ;;  %v630_v16 = vpop.f32.mrb[12].mxu1 }
  0xfe   : > { %v430_v17 = vpack.c.bf16 %v429_v14, %v429_v14  ;;  %v528_v18 = vadd.f32 %v527_v1, %v484_v15  ;;  %v2144_v19 = vpop.f32.mrb[9].mxu0  ;;  %v2162_v20 = vpop.f32.mrb[13].mxu1 }
  0xff   : > { %v487_v22 = vpop.f32.mrb[10].mxu0  ;;  %v633_v23 = vpop.f32.mrb[14].mxu1 }
 0x100   : > { %432 = vst.msk [vmem:[%s2611_s4] sm:$0xf] %vm431_vm3, %v430_v17  ;;  %v2145_v24 = vpop.f32.mrb[11].mxu0  ;;  %v2163_v25 = vpop.f32.mrb[15].mxu1 }
 0x105   : > { %v572_v26 = vpop.f32.mrb[12].mxu0  ;;  %v735_v27 = vpop.f32.mrb[16].mxu1 }
 0x106   : > { %v578_v28 = vadd.f32 %v572_v26, %v528_v18  ;;  %v2156_v29 = vpop.f32.mrb[13].mxu0  ;;  %v2174_v30 = vpop.f32.mrb[17].mxu1 }
 0x107   : > { %v575_v31 = vpop.f32.mrb[14].mxu0  ;;  %v738_v32 = vpop.f32.mrb[18].mxu1 }
 0x108   : > { %v636_v33 = vadd.f32 %v630_v16, %v578_v28  ;;  %v2157_v34 = vpop.f32.mrb[15].mxu0  ;;  %v2175_v35 = vpop.f32.mrb[19].mxu1 }
 0x10a   : > { %v637_v36 = vadd.f32 %v2604_v7, %v636_v33 }
 0x10c   : > { %v638_v37 = vmax.f32 %v637_v36, 0.0 }
 0x10d   : > { %v692_v38 = vpop.f32.mrb[16].mxu0  ;;  %v838_v39 = vpop.f32.mrb[20].mxu1 }
 0x10e   : > { %v639_v40 = vpack.c.bf16 %v638_v37, %v638_v37  ;;  %v736_v41 = vadd.f32 %v735_v27, %v692_v38  ;;  %v2168_v42 = vpop.f32.mrb[17].mxu0  ;;  %v2186_v43 = vpop.f32.mrb[21].mxu1 }
 0x10f   : > { %v695_v44 = vpop.f32.mrb[18].mxu0  ;;  %v841_v45 = vpop.f32.mrb[22].mxu1 }
 0x110   : > { %640 = vst.msk [vmem:[%s2611_s4 + $0x4] sm:$0xf] %vm431_vm3, %v639_v40  ;;  %v2169_v46 = vpop.f32.mrb[19].mxu0  ;;  %v2187_v47 = vpop.f32.mrb[23].mxu1 }
 0x115   : > { %v780_v48 = vpop.f32.mrb[20].mxu0  ;;  %v943_v49 = vpop.f32.mrb[24].mxu1 }
 0x116   : > { %v786_v50 = vadd.f32 %v780_v48, %v736_v41  ;;  %v2180_v4 = vpop.f32.mrb[21].mxu0  ;;  %v2198_v51 = vpop.f32.mrb[25].mxu1 }
 0x117   : > { %v783_v3 = vpop.f32.mrb[22].mxu0  ;;  %v946_v52 = vpop.f32.mrb[26].mxu1 }
 0x118   : > { %v844_v53 = vadd.f32 %v838_v39, %v786_v50  ;;  %v2181_v6 = vpop.f32.mrb[23].mxu0  ;;  %v2199_v54 = vpop.f32.mrb[27].mxu1 }
 0x11a   : > { %v845_v55 = vadd.f32 %v2604_v7, %v844_v53 }
 0x11c   : > { %v846_v56 = vmax.f32 %v845_v55, 0.0 }
 0x11d   : > { %v900_v57 = vpop.f32.mrb[24].mxu0  ;;  %v1046_v58 = vpop.f32.mrb[28].mxu1 }
 0x11e   : > { %v847_v59 = vpack.c.bf16 %v846_v56, %v846_v56  ;;  %v944_v60 = vadd.f32 %v943_v49, %v900_v57  ;;  %v2192_v61 = vpop.f32.mrb[25].mxu0  ;;  %v2210_v62 = vpop.f32.mrb[29].mxu1 }
 0x11f   : > { %v903_v21 = vpop.f32.mrb[26].mxu0  ;;  %v1049_v63 = vpop.f32.mrb[30].mxu1 }
 0x120   : > { %848 = vst.msk [vmem:[%s2611_s4 + $0x8] sm:$0xf] %vm431_vm3, %v847_v59  ;;  %v2193_v1 = vpop.f32.mrb[27].mxu0  ;;  %v2211_v0 = vpop.f32.mrb[31].mxu1 }
 0x125   : > { %v988_v2 = vpop.f32.mrb[28].mxu0  ;;  %v1151_v5 = vpop.f32.mrb[32].mxu1 }
 0x126   : > { %v994_v8 = vadd.f32 %v988_v2, %v944_v60  ;;  %v2204_v9 = vpop.f32.mrb[29].mxu0  ;;  %v2222_v10 = vpop.f32.mrb[33].mxu1 }
 0x127   : > { %v991_v11 = vpop.f32.mrb[30].mxu0  ;;  %v1154_v12 = vpop.f32.mrb[34].mxu1 }
 0x128   : > { %v1052_v13 = vadd.f32 %v1046_v58, %v994_v8  ;;  %v2205_v14 = vpop.f32.mrb[31].mxu0  ;;  %v2223_v15 = vpop.f32.mrb[35].mxu1 }
 0x12a   : > { %v1053_v16 = vadd.f32 %v2604_v7, %v1052_v13 }
 0x12c   : > { %v1054_v17 = vmax.f32 %v1053_v16, 0.0 }
 0x12d   : > { %v1108_v18 = vpop.f32.mrb[32].mxu0  ;;  %v1254_v19 = vpop.f32.mrb[36].mxu1 }
 0x12e   : > { %v1055_v20 = vpack.c.bf16 %v1054_v17, %v1054_v17  ;;  %v1152_v22 = vadd.f32 %v1151_v5, %v1108_v18  ;;  %v2216_v23 = vpop.f32.mrb[33].mxu0  ;;  %v2234_v24 = vpop.f32.mrb[37].mxu1 }
 0x12f   : > { %v1111_v25 = vpop.f32.mrb[34].mxu0  ;;  %v1257_v26 = vpop.f32.mrb[38].mxu1 }
 0x130   : > { %1056 = vst.msk [vmem:[%s2611_s4 + $0xc] sm:$0xf] %vm431_vm3, %v1055_v20  ;;  %v2217_v27 = vpop.f32.mrb[35].mxu0  ;;  %v2235_v28 = vpop.f32.mrb[39].mxu1 }
 0x135   : > { %v1196_v29 = vpop.f32.mrb[36].mxu0  ;;  %v1359_v30 = vpop.f32.mrb[40].mxu1 }
 0x136   : > { %v1202_v31 = vadd.f32 %v1196_v29, %v1152_v22  ;;  %v2228_v32 = vpop.f32.mrb[37].mxu0  ;;  %v2246_v33 = vpop.f32.mrb[41].mxu1 }
 0x137   : > { %v1199_v34 = vpop.f32.mrb[38].mxu0  ;;  %v1362_v35 = vpop.f32.mrb[42].mxu1 }
 0x138   : > { %v1260_v36 = vadd.f32 %v1254_v19, %v1202_v31  ;;  %v2229_v37 = vpop.f32.mrb[39].mxu0  ;;  %v2247_v38 = vpop.f32.mrb[43].mxu1 }
 0x13a   : > { %v1261_v39 = vadd.f32 %v2604_v7, %v1260_v36 }
 0x13c   : > { %v1262_v40 = vmax.f32 %v1261_v39, 0.0 }
 0x13d   : > { %v1316_v41 = vpop.f32.mrb[40].mxu0  ;;  %v1462_v42 = vpop.f32.mrb[44].mxu1 }
 0x13e   : > { %v1263_v43 = vpack.c.bf16 %v1262_v40, %v1262_v40  ;;  %v1360_v44 = vadd.f32 %v1359_v30, %v1316_v41  ;;  %v2240_v45 = vpop.f32.mrb[41].mxu0  ;;  %v2258_v46 = vpop.f32.mrb[45].mxu1 }
 0x13f   : > { %v1319_v47 = vpop.f32.mrb[42].mxu0  ;;  %v1465_v48 = vpop.f32.mrb[46].mxu1 }
 0x140   : > { %1264 = vst.msk [vmem:[%s2611_s4 + $0x10] sm:$0xf] %vm431_vm3, %v1263_v43  ;;  %v2241_v49 = vpop.f32.mrb[43].mxu0  ;;  %v2259_v50 = vpop.f32.mrb[47].mxu1 }
 0x145   : > { %v1404_v4 = vpop.f32.mrb[44].mxu0  ;;  %v1567_v51 = vpop.f32.mrb[48].mxu1 }
 0x146   : > { %v1410_v3 = vadd.f32 %v1404_v4, %v1360_v44  ;;  %v2252_v52 = vpop.f32.mrb[45].mxu0  ;;  %v2270_v53 = vpop.f32.mrb[49].mxu1 }
 0x147   : > { %v1407_v6 = vpop.f32.mrb[46].mxu0  ;;  %v1570_v54 = vpop.f32.mrb[50].mxu1 }
 0x148   : > { %v1468_v55 = vadd.f32 %v1462_v42, %v1410_v3  ;;  %v2253_v56 = vpop.f32.mrb[47].mxu0  ;;  %v2271_v57 = vpop.f32.mrb[51].mxu1 }
 0x14a   : > { %v1469_v58 = vadd.f32 %v2604_v7, %v1468_v55 }
 0x14c   : > { %v1470_v59 = vmax.f32 %v1469_v58, 0.0 }
 0x14d   : > { %v1524_v60 = vpop.f32.mrb[48].mxu0  ;;  %v1670_v61 = vpop.f32.mrb[52].mxu1 }
 0x14e   : > { %v1471_v62 = vpack.c.bf16 %v1470_v59, %v1470_v59  ;;  %v1568_v21 = vadd.f32 %v1567_v51, %v1524_v60  ;;  %v2264_v63 = vpop.f32.mrb[49].mxu0  ;;  %v2282_v1 = vpop.f32.mrb[53].mxu1 }
 0x14f   : > { %v1527_v0 = vpop.f32.mrb[50].mxu0  ;;  %v1673_v2 = vpop.f32.mrb[54].mxu1 }
 0x150   : > { %1472 = vst.msk [vmem:[%s2611_s4 + $0x14] sm:$0xf] %vm431_vm3, %v1471_v62  ;;  %v2265_v5 = vpop.f32.mrb[51].mxu0  ;;  %v2283_v8 = vpop.f32.mrb[55].mxu1 }
 0x155   : > { %v1612_v9 = vpop.f32.mrb[52].mxu0  ;;  %v1775_v10 = vpop.f32.mrb[56].mxu1 }
 0x156   : > { %v1618_v11 = vadd.f32 %v1612_v9, %v1568_v21  ;;  %v2276_v12 = vpop.f32.mrb[53].mxu0  ;;  %v2294_v13 = vpop.f32.mrb[57].mxu1 }
 0x157   : > { %v1615_v14 = vpop.f32.mrb[54].mxu0  ;;  %v1778_v15 = vpop.f32.mrb[58].mxu1 }
 0x158   : > { %v1676_v16 = vadd.f32 %v1670_v61, %v1618_v11  ;;  %v2277_v17 = vpop.f32.mrb[55].mxu0  ;;  %v2295_v18 = vpop.f32.mrb[59].mxu1 }
 0x15a   : > { %v1677_v19 = vadd.f32 %v2604_v7, %v1676_v16 }
 0x15c   : > { %v1678_v20 = vmax.f32 %v1677_v19, 0.0 }
 0x15d   : > { %v1732_v22 = vpop.f32.mrb[56].mxu0  ;;  %v1878_v23 = vpop.f32.mrb[60].mxu1 }
 0x15e   : > { %v1679_v24 = vpack.c.bf16 %v1678_v20, %v1678_v20  ;;  %v1776_v25 = vadd.f32 %v1775_v10, %v1732_v22  ;;  %v2288_v26 = vpop.f32.mrb[57].mxu0  ;;  %v2306_v27 = vpop.f32.mrb[61].mxu1 }
 0x15f   : > { %v1735_v28 = vpop.f32.mrb[58].mxu0  ;;  %v1881_v29 = vpop.f32.mrb[62].mxu1 }
 0x160   : > { %1680 = vst.msk [vmem:[%s2611_s4 + $0x18] sm:$0xf] %vm431_vm3, %v1679_v24  ;;  %v2289_v30 = vpop.f32.mrb[59].mxu0  ;;  %v2307_v31 = vpop.f32.mrb[63].mxu1 }
 0x165   : > { %v1820_v32 = vpop.f32.mrb[60].mxu0 }
 0x166   : > { %v1826_v33 = vadd.f32 %v1820_v32, %v1776_v25  ;;  %v2300_v34 = vpop.f32.mrb[61].mxu0 }
 0x167   : > { %v1823_v35 = vpop.f32.mrb[62].mxu0 }
 0x168   : > { %v1884_v36 = vadd.f32 %v1878_v23, %v1826_v33  ;;  %v2301_v37 = vpop.f32.mrb[63].mxu0 }
 0x16a   : > { %v1885_v38 = vadd.f32 %v2604_v7, %v1884_v36 }
 0x16c   : > { %v1886_v39 = vmax.f32 %v1885_v38, 0.0 }
 0x16e   : > { %v1887_v40 = vpack.c.bf16 %v1886_v39, %v1886_v39 }
 0x170   : > { %1888 = vst.msk [vmem:[%s2611_s4 + $0x1c] sm:$0xf] %vm431_vm3, %v1887_v40 }
 0x171 PF: > { %s13_s12 = sadd.s32 1, %s2345_s12  }
 0x172   : > { %p10_p4 = scmp.ge.s32.totalorder %s13_s12, 4  }
 0x174   :  { %12 = sbr.rel (!%p10_p4) target bundleno = 1 (0x1), region = 73 }

// kernel: encoder_simple.6
= control target key start
LH: loop header
LB: loop body
LE: loop exit
PB: predicated region body
PF: predicated region fallthrough
CT: control target
= control target key end

     0   :  { %s1314_s12 = smov 0   ;;  %s1655_s0 = inlined_call_operand.vmem [shape: bf16[2,3,3,128], index: 0, kind: input, shape index: {}]   ;;  %s1656_s1 = inlined_call_operand.vmem [shape: bf16[4,128,64], index: 1, kind: input, shape index: {}]   ;;  %s1657_s2 = inlined_call_operand.vmem [shape: f32[1,64], index: 2, kind: input, shape index: {}]   ;;  %s1658_s3 = inlined_call_operand.vmem [shape: bf16[2,4,64], index: 3, kind: output, shape index: {}]  }
   0x1 LB: > { %s907_s13 = sadd.s32 4294967295, %s1289_s12   ;;  %p911_p0 = scmp.ge.s32.totalorder %s1289_s12, 1  ;;  %s1289_s12 = sphi %s1314_s12, %s13_s12  }
   0x2   : > { %p137_p1 = scmp.lt.s32.totalorder %s1289_s12, 3 }
   0x4   : > { %p138_p2 = pnand %p911_p0, %p137_p1 }
   0x5   : > { %v1325_v0 = vld [vmem:[%s1656_s1 + $0x40] sm:$0xff] (!%p138_p2)   ;;  %v1291_v1 = vmov (!%p138_p2), 0.0   ;;  %v1338_v3 = vld [vmem:[%s1656_s1 + $0x48] sm:$0xff] (!%p138_p2)   ;;  %vm1292_vm0 = vmmov (!%p138_p2), 0   ;;  %p160_p3 = scmp.lt.s32.totalorder (!%p138_p2), %s907_s13, 1  ;;  %v1358_v5 = vld [vmem:[%s1656_s1 + $0x50] sm:$0xff] (!%p138_p2)  }
   0x6   : > { %141 = sbr.rel (%p138_p2) target bundleno = 361 (0x169), region = 32  ;;  %1079 = vmatprep.subr.bf16.mxu0 (!%p138_p2), %v1291_v1  ;;  %1099 = vmatprep.subr.bf16.mxu1 (!%p138_p2), %v1291_v1  ;;  %v1332_v2 = vld [vmem:[%s1656_s1] sm:$0xff] (!%p138_p2)   ;;  %v1347_v4 = vld [vmem:[%s1656_s1 + $0x8] sm:$0xff] (!%p138_p2)   ;;  %v1365_v6 = vld [vmem:[%s1656_s1 + $0x10] sm:$0xff] (!%p138_p2)   ;;  %vm638_vm1 = vcmask (!%p138_p2), 516096   ;;  %vm852_vm2 = vcmask (!%p138_p2), 517121  }
   0x7   : > { %1080 = vmatpush3.bf16.msra.mxu0 (!%p138_p2), %v1325_v0  ;;  %1095 = vmatprep.mubr.msk.bf16.mxu0 (!%p138_p2), %vm1292_vm0, %v1291_v1  ;;  %v1373_v7 = vld [vmem:[%s1656_s1 + $0x58] sm:$0xff] (!%p138_p2)   ;;  %v1392_v9 = vld [vmem:[%s1656_s1 + $0x60] sm:$0xff] (!%p138_p2)   ;;  %v1407_v12 = vld [vmem:[%s1656_s1 + $0x68] sm:$0xff] (!%p138_p2)  }
   0x8   : > { %1100 = vmatpush3.bf16.msra.mxu1 (!%p138_p2), %v1332_v2  ;;  %1081 = vmatprep.subr.bf16.mxu0 (!%p138_p2), %v1291_v1  ;;  %v1380_v8 = vld [vmem:[%s1656_s1 + $0x18] sm:$0xff] (!%p138_p2)   ;;  %v1399_v10 = vld [vmem:[%s1656_s1 + $0x20] sm:$0xff] (!%p138_p2)   ;;  %v1414_v13 = vld [vmem:[%s1656_s1 + $0x28] sm:$0xff] (!%p138_p2)  }
   0x9   : > { %1101 = vmatprep.subr.bf16.mxu1 (!%p138_p2), %v1291_v1  ;;  %1115 = vmatprep.mubr.msk.bf16.mxu1 (!%p138_p2), %vm1292_vm0, %v1291_v1  ;;  %v1421_v15 = vld [vmem:[%s1656_s1 + $0x70] sm:$0xff] (!%p138_p2)   ;;  %v1435_v19 = vld [vmem:[%s1656_s1 + $0x78] sm:$0xff] (!%p138_p2)   ;;  %v1450_v23 = vld [vmem:[%s1656_s1 + $0x80] sm:$0xff] (!%p138_p2)  }
   0xa   : > { %v1428_v16 = vld [vmem:[%s1656_s1 + $0x30] sm:$0xff] (!%p138_p2)   ;;  %v1442_v20 = vld [vmem:[%s1656_s1 + $0x38] sm:$0xff] (!%p138_p2)   ;;  %v1457_v24 = vld [vmem:[%s1656_s1 + $0xc0] sm:$0xff] (!%p138_p2)  }
   0xb   : > { %1082 = vmatpush3.bf16.msra.mxu0 (!%p138_p2), %v1338_v3  ;;  %v1464_v25 = vld [vmem:[%s1656_s1 + $0x88] sm:$0xff] (!%p138_p2)   ;;  %v1482_v27 = vld [vmem:[%s1656_s1 + $0x90] sm:$0xff] (!%p138_p2)   ;;  %v1496_v29 = vld [vmem:[%s1656_s1 + $0x98] sm:$0xff] (!%p138_p2)  }
   0xc   : > { %1102 = vmatpush3.bf16.msra.mxu1 (!%p138_p2), %v1347_v4  ;;  %1083 = vmatprep.subr.bf16.mxu0 (!%p138_p2), %v1291_v1  ;;  %v1471_v26 = vld [vmem:[%s1656_s1 + $0xc8] sm:$0xff] (!%p138_p2)   ;;  %v1489_v28 = vld [vmem:[%s1656_s1 + $0xd0] sm:$0xff] (!%p138_p2)   ;;  %v1503_v30 = vld [vmem:[%s1656_s1 + $0xd8] sm:$0xff] (!%p138_p2)  }
   0xd   : > { %s1660_s13 = smov (!%p160_p3, %s907_s13), 1  ;;  %1103 = vmatprep.subr.bf16.mxu1 %v1291_v1  ;;  %v1510_v31 = vld [vmem:[%s1656_s1 + $0xa0] sm:$0xff]   ;;  %v1524_v33 = vld [vmem:[%s1656_s1 + $0xa8] sm:$0xff]   ;;  %v1539_v36 = vld [vmem:[%s1656_s1 + $0xb0] sm:$0xff]  }
   0xe   : > { %s1239_s26 = smul.u32 6, %s1660_s13  ;;  %v1517_v32 = vld [vmem:[%s1656_s1 + $0xe0] sm:$0xff]   ;;  %v1531_v34 = vld [vmem:[%s1656_s1 + $0xe8] sm:$0xff]   ;;  %v1546_v38 = vld [vmem:[%s1656_s1 + $0xf0] sm:$0xff]   ;;  %s913_s8 = sshll.u32 %s1660_s13, 1 }
   0xf   : > { %1084 = vmatpush3.bf16.msra.mxu0 %v1358_v5  ;;  %v1553_v39 = vld [vmem:[%s1656_s1 + $0xb8] sm:$0xff]   ;;  %s1648_s11 = scalar_lea.vmem %s1658_s3, %s913_s8 }
  0x10   : > { %1104 = vmatpush3.bf16.msra.mxu1 %v1365_v6  ;;  %1085 = vmatprep.subr.bf16.mxu0 %v1291_v1  ;;  %s1386_s6 = scalar_lea.vmem %s1655_s0, %s1239_s26  ;;  %v1560_v42 = vld [vmem:[%s1656_s1 + $0xf8] sm:$0xff]  }
  0x11   : > { %1105 = vmatprep.subr.bf16.mxu1 %v1291_v1  ;;  %v962_v11 = vld.sshfl [vmem:[%s1386_s6] sm:$0x3 pattern:$0x76325410]  ;;  %v979_v43 = vld [vmem:[%s1386_s6 + $0x2] sm:$0x1] }
  0x12   : > { %v251_v14 = vshll.u32 %v962_v11, 16  ;;  %v249_v17 = vshrl.u32 %v962_v11, 16  ;;  %v238_v22 = vld [vmem:[%s1386_s6] sm:$0x1]  ;;  %v999_v45 = vld [vmem:[%s1386_s6 + $0x2] sm:$0x1] }
  0x13   : > { %1086 = vmatpush3.bf16.msra.mxu0 %v1373_v7  ;;  %v989_v35 = vld.sshfl [vmem:[%s1386_s6 + $0x2] sm:$0x3 pattern:$0x76325410]  ;;  %v1002_v50 = vld [vmem:[%s1386_s6 + $0x4] sm:$0x1] }
  0x14   : > { %1106 = vmatpush3.bf16.msra.mxu1 %v1380_v8  ;;  %1087 = vmatprep.subr.bf16.mxu0 %v1291_v1  ;;  %v253_v18 = vrot.slane %v251_v14, 1  ;;  %v535_v37 = vshll.u32 %v989_v35, 16  ;;  %v533_v40 = vshrl.u32 %v989_v35, 16 }
  0x15   : > { %1107 = vmatprep.subr.bf16.mxu1 %v1291_v1  ;;  %v1004_v46 = vld.sshfl [vmem:[%s1386_s6 + $0x4] sm:$0x3 pattern:$0x76325410] }
  0x16   : > { %v254_v21 = vor.u32 %v253_v18, %v249_v17  ;;  %v537_v41 = vrot.slane %v535_v37, 1  ;;  %v793_v47 = vshll.u32 %v1004_v46, 16  ;;  %v791_v48 = vshrl.u32 %v1004_v46, 16 }
  0x17   : > { %1088 = vmatpush3.bf16.msra.mxu0 %v1392_v9 }
  0x18   : > { %1108 = vmatpush3.bf16.msra.mxu1 %v1399_v10  ;;  %1089 = vmatprep.subr.bf16.mxu0 %v1291_v1  ;;  %v538_v44 = vor.u32 %v537_v41, %v533_v40  ;;  %v795_v49 = vrot.slane %v793_v47, 1 }
  0x19   : > { %1109 = vmatprep.subr.bf16.mxu1 %v1291_v1 }
  0x1a   : > { %v796_v51 = vor.u32 %v795_v49, %v791_v48 }
  0x1b   : > { %1090 = vmatpush3.bf16.msra.mxu0 %v1407_v12 }
  0x1c   : > { %1110 = vmatpush3.bf16.msra.mxu1 %v1414_v13  ;;  %1091 = vmatprep.subr.bf16.mxu0 %v1291_v1 }
  0x1d   : > { %1111 = vmatprep.subr.bf16.mxu1 %v1291_v1 }
  0x1f   : > { %1092 = vmatpush3.bf16.msra.mxu0 %v1421_v15 }
  0x20   : > { %1112 = vmatpush3.bf16.msra.mxu1 %v1428_v16  ;;  %1093 = vmatprep.subr.bf16.mxu0 %v1291_v1 }
  0x21   : > { %1113 = vmatprep.subr.bf16.mxu1 %v1291_v1 }
  0x23   : > { %1094 = vmatpush3.bf16.msra.mxu0 %v1435_v19 }
  0x24   : > { %1114 = vmatpush3.bf16.msra.mxu1 %v1442_v20  ;;  %1119 = vmatprep.subr.bf16.mxu0 %v1291_v1 }
  0x25   : > { %1139 = vmatprep.subr.bf16.mxu1 %v1291_v1 }
  0x26   : > { %1096 = vmatmul.mubr.bf16.vlgmr.msra.gmra.mrb[0].mxu0 %v254_v21 }
  0x27   : > { %1116 = vmatmul.mubr.bf16.vlgmr.msra.gmra.mrb[0].mxu1 %v238_v22  ;;  %1120 = vmatpush3.bf16.msra.mxu0 %v1450_v23  ;;  %v846_v22 = vlaneseq }
  0x28   : > { %1140 = vmatpush3.bf16.msra.mxu1 %v1457_v24  ;;  %1121 = vmatprep.subr.bf16.mxu0 %v1291_v1 }
  0x29   : > { %1141 = vmatprep.subr.bf16.mxu1 %v1291_v1  ;;  %1135 = vmatprep.mubr.msk.bf16.mxu0 %vm1292_vm0, %v1291_v1 }
  0x2a   : > { %1155 = vmatprep.mubr.msk.bf16.mxu1 %vm1292_vm0, %v1291_v1 }
  0x2b   : > { %1122 = vmatpush3.bf16.msra.mxu0 %v1464_v25 }
  0x2c   : > { %1142 = vmatpush3.bf16.msra.mxu1 %v1471_v26  ;;  %1123 = vmatprep.subr.bf16.mxu0 %v1291_v1 }
  0x2d   : > { %1143 = vmatprep.subr.bf16.mxu1 %v1291_v1 }
  0x2f   : > { %1124 = vmatpush3.bf16.msra.mxu0 %v1482_v27 }
  0x30   : > { %1144 = vmatpush3.bf16.msra.mxu1 %v1489_v28  ;;  %1125 = vmatprep.subr.bf16.mxu0 %v1291_v1 }
  0x31   : > { %1145 = vmatprep.subr.bf16.mxu1 %v1291_v1 }
  0x33   : > { %1126 = vmatpush3.bf16.msra.mxu0 %v1496_v29 }
  0x34   : > { %1146 = vmatpush3.bf16.msra.mxu1 %v1503_v30  ;;  %1127 = vmatprep.subr.bf16.mxu0 %v1291_v1 }
  0x35   : > { %1147 = vmatprep.subr.bf16.mxu1 %v1291_v1 }
  0x37   : > { %1128 = vmatpush3.bf16.msra.mxu0 %v1510_v31 }
  0x38   : > { %1148 = vmatpush3.bf16.msra.mxu1 %v1517_v32  ;;  %1129 = vmatprep.subr.bf16.mxu0 %v1291_v1 }
  0x39   : > { %1149 = vmatprep.subr.bf16.mxu1 %v1291_v1 }
  0x3b   : > { %1130 = vmatpush3.bf16.msra.mxu0 %v1524_v33 }
  0x3c   : > { %1150 = vmatpush3.bf16.msra.mxu1 %v1531_v34  ;;  %1131 = vmatprep.subr.bf16.mxu0 %v1291_v1 }
  0x3d   : > { %1151 = vmatprep.subr.bf16.mxu1 %v1291_v1 }
  0x3f   : > { %1132 = vmatpush3.bf16.msra.mxu0 %v1539_v36 }
  0x40   : > { %1152 = vmatpush3.bf16.msra.mxu1 %v1546_v38  ;;  %1133 = vmatprep.subr.bf16.mxu0 %v1291_v1 }
  0x41   : > { %1153 = vmatprep.subr.bf16.mxu1 %v1291_v1 }
  0x43   : > { %1134 = vmatpush3.bf16.msra.mxu0 %v1553_v39 }
  0x44   : > { %1154 = vmatpush3.bf16.msra.mxu1 %v1560_v42  ;;  %1159 = vmatprep.subr.bf16.mxu0 %v1291_v1 }
  0x45   : > { %1179 = vmatprep.subr.bf16.mxu1 %v1291_v1 }
  0x46   : > { %1136 = vmatmul.mubr.bf16.vlgmr.msra.gmra.mrb[4].mxu0 %v979_v43 }
  0x47   : > { %1156 = vmatmul.mubr.bf16.vlgmr.msra.gmra.mrb[4].mxu1 %v538_v44  ;;  %1160 = vmatpush3.bf16.msra.mxu0 %v1325_v0 }
  0x48   : > { %1180 = vmatpush3.bf16.msra.mxu1 %v1332_v2  ;;  %1161 = vmatprep.subr.bf16.mxu0 %v1291_v1 }
  0x49   : > { %1181 = vmatprep.subr.bf16.mxu1 %v1291_v1  ;;  %1175 = vmatprep.mubr.msk.bf16.mxu0 %vm1292_vm0, %v1291_v1 }
  0x4a   : > { %1195 = vmatprep.mubr.msk.bf16.mxu1 %vm1292_vm0, %v1291_v1 }
  0x4b   : > { %1162 = vmatpush3.bf16.msra.mxu0 %v1338_v3 }
  0x4c   : > { %1182 = vmatpush3.bf16.msra.mxu1 %v1347_v4  ;;  %1163 = vmatprep.subr.bf16.mxu0 %v1291_v1 }
  0x4d   : > { %1183 = vmatprep.subr.bf16.mxu1 %v1291_v1 }
  0x4f   : > { %1164 = vmatpush3.bf16.msra.mxu0 %v1358_v5 }
  0x50   : > { %1184 = vmatpush3.bf16.msra.mxu1 %v1365_v6  ;;  %1165 = vmatprep.subr.bf16.mxu0 %v1291_v1 }
  0x51   : > { %1185 = vmatprep.subr.bf16.mxu1 %v1291_v1 }
  0x53   : > { %1166 = vmatpush3.bf16.msra.mxu0 %v1373_v7 }
  0x54   : > { %1186 = vmatpush3.bf16.msra.mxu1 %v1380_v8  ;;  %1167 = vmatprep.subr.bf16.mxu0 %v1291_v1 }
  0x55   : > { %1187 = vmatprep.subr.bf16.mxu1 %v1291_v1 }
  0x57   : > { %1168 = vmatpush3.bf16.msra.mxu0 %v1392_v9 }
  0x58   : > { %1188 = vmatpush3.bf16.msra.mxu1 %v1399_v10  ;;  %1169 = vmatprep.subr.bf16.mxu0 %v1291_v1 }
  0x59   : > { %1189 = vmatprep.subr.bf16.mxu1 %v1291_v1 }
  0x5b   : > { %1170 = vmatpush3.bf16.msra.mxu0 %v1407_v12 }
  0x5c   : > { %1190 = vmatpush3.bf16.msra.mxu1 %v1414_v13  ;;  %1171 = vmatprep.subr.bf16.mxu0 %v1291_v1 }
  0x5d   : > { %1191 = vmatprep.subr.bf16.mxu1 %v1291_v1 }
  0x5f   : > { %1172 = vmatpush3.bf16.msra.mxu0 %v1421_v15 }
  0x60   : > { %1192 = vmatpush3.bf16.msra.mxu1 %v1428_v16  ;;  %1173 = vmatprep.subr.bf16.mxu0 %v1291_v1 }
  0x61   : > { %1193 = vmatprep.subr.bf16.mxu1 %v1291_v1 }
  0x63   : > { %1174 = vmatpush3.bf16.msra.mxu0 %v1435_v19 }
  0x64   : > { %1194 = vmatpush3.bf16.msra.mxu1 %v1442_v20  ;;  %1199 = vmatprep.subr.bf16.mxu0 %v1291_v1  ;;  %v1293_v20 = vmov 1983009808  }
  0x65   : > { %1219 = vmatprep.subr.bf16.mxu1 %v1291_v1  ;;  %v844_v21 = vunpack.c.l.s4 %v1293_v20 }
  0x66   : > { %1176 = vmatmul.mubr.bf16.vlgmr.msra.gmra.mrb[8].mxu0 %v538_v44 }
  0x67   : > { %1196 = vmatmul.mubr.bf16.vlgmr.msra.gmra.mrb[8].mxu1 %v999_v45  ;;  %1200 = vmatpush3.bf16.msra.mxu0 %v1450_v23 }
  0x68   : > { %1220 = vmatpush3.bf16.msra.mxu1 %v1457_v24  ;;  %1201 = vmatprep.subr.bf16.mxu0 %v1291_v1 }
  0x69   : > { %1221 = vmatprep.subr.bf16.mxu1 %v1291_v1  ;;  %1215 = vmatprep.mubr.msk.bf16.mxu0 %vm1292_vm0, %v1291_v1 }
  0x6a   : > { %1235 = vmatprep.mubr.msk.bf16.mxu1 %vm1292_vm0, %v1291_v1 }
  0x6b   : > { %1202 = vmatpush3.bf16.msra.mxu0 %v1464_v25 }
  0x6c   : > { %1222 = vmatpush3.bf16.msra.mxu1 %v1471_v26  ;;  %1203 = vmatprep.subr.bf16.mxu0 %v1291_v1 }
  0x6d   : > { %1223 = vmatprep.subr.bf16.mxu1 %v1291_v1 }
  0x6f   : > { %1204 = vmatpush3.bf16.msra.mxu0 %v1482_v27 }
  0x70   : > { %1224 = vmatpush3.bf16.msra.mxu1 %v1489_v28  ;;  %1205 = vmatprep.subr.bf16.mxu0 %v1291_v1 }
  0x71   : > { %1225 = vmatprep.subr.bf16.mxu1 %v1291_v1 }
  0x73   : > { %1206 = vmatpush3.bf16.msra.mxu0 %v1496_v29 }
  0x74   : > { %1226 = vmatpush3.bf16.msra.mxu1 %v1503_v30  ;;  %1207 = vmatprep.subr.bf16.mxu0 %v1291_v1  ;;  %v845_v30 = vunpack.c.0.s8 %v844_v21 }
  0x75   : > { %1227 = vmatprep.subr.bf16.mxu1 %v1291_v1 }
  0x77   : > { %1208 = vmatpush3.bf16.msra.mxu0 %v1510_v31  ;;  %v847_v31 = vshrl.u32 %v846_v22, 7 }
  0x78   : > { %1228 = vmatpush3.bf16.msra.mxu1 %v1517_v32  ;;  %1209 = vmatprep.subr.bf16.mxu0 %v1291_v1 }
  0x79   : > { %1229 = vmatprep.subr.bf16.mxu1 %v1291_v1  ;;  %v848_v37 = vsub.s32 %v845_v30, %v847_v31 }
  0x7b   : > { %1210 = vmatpush3.bf16.msra.mxu0 %v1524_v33 }
  0x7c   : > { %1230 = vmatpush3.bf16.msra.mxu1 %v1531_v34  ;;  %1211 = vmatprep.subr.bf16.mxu0 %v1291_v1 }
  0x7d   : > { %1231 = vmatprep.subr.bf16.mxu1 %v1291_v1 }
  0x7f   : > { %1212 = vmatpush3.bf16.msra.mxu0 %v1539_v36 }
  0x80   : > { %1232 = vmatpush3.bf16.msra.mxu1 %v1546_v38  ;;  %1213 = vmatprep.subr.bf16.mxu0 %v1291_v1 }
  0x81   : > { %1233 = vmatprep.subr.bf16.mxu1 %v1291_v1  ;;  %v998_v1 = vld [vmem:[%s1657_s2] ss:$0 sm:$0xff] }
  0x83   : > { %1214 = vmatpush3.bf16.msra.mxu0 %v1553_v39 }
  0x84   : > { %1234 = vmatpush3.bf16.msra.mxu1 %v1560_v42 }
  0x86   : > { %1216 = vmatmul.mubr.bf16.vlgmr.msra.gmra.mrb[12].mxu0 %v1002_v50 }
  0x87   : > { %1236 = vmatmul.mubr.bf16.vlgmr.msra.gmra.mrb[12].mxu1 %v796_v51 }
  0xf9   : > { %v338_v52 = vpop.f32.mrb[0].mxu0 }
  0xfa   : > { %v426_v53 = vpop.f32.mrb[0].mxu1  ;;  %v1097_v54 = vpop.f32.mrb[1].mxu0 }
  0xfb   : > { %v427_v55 = vadd.f32 %v426_v53, %v338_v52  ;;  %v1117_v56 = vpop.f32.mrb[1].mxu1  ;;  %v341_v57 = vpop.f32.mrb[2].mxu0 }
  0xfc   : > { %v429_v58 = vpop.f32.mrb[2].mxu1  ;;  %v1098_v59 = vpop.f32.mrb[3].mxu0 }
  0xfd   : > { %v1118_v60 = vpop.f32.mrb[3].mxu1 }
 0x119   : > { %v516_v61 = vpop.f32.mrb[4].mxu0 }
 0x11a   : > { %v522_v62 = vadd.f32 %v516_v61, %v427_v55  ;;  %v622_v63 = vpop.f32.mrb[4].mxu1  ;;  %v1137_v0 = vpop.f32.mrb[5].mxu0 }
 0x11b   : > { %v1157_v2 = vpop.f32.mrb[5].mxu1  ;;  %v519_v3 = vpop.f32.mrb[6].mxu0 }
 0x11c   : > { %v628_v4 = vadd.f32 %v622_v63, %v522_v62  ;;  %v625_v5 = vpop.f32.mrb[6].mxu1  ;;  %v1138_v6 = vpop.f32.mrb[7].mxu0 }
 0x11d   : > { %v1158_v7 = vpop.f32.mrb[7].mxu1 }
 0x11e   : > { %v635_v8 = vadd.f32 %v998_v1, %v628_v4 }
 0x120   : > { %v636_v9 = vmax.f32 %v635_v8, 0.0 }
 0x122   : > { %v637_v10 = vpack.c.bf16 %v636_v9, %v636_v9 }
 0x124   : > { %639 = vst.msk [vmem:[%s1648_s11] sm:$0x1] %vm638_vm1, %v637_v10 }
 0x139   : > { %v692_v11 = vpop.f32.mrb[8].mxu0 }
 0x13a   : > { %v732_v12 = vpop.f32.mrb[8].mxu1  ;;  %v1177_v13 = vpop.f32.mrb[9].mxu0 }
 0x13b   : > { %v733_v14 = vadd.f32 %v732_v12, %v692_v11  ;;  %v1197_v15 = vpop.f32.mrb[9].mxu1  ;;  %v695_v16 = vpop.f32.mrb[10].mxu0 }
 0x13c   : > { %v735_v17 = vpop.f32.mrb[10].mxu1  ;;  %v1178_v18 = vpop.f32.mrb[11].mxu0 }
 0x13d   : > { %v1198_v19 = vpop.f32.mrb[11].mxu1 }
 0x159   : > { %v774_v23 = vpop.f32.mrb[12].mxu0 }
 0x15a   : > { %v780_v24 = vadd.f32 %v774_v23, %v733_v14  ;;  %v832_v25 = vpop.f32.mrb[12].mxu1  ;;  %v1217_v26 = vpop.f32.mrb[13].mxu0 }
 0x15b   : > { %v1237_v27 = vpop.f32.mrb[13].mxu1  ;;  %v777_v28 = vpop.f32.mrb[14].mxu0 }
 0x15c   : > { %v838_v29 = vadd.f32 %v832_v25, %v780_v24  ;;  %v835_v32 = vpop.f32.mrb[14].mxu1  ;;  %v1218_v33 = vpop.f32.mrb[15].mxu0 }
 0x15d   : > { %v1238_v34 = vpop.f32.mrb[15].mxu1 }
 0x15e   : > { %v839_v35 = vadd.f32 %v998_v1, %v838_v29 }
 0x160   : > { %v840_v36 = vmax.f32 %v839_v35, 0.0 }
 0x162   : > { %v841_v38 = vpack.c.bf16 %v840_v36, %v840_v36 }
 0x164   : > { %v849_v39 = vrot.slane %v841_v38, %v848_v37 }
 0x166   : > { %v850_v40 = vrot.slane %v849_v39, 7 }
 0x168   : > { %853 = vst.msk [vmem:[%s1648_s11] sm:$0x2] %vm852_vm2, %v850_v40 }
 0x169 PF: > { %s13_s12 = sadd.s32 1, %s1289_s12  }
 0x16a   : > { %p10_p4 = scmp.ge.s32.totalorder %s13_s12, 4  }
 0x16c   :  { %12 = sbr.rel (!%p10_p4) target bundleno = 1 (0x1), region = 67 }

// kernel: encoder_simple.7
= control target key start
LH: loop header
LB: loop body
LE: loop exit
PB: predicated region body
PF: predicated region fallthrough
CT: control target
= control target key end

     0   :  { %s1355_s12 = smov 0   ;;  %s1585_s0 = inlined_call_operand.vmem [shape: bf16[2,2,2,256], index: 0, kind: input, shape index: {}]   ;;  %s1586_s1 = inlined_call_operand.vmem [shape: bf16[4,256,128], index: 1, kind: input, shape index: {}]   ;;  %s1587_s2 = inlined_call_operand.vmem [shape: f32[1,128], index: 2, kind: input, shape index: {}]   ;;  %s1588_s3 = inlined_call_operand.vmem [shape: bf16[2,1,128], index: 3, kind: output, shape index: {}]  }
   0x1 LB: > { %s992_s13 = sadd.s32 4294967295, %s1332_s12   ;;  %p996_p0 = scmp.ge.s32.totalorder %s1332_s12, 1  ;;  %s1332_s12 = sphi %s1355_s12, %s13_s12  }
   0x2   : > { %p136_p1 = scmp.lt.s32.totalorder %s1332_s12, 3 }
   0x4   : > { %p137_p2 = pnand %p996_p0, %p136_p1 }
   0x5   : > { %v1262_v0 = vld [vmem:[%s1586_s1 + $0xc0] sm:$0xff] (!%p137_p2)   ;;  %v1266_v4 = vld [vmem:[%s1586_s1 + $0xc8] sm:$0xff] (!%p137_p2)   ;;  %v1270_v8 = vld [vmem:[%s1586_s1 + $0xd0] sm:$0xff] (!%p137_p2)   ;;  %p157_p3 = scmp.lt.s32.totalorder (!%p137_p2), %s992_s13, 1  ;;  %v310_v30 = vlaneseq (!%p137_p2)  ;;  %v1334_v34 = vmov (!%p137_p2), 1966171168  }
   0x6   : > { %140 = sbr.rel (%p137_p2) target bundleno = 298 (0x12a), region = 32  ;;  %v1263_v1 = vld [vmem:[%s1586_s1 + $0x40] sm:$0xff] (!%p137_p2)   ;;  %1165 = vmatprep.subr.bf16.mxu0 (!%p137_p2), %v1262_v0  ;;  %v1267_v5 = vld [vmem:[%s1586_s1 + $0x48] sm:$0xff] (!%p137_p2)   ;;  %v1271_v9 = vld [vmem:[%s1586_s1 + $0x50] sm:$0xff] (!%p137_p2)   ;;  %v308_v35 = vunpack.c.l.s4 (!%p137_p2), %v1334_v34  ;;  %vm939_vm0 = vcmask (!%p137_p2), 1040384  }
   0x7   : > { %v1264_v2 = vld [vmem:[%s1586_s1 + $0x80] sm:$0xff] (!%p137_p2)   ;;  %1187 = vmatprep.subr.bf16.mxu1 (!%p137_p2), %v1263_v1  ;;  %v1268_v6 = vld [vmem:[%s1586_s1 + $0x88] sm:$0xff] (!%p137_p2)   ;;  %v1272_v10 = vld [vmem:[%s1586_s1 + $0x90] sm:$0xff] (!%p137_p2)   ;;  %v311_v36 = vshrl.u32 (!%p137_p2), %v310_v30, 7  ;;  %vm940_vm1 = vsmask.f32 (!%p137_p2), 256 }
   0x8   : > { %v1265_v3 = vld [vmem:[%s1586_s1] sm:$0xff] (!%p137_p2)   ;;  %1166 = vmatpush3.bf16.msra.mxu0 (!%p137_p2), %v1264_v2  ;;  %v1269_v7 = vld [vmem:[%s1586_s1 + $0x8] sm:$0xff] (!%p137_p2)   ;;  %v1273_v11 = vld [vmem:[%s1586_s1 + $0x10] sm:$0xff] (!%p137_p2)   ;;  %v309_v40 = vunpack.c.0.s8 (!%p137_p2), %v308_v35 }
   0x9   : > { %1188 = vmatpush3.bf16.msra.mxu1 (!%p137_p2), %v1265_v3  ;;  %1167 = vmatprep.subr.bf16.mxu0 (!%p137_p2), %v1266_v4  ;;  %v1274_v12 = vld [vmem:[%s1586_s1 + $0xd8] sm:$0xff] (!%p137_p2)   ;;  %v1278_v16 = vld [vmem:[%s1586_s1 + $0xe0] sm:$0xff] (!%p137_p2)   ;;  %v1282_v20 = vld [vmem:[%s1586_s1 + $0xe8] sm:$0xff] (!%p137_p2)  }
   0xa   : > { %1189 = vmatprep.subr.bf16.mxu1 (!%p137_p2), %v1267_v5  ;;  %v1275_v13 = vld [vmem:[%s1586_s1 + $0x58] sm:$0xff] (!%p137_p2)   ;;  %v1279_v17 = vld [vmem:[%s1586_s1 + $0x60] sm:$0xff] (!%p137_p2)   ;;  %v1283_v21 = vld [vmem:[%s1586_s1 + $0x68] sm:$0xff] (!%p137_p2)   ;;  %v1478_v41 = vsub.s32 (!%p137_p2), %v309_v40, %v311_v36 }
   0xb   : > { %v1276_v14 = vld [vmem:[%s1586_s1 + $0x98] sm:$0xff] (!%p137_p2)   ;;  %v1280_v18 = vld [vmem:[%s1586_s1 + $0xa0] sm:$0xff] (!%p137_p2)   ;;  %v1284_v22 = vld [vmem:[%s1586_s1 + $0xa8] sm:$0xff] (!%p137_p2)  }
   0xc   : > { %1168 = vmatpush3.bf16.msra.mxu0 (!%p137_p2), %v1268_v6  ;;  %v1277_v15 = vld [vmem:[%s1586_s1 + $0x18] sm:$0xff] (!%p137_p2)   ;;  %v1281_v19 = vld [vmem:[%s1586_s1 + $0x20] sm:$0xff] (!%p137_p2)   ;;  %v1285_v23 = vld [vmem:[%s1586_s1 + $0x28] sm:$0xff] (!%p137_p2)  }
   0xd   : > { %1190 = vmatpush3.bf16.msra.mxu1 %v1269_v7  ;;  %1169 = vmatprep.subr.bf16.mxu0 %v1270_v8  ;;  %s1590_s13 = smov (!%p157_p3, %s992_s13), 1  ;;  %v1286_v24 = vld [vmem:[%s1586_s1 + $0xf0] sm:$0xff]   ;;  %v1290_v28 = vld [vmem:[%s1586_s1 + $0xf8] sm:$0xff]   ;;  %v1294_v37 = vld [vmem:[%s1586_s1 + $0x140] sm:$0xff]  }
   0xe   : > { %1191 = vmatprep.subr.bf16.mxu1 %v1271_v9  ;;  %v1287_v25 = vld [vmem:[%s1586_s1 + $0x70] sm:$0xff]   ;;  %s997_s18 = sshll.u32 %s1590_s13, 2  ;;  %v1291_v29 = vld [vmem:[%s1586_s1 + $0x78] sm:$0xff]   ;;  %v1295_v38 = vld [vmem:[%s1586_s1 + $0x1c0] sm:$0xff]   ;;  %s163_s26 = scalar_lea.vmem %s1588_s3, %s1590_s13 }
   0xf   : > { %v1288_v26 = vld [vmem:[%s1586_s1 + $0xb0] sm:$0xff]   ;;  %s1463_s27 = scalar_lea.vmem %s1585_s0, %s997_s18  ;;  %v1292_v31 = vld [vmem:[%s1586_s1 + $0xb8] sm:$0xff]   ;;  %v1296_v44 = vld [vmem:[%s1586_s1 + $0x100] sm:$0xff]  }
  0x10   : > { %1170 = vmatpush3.bf16.msra.mxu0 %v1272_v10  ;;  %v1289_v27 = vld [vmem:[%s1586_s1 + $0x30] sm:$0xff]   ;;  %v1293_v32 = vld [vmem:[%s1586_s1 + $0x38] sm:$0xff]   ;;  %v1094_v33 = vld.sshfl [vmem:[%s1463_s27] sm:$0x11 pattern:$0x75316420] }
  0x11   : > { %1192 = vmatpush3.bf16.msra.mxu1 %v1273_v11  ;;  %1171 = vmatprep.subr.bf16.mxu0 %v1274_v12  ;;  %v306_v39 = vcombine.high %v1094_v33, %v1094_v33  ;;  %v313_v43 = vrot.slane %v1094_v33, %v1478_v41  ;;  %v1297_v45 = vld [vmem:[%s1586_s1 + $0x180] sm:$0xff]   ;;  %v1299_v46 = vld [vmem:[%s1586_s1 + $0x1c8] sm:$0xff]   ;;  %v1303_v51 = vld [vmem:[%s1586_s1 + $0x1d0] sm:$0xff]  }
  0x12   : > { %1193 = vmatprep.subr.bf16.mxu1 %v1275_v13  ;;  %v1298_v49 = vld [vmem:[%s1586_s1 + $0x148] sm:$0xff]   ;;  %v1302_v53 = vld [vmem:[%s1586_s1 + $0x150] sm:$0xff]   ;;  %v1307_v55 = vld [vmem:[%s1586_s1 + $0x1d8] sm:$0xff]  }
  0x13   : > { %v320_v42 = vrot.slane %v306_v39, %v1478_v41  ;;  %v322_v48 = vshrl.u32 %v313_v43, 16  ;;  %v1301_v50 = vld [vmem:[%s1586_s1 + $0x188] sm:$0xff]   ;;  %v1305_v54 = vld [vmem:[%s1586_s1 + $0x190] sm:$0xff]   ;;  %v1306_v57 = vld [vmem:[%s1586_s1 + $0x158] sm:$0xff]  }
  0x14   : > { %1172 = vmatpush3.bf16.msra.mxu0 %v1276_v14  ;;  %v1300_v52 = vld [vmem:[%s1586_s1 + $0x108] sm:$0xff]   ;;  %v1304_v56 = vld [vmem:[%s1586_s1 + $0x110] sm:$0xff]   ;;  %v1309_v58 = vld [vmem:[%s1586_s1 + $0x198] sm:$0xff]  }
  0x15   : > { %1194 = vmatpush3.bf16.msra.mxu1 %v1277_v15  ;;  %1173 = vmatprep.subr.bf16.mxu0 %v1278_v16  ;;  %v325_v47 = vshrl.u32 %v320_v42, 16  ;;  %v1311_v59 = vld [vmem:[%s1586_s1 + $0x1e0] sm:$0xff]   ;;  %v1308_v60 = vld [vmem:[%s1586_s1 + $0x118] sm:$0xff]   ;;  %v1315_v63 = vld [vmem:[%s1586_s1 + $0x1e8] sm:$0xff]  }
  0x16   : > { %1195 = vmatprep.subr.bf16.mxu1 %v1279_v17  ;;  %595 = vmatprep.mubr.bf16.mxu1 %v320_v42  ;;  %v1310_v61 = vld [vmem:[%s1586_s1 + $0x160] sm:$0xff]   ;;  %v1314_v1 = vld [vmem:[%s1586_s1 + $0x168] sm:$0xff]   ;;  %v1319_v3 = vld [vmem:[%s1586_s1 + $0x1f0] sm:$0xff]  }
  0x17   : > { %457 = vmatprep.mubr.bf16.mxu0 %v325_v47  ;;  %v1313_v62 = vld [vmem:[%s1586_s1 + $0x1a0] sm:$0xff]   ;;  %v1317_v2 = vld [vmem:[%s1586_s1 + $0x1a8] sm:$0xff]   ;;  %v1318_v5 = vld [vmem:[%s1586_s1 + $0x170] sm:$0xff]  }
  0x18   : > { %1174 = vmatpush3.bf16.msra.mxu0 %v1280_v18  ;;  %v1312_v0 = vld [vmem:[%s1586_s1 + $0x120] sm:$0xff]   ;;  %v1316_v4 = vld [vmem:[%s1586_s1 + $0x128] sm:$0xff]   ;;  %v1321_v6 = vld [vmem:[%s1586_s1 + $0x1b0] sm:$0xff]  }
  0x19   : > { %1196 = vmatpush3.bf16.msra.mxu1 %v1281_v19  ;;  %1175 = vmatprep.subr.bf16.mxu0 %v1282_v20  ;;  %v1323_v7 = vld [vmem:[%s1586_s1 + $0x1f8] sm:$0xff]   ;;  %v1320_v8 = vld [vmem:[%s1586_s1 + $0x130] sm:$0xff]   ;;  %v1128_v9 = vld.sshfl [vmem:[%s1463_s27 + $0x2] sm:$0x11 pattern:$0x75316420] }
  0x1a   : > { %1197 = vmatprep.subr.bf16.mxu1 %v1283_v21  ;;  %v1322_v10 = vld [vmem:[%s1586_s1 + $0x178] sm:$0xff]   ;;  %v613_v11 = vcombine.high %v1128_v9, %v1128_v9  ;;  %v620_v12 = vrot.slane %v1128_v9, %v1478_v41  ;;  %v296_v40 = vld [vmem:[%s1587_s2] sm:$0x1]  ;;  %vm941_vm2 = vmand %vm939_vm0, %vm940_vm1 }
  0x1b   : > { %v1325_v13 = vld [vmem:[%s1586_s1 + $0x1b8] sm:$0xff]  }
  0x1c   : > { %1176 = vmatpush3.bf16.msra.mxu0 %v1284_v22  ;;  %v627_v14 = vrot.slane %v613_v11, %v1478_v41  ;;  %v1324_v15 = vld [vmem:[%s1586_s1 + $0x138] sm:$0xff]   ;;  %v792_v17 = vshrl.u32 %v620_v12, 16 }
  0x1d   : > { %1198 = vmatpush3.bf16.msra.mxu1 %v1285_v23  ;;  %1177 = vmatprep.subr.bf16.mxu0 %v1286_v24 }
  0x1e   : > { %1199 = vmatprep.subr.bf16.mxu1 %v1287_v25  ;;  %v795_v16 = vshrl.u32 %v627_v14, 16 }
  0x20   : > { %1178 = vmatpush3.bf16.msra.mxu0 %v1288_v26 }
  0x21   : > { %1200 = vmatpush3.bf16.msra.mxu1 %v1289_v27  ;;  %1179 = vmatprep.subr.bf16.mxu0 %v1290_v28 }
  0x22   : > { %1201 = vmatprep.subr.bf16.mxu1 %v1291_v29 }
  0x24   : > { %1180 = vmatpush3.bf16.msra.mxu0 %v1292_v31 }
  0x25   : > { %1202 = vmatpush3.bf16.msra.mxu1 %v1293_v32  ;;  %1209 = vmatprep.subr.bf16.mxu0 %v1294_v37 }
  0x26   : > { %1231 = vmatprep.subr.bf16.mxu1 %v1295_v38 }
  0x27   : > { %458 = vmatmul.mubr.bf16.vlgmr.msra.gmra.mrb[0].mxu0 %v322_v48 }
  0x28   : > { %596 = vmatmul.mubr.bf16.vlgmr.msra.gmra.mrb[0].mxu1 %v313_v43  ;;  %1210 = vmatpush3.bf16.msra.mxu0 %v1296_v44  ;;  %v942_v44 = vld [vmem:[%s163_s26] sm:$0x1] }
  0x29   : > { %1232 = vmatpush3.bf16.msra.mxu1 %v1297_v45  ;;  %1211 = vmatprep.subr.bf16.mxu0 %v1298_v49 }
  0x2a   : > { %1233 = vmatprep.subr.bf16.mxu1 %v1299_v46  ;;  %758 = vmatprep.mubr.bf16.mxu0 %v627_v14 }
  0x2b   : > { %927 = vmatprep.mubr.bf16.mxu1 %v795_v16 }
  0x2c   : > { %1212 = vmatpush3.bf16.msra.mxu0 %v1300_v52 }
  0x2d   : > { %1234 = vmatpush3.bf16.msra.mxu1 %v1301_v50  ;;  %1213 = vmatprep.subr.bf16.mxu0 %v1302_v53 }
  0x2e   : > { %1235 = vmatprep.subr.bf16.mxu1 %v1303_v51 }
  0x30   : > { %1214 = vmatpush3.bf16.msra.mxu0 %v1304_v56 }
  0x31   : > { %1236 = vmatpush3.bf16.msra.mxu1 %v1305_v54  ;;  %1215 = vmatprep.subr.bf16.mxu0 %v1306_v57 }
  0x32   : > { %1237 = vmatprep.subr.bf16.mxu1 %v1307_v55 }
  0x34   : > { %1216 = vmatpush3.bf16.msra.mxu0 %v1308_v60 }
  0x35   : > { %1238 = vmatpush3.bf16.msra.mxu1 %v1309_v58  ;;  %1217 = vmatprep.subr.bf16.mxu0 %v1310_v61 }
  0x36   : > { %1239 = vmatprep.subr.bf16.mxu1 %v1311_v59 }
  0x38   : > { %1218 = vmatpush3.bf16.msra.mxu0 %v1312_v0 }
  0x39   : > { %1240 = vmatpush3.bf16.msra.mxu1 %v1313_v62  ;;  %1219 = vmatprep.subr.bf16.mxu0 %v1314_v1 }
  0x3a   : > { %1241 = vmatprep.subr.bf16.mxu1 %v1315_v63 }
  0x3c   : > { %1220 = vmatpush3.bf16.msra.mxu0 %v1316_v4 }
  0x3d   : > { %1242 = vmatpush3.bf16.msra.mxu1 %v1317_v2  ;;  %1221 = vmatprep.subr.bf16.mxu0 %v1318_v5 }
  0x3e   : > { %1243 = vmatprep.subr.bf16.mxu1 %v1319_v3 }
  0x40   : > { %1222 = vmatpush3.bf16.msra.mxu0 %v1320_v8 }
  0x41   : > { %1244 = vmatpush3.bf16.msra.mxu1 %v1321_v6  ;;  %1223 = vmatprep.subr.bf16.mxu0 %v1322_v10 }
  0x42   : > { %1245 = vmatprep.subr.bf16.mxu1 %v1323_v7 }
  0x44   : > { %1224 = vmatpush3.bf16.msra.mxu0 %v1324_v15 }
  0x45   : > { %1246 = vmatpush3.bf16.msra.mxu1 %v1325_v13 }
  0x47   : > { %759 = vmatmul.mubr.bf16.vlgmr.msra.gmra.mrb[4].mxu0 %v620_v12 }
  0x48   : > { %928 = vmatmul.mubr.bf16.vlgmr.msra.gmra.mrb[4].mxu1 %v792_v17 }
  0xfa   : > { %v1181_v20 = vpop.f32.mrb[0].mxu0 }
  0xfb   : > { %v1203_v18 = vpop.f32.mrb[0].mxu1  ;;  %v1182_v23 = vpop.f32.mrb[1].mxu0 }
  0xfc   : > { %v1204_v19 = vpop.f32.mrb[1].mxu1  ;;  %v1183_v25 = vadd.f32 %v1182_v23, %v1181_v20  ;;  %v1184_v26 = vpop.f32.mrb[2].mxu0 }
  0xfd   : > { %v1205_v21 = vadd.f32 %v1204_v19, %v1203_v18  ;;  %v1206_v22 = vpop.f32.mrb[2].mxu1  ;;  %v1185_v27 = vpop.f32.mrb[3].mxu0 }
  0xfe   : > { %v1207_v24 = vpop.f32.mrb[3].mxu1 }
  0xff   : > { %v598_v28 = vadd.f32 %v1205_v21, %v1183_v25 }
 0x11a   : > { %v1225_v31 = vpop.f32.mrb[4].mxu0 }
 0x11b   : > { %v1247_v29 = vpop.f32.mrb[4].mxu1  ;;  %v1226_v34 = vpop.f32.mrb[5].mxu0 }
 0x11c   : > { %v1248_v30 = vpop.f32.mrb[5].mxu1  ;;  %v1227_v36 = vadd.f32 %v1226_v34, %v1225_v31  ;;  %v1228_v37 = vpop.f32.mrb[6].mxu0 }
 0x11d   : > { %v1249_v32 = vadd.f32 %v1248_v30, %v1247_v29  ;;  %v1250_v33 = vpop.f32.mrb[6].mxu1  ;;  %v1229_v38 = vpop.f32.mrb[7].mxu0 }
 0x11e   : > { %v1251_v35 = vpop.f32.mrb[7].mxu1  ;;  %v766_v39 = vadd.f32 %v1227_v36, %v598_v28 }
 0x120   : > { %v935_v41 = vadd.f32 %v1249_v32, %v766_v39 }
 0x122   : > { %v936_v42 = vadd.f32 %v935_v41, %v296_v40 }
 0x124   : > { %v937_v43 = vmax.f32 %v936_v42, 0.0 }
 0x126   : > { %v938_v45 = vpack.c.bf16 %v937_v43, %v937_v43 }
 0x128   : > { %v943_v46 = vsel %vm941_vm2, %v938_v45, %v942_v44 }
 0x129   : > { %944 = vst [vmem:[%s163_s26] sm:$0x1] %v943_v46 }
 0x12a PF: > { %s13_s12 = sadd.s32 1, %s1332_s12  }
 0x12b   : > { %p10_p4 = scmp.ge.s32.totalorder %s13_s12, 4  }
 0x12d   :  { %12 = sbr.rel (!%p10_p4) target bundleno = 1 (0x1), region = 66 }

</bundles_post_ra>
